<compile_context>
chip_gen: v7x
topology: tpu7x:2x2x1
jax: 0.10.0
libtpu: 0.0.40
codegen_flags: <defaults>
</compile_context>

<pallas_src>
import jax
import jax.numpy as jnp
from jax.experimental import pallas as pl
from jax.experimental.pallas import tpu as pltpu

LANE = 128                      # pad channel dims to a multiple of the lane width
EPS = 1e-5                      # nn.BatchNorm2d default
_OFF = 16                       # bf16-sublane-aligned column offset of the image in the slab
_TH = 8                         # target rows per grid step (H tile)
_VMEM_LIMIT = 32 * 1024 * 1024  # explicit scoped-VMEM budget (safe on v5e/v6e/v7x)


def _round_up(v, m):
    return -(-v // m) * m


# ----------------------------------------------------------------------------
# in-kernel helpers
# ----------------------------------------------------------------------------
def _halo_stage(xpad, center, up, down, t, th, wdt):
    """Stage a bf16 tile plus its 1-row halos into the zero-guarded VMEM slab.

    Slab layout: row 0 = halo above, rows 1..th = tile, row th+1 = halo below; image
    columns live at [_OFF, _OFF+wdt); guard columns _OFF-1 and _OFF+wdt are kept zero
    (left/right conv padding).  Only the border is zeroed, never the whole slab."""
    cin = xpad.shape[-1]
    zcol = jnp.zeros((th + 2, 1, cin), jnp.bfloat16)
    xpad[:, _OFF - 1:_OFF, :] = zcol
    xpad[:, _OFF + wdt:_OFF + wdt + 1, :] = zcol
    xpad[1:th + 1, _OFF:_OFF + wdt, :] = center
    xpad[0:1, _OFF:_OFF + wdt, :] = up
    xpad[th + 1:th + 2, _OFF:_OFF + wdt, :] = down

    zrow = jnp.zeros((1, wdt, cin), jnp.bfloat16)

    @pl.when(t == 0)                       # top of image: conv pad row is zero
    def _():
        xpad[0:1, _OFF:_OFF + wdt, :] = zrow

    @pl.when(t == pl.num_programs(1) - 1)  # bottom of image
    def _():
        xpad[th + 1:th + 2, _OFF:_OFF + wdt, :] = zrow


def _conv3x3_from_slab(xpad, w_ref, th, wdt):
    """3x3 conv of the staged slab: one kw-expanded view + 3 kh-tap MXU dots, f32 acc."""
    cin = xpad.shape[-1]
    ncols = w_ref.shape[-1]
    # kw-expanded slab built once: (th+2, wdt, 3*cin) bf16
    slab3 = jnp.concatenate(
        [xpad[:, _OFF - 1:_OFF - 1 + wdt, :],
         xpad[:, _OFF:_OFF + wdt, :],
         xpad[:, _OFF + 1:_OFF + 1 + wdt, :]], axis=-1)
    acc = jnp.zeros((th * wdt, ncols), jnp.float32)
    for kh in range(3):                                # accumulate over kh taps, K = 3*cin
        patch = slab3[kh:kh + th].reshape(th * wdt, 3 * cin)
        acc = acc + jnp.dot(patch, w_ref[kh], preferred_element_type=jnp.float32)
    return acc


def _partial_stats(acc):
    """acc: (rows, c) f32 -> (1, 1, 2, c) [sum, sumsq] partial BN stats for this tile."""
    s = jnp.sum(acc, axis=0, keepdims=True)
    ss = jnp.sum(acc * acc, axis=0, keepdims=True)
    return jnp.concatenate([s, ss], axis=0)[None, None]


# ----------------------------------------------------------------------------
# kernel A: conv1 (3x3) [+ packed 1x1 shortcut columns] + partial BN stats
# ----------------------------------------------------------------------------
def _conv1_kernel(xc_ref, xu_ref, xd_ref, w_ref, y_ref, st_ref, xpad):
    t = pl.program_id(1)
    _, th, wdt, _ = xc_ref.shape
    ncols = w_ref.shape[-1]
    _halo_stage(xpad, xc_ref[0], xu_ref[0], xd_ref[0], t, th, wdt)
    acc = _conv3x3_from_slab(xpad, w_ref, th, wdt)
    y_ref[...] = acc.reshape(1, th, wdt, ncols).astype(y_ref.dtype)
    st_ref[...] = _partial_stats(acc)


# ----------------------------------------------------------------------------
# kernel B: BN1-apply + ReLU + conv2 (3x3) + partial BN2 stats
# ----------------------------------------------------------------------------
def _bn_relu_conv2_kernel(yc_ref, yu_ref, yd_ref, sc_ref, sh_ref, w_ref,
                          y2_ref, st_ref, xpad):
    t = pl.program_id(1)
    _, th, wdt, c = yc_ref.shape
    sc = sc_ref[...].reshape(1, 1, c)
    sh = sh_ref[...].reshape(1, 1, c)

    def bn_relu(v):    # BN1-apply + ReLU in f32, single cast to bf16 for staging
        return jnp.maximum(v.astype(jnp.float32) * sc + sh, 0.0).astype(jnp.bfloat16)

    _halo_stage(xpad, bn_relu(yc_ref[0]), bn_relu(yu_ref[0]), bn_relu(yd_ref[0]),
                t, th, wdt)
    acc = _conv3x3_from_slab(xpad, w_ref, th, wdt)
    y2_ref[...] = acc.reshape(1, th, wdt, acc.shape[-1]).astype(y2_ref.dtype)
    st_ref[...] = _partial_stats(acc)


# ----------------------------------------------------------------------------
# kernel C: BN2-apply (+ shortcut BN-apply) + residual add + ReLU (pointwise)
# ----------------------------------------------------------------------------
def _bn_add_relu_ds_kernel(y2_ref, sc2_ref, sh2_ref, id_ref, scd_ref, shd_ref, o_ref):
    _, th, wdt, c = y2_ref.shape
    y = (y2_ref[0].astype(jnp.float32) * sc2_ref[...].reshape(1, 1, c)
         + sh2_ref[...].reshape(1, 1, c))
    idv = (id_ref[0].astype(jnp.float32) * scd_ref[...].reshape(1, 1, c)
           + shd_ref[...].reshape(1, 1, c))
    o_ref[...] = jnp.maximum(y + idv, 0.0)[None]


def _bn_add_relu_id_kernel(y2_ref, sc2_ref, sh2_ref, id_ref, o_ref):
    _, th, wdt, c = y2_ref.shape
    y = (y2_ref[0].astype(jnp.float32) * sc2_ref[...].reshape(1, 1, c)
         + sh2_ref[...].reshape(1, 1, c))
    o_ref[...] = jnp.maximum(y + id_ref[0].astype(jnp.float32), 0.0)[None]


# ----------------------------------------------------------------------------
# pallas_call wrappers
# ----------------------------------------------------------------------------
def _conv_specs(th, h, wdt, cin):
    """Center tile + clamped 1-row halo-above/-below specs over an (N, H, W, C') array.
    Last-dim block index 0 -> reads only the first `cin` channels of a packed array."""
    center = pl.BlockSpec((1, th, wdt, cin), lambda b, t: (b, t, 0, 0))
    up = pl.BlockSpec((1, 1, wdt, cin),
                      lambda b, t: (b, jnp.maximum(t * th - 1, 0), 0, 0))
    down = pl.BlockSpec((1, 1, wdt, cin),
                        lambda b, t: (b, jnp.minimum(t * th + th, h - 1), 0, 0))
    return center, up, down


def _conv1_pallas(x, w1k, th):
    n, h, wdt, cinp = x.shape
    ncols = w1k.shape[-1]
    nht = h // th
    center, up, down = _conv_specs(th, h, wdt, cinp)
    flops = 2 * n * h * wdt * 9 * cinp * ncols
    bytes_accessed = (2 * n * h * wdt * cinp + 2 * n * h * wdt * ncols
                      + 4 * n * nht * 2 * ncols + 2 * 9 * cinp * ncols)
    return pl.pallas_call(
        _conv1_kernel,
        grid=(n, nht),
        in_specs=[center, up, down,
                  pl.BlockSpec((3, 3 * cinp, ncols), lambda b, t: (0, 0, 0))],
        out_specs=(pl.BlockSpec((1, th, wdt, ncols), lambda b, t: (b, t, 0, 0)),
                   pl.BlockSpec((1, 1, 2, ncols), lambda b, t: (b, t, 0, 0))),
        out_shape=(jax.ShapeDtypeStruct((n, h, wdt, ncols), jnp.bfloat16),
                   jax.ShapeDtypeStruct((n, nht, 2, ncols), jnp.float32)),
        scratch_shapes=[pltpu.VMEM((th + 2, wdt + 2 * _OFF, cinp), jnp.bfloat16)],
        compiler_params=pltpu.CompilerParams(
            dimension_semantics=("parallel", "parallel"),
            vmem_limit_bytes=_VMEM_LIMIT),
        cost_estimate=pl.CostEstimate(flops=flops, transcendentals=0,
                                      bytes_accessed=bytes_accessed),
    )(x, x, x, w1k)


def _conv2_pallas(ycat, sc1, sh1, w2k, th):
    n, h, wdt, _ = ycat.shape
    c = w2k.shape[-1]
    nht = h // th
    center, up, down = _conv_specs(th, h, wdt, c)
    vec = pl.BlockSpec((1, c), lambda b, t: (0, 0))
    flops = 2 * n * h * wdt * 9 * c * c + 3 * n * h * wdt * c
    bytes_accessed = (4 * n * h * wdt * c + 4 * n * nht * 2 * c + 2 * 9 * c * c + 8 * c)
    return pl.pallas_call(
        _bn_relu_conv2_kernel,
        grid=(n, nht),
        in_specs=[center, up, down, vec, vec,
                  pl.BlockSpec((3, 3 * c, c), lambda b, t: (0, 0, 0))],
        out_specs=(pl.BlockSpec((1, th, wdt, c), lambda b, t: (b, t, 0, 0)),
                   pl.BlockSpec((1, 1, 2, c), lambda b, t: (b, t, 0, 0))),
        out_shape=(jax.ShapeDtypeStruct((n, h, wdt, c), jnp.bfloat16),
                   jax.ShapeDtypeStruct((n, nht, 2, c), jnp.float32)),
        scratch_shapes=[pltpu.VMEM((th + 2, wdt + 2 * _OFF, c), jnp.bfloat16)],
        compiler_params=pltpu.CompilerParams(
            dimension_semantics=("parallel", "parallel"),
            vmem_limit_bytes=_VMEM_LIMIT),
        cost_estimate=pl.CostEstimate(flops=flops, transcendentals=0,
                                      bytes_accessed=bytes_accessed),
    )(ycat, ycat, ycat, sc1, sh1, w2k)


def _bn_add_relu_ds_pallas(y2, sc2, sh2, ycat, scd, shd, th):
    n, h, wdt, c = y2.shape
    nht = h // th
    img = pl.BlockSpec((1, th, wdt, c), lambda b, t: (b, t, 0, 0))
    ident = pl.BlockSpec((1, th, wdt, c), lambda b, t: (b, t, 0, 1))  # shortcut half of ycat
    vec = pl.BlockSpec((1, c), lambda b, t: (0, 0))
    flops = 6 * n * h * wdt * c
    bytes_accessed = 4 * n * h * wdt * c + 4 * n * h * wdt * c
    return pl.pallas_call(
        _bn_add_relu_ds_kernel,
        grid=(n, nht),
        in_specs=[img, vec, vec, ident, vec, vec],
        out_specs=img,
        out_shape=jax.ShapeDtypeStruct((n, h, wdt, c), jnp.float32),
        compiler_params=pltpu.CompilerParams(
            dimension_semantics=("parallel", "parallel"),
            vmem_limit_bytes=_VMEM_LIMIT),
        cost_estimate=pl.CostEstimate(flops=flops, transcendentals=0,
                                      bytes_accessed=bytes_accessed),
    )(y2, sc2, sh2, ycat, scd, shd)


def _bn_add_relu_id_pallas(y2, sc2, sh2, x, th):
    n, h, wdt, c = y2.shape
    nht = h // th
    img = pl.BlockSpec((1, th, wdt, c), lambda b, t: (b, t, 0, 0))
    vec = pl.BlockSpec((1, c), lambda b, t: (0, 0))
    flops = 4 * n * h * wdt * c
    bytes_accessed = 4 * n * h * wdt * c + 4 * n * h * wdt * c
    return pl.pallas_call(
        _bn_add_relu_id_kernel,
        grid=(n, nht),
        in_specs=[img, vec, vec, img],
        out_specs=img,
        out_shape=jax.ShapeDtypeStruct((n, h, wdt, c), jnp.float32),
        compiler_params=pltpu.CompilerParams(
            dimension_semantics=("parallel", "parallel"),
            vmem_limit_bytes=_VMEM_LIMIT),
        cost_estimate=pl.CostEstimate(flops=flops, transcendentals=0,
                                      bytes_accessed=bytes_accessed),
    )(y2, sc2, sh2, x)


# ----------------------------------------------------------------------------
# parameter prep (lane padding, kh-split, shortcut packing) + BN finalize
# ----------------------------------------------------------------------------
def _prep_conv1_weights(w1, wd, cinp, coutp):
    """(3,3,cin,cout) conv1 (+ optional (cin,cout) 1x1 shortcut packed as extra output
    columns, non-zero only at the centre tap) -> (3, 3*cinp, ncols) bf16, kh-split."""
    cin, cout = w1.shape[2], w1.shape[3]
    ncols = 2 * coutp if wd is not None else coutp
    wk = jnp.zeros((3, 3, cinp, ncols), jnp.float32)
    wk = wk.at[:, :, :cin, :cout].set(w1)
    if wd is not None:
        wk = wk.at[1, 1, :cin, coutp:coutp + cout].set(wd)
    return wk.reshape(3, 3 * cinp, ncols).astype(jnp.bfloat16)


def _prep_conv2_weights(w2, coutp):
    cin, cout = w2.shape[2], w2.shape[3]
    wk = jnp.zeros((3, 3, coutp, coutp), jnp.float32).at[:, :, :cin, :cout].set(w2)
    return wk.reshape(3, 3 * coutp, coutp).astype(jnp.bfloat16)


def _prep_affine(g, b, coutp):
    gp = jnp.ones((coutp,), jnp.float32).at[:g.shape[0]].set(g)
    bp = jnp.zeros((coutp,), jnp.float32).at[:b.shape[0]].set(b)
    return gp, bp


def _bn_scale_shift(partial_stats, gamma, beta, count):
    """partial_stats: (N, NHT, 2, C) per-tile [sum, sumsq] -> fused (scale, shift).
    Training-mode BatchNorm2d: batch mean, biased variance, eps=1e-5, affine."""
    tot = jnp.sum(partial_stats, axis=(0, 1))          # (2, C) -- tiny reduction
    mean = tot[0] / count
    var = jnp.maximum(tot[1] / count - mean * mean, 0.0)
    scale = gamma / jnp.sqrt(var + EPS)
    shift = beta - mean * scale
    return scale.reshape(1, -1), shift.reshape(1, -1)


# ----------------------------------------------------------------------------
# BasicBlock forward (NCHW in / NCHW out, matching the PyTorch module).
# Internally NHWC bf16 with channels padded to 128 lanes; in a full network keep
# activations in that layout and hoist the boundary transpose out.
# ----------------------------------------------------------------------------
def basic_block_forward(params, x_nchw):
    n, cin, h, w = x_nchw.shape
    cout = params["w1"].shape[-1]
    downsample = "wd" in params
    if not downsample:
        assert cin == cout, "identity shortcut requires in_ch == out_ch"
    cinp = _round_up(cin, LANE)
    coutp = _round_up(cout, LANE)
    th = _TH if h % _TH == 0 else h
    count = n * h * w

    # single boundary relayout: NCHW -> NHWC, bf16, channels padded to 128 lanes
    x = jnp.transpose(x_nchw, (0, 2, 3, 1)).astype(jnp.bfloat16)
    if cinp != cin:
        x = jnp.pad(x, ((0, 0), (0, 0), (0, 0), (0, cinp - cin)))

    w1k = _prep_conv1_weights(params["w1"], params.get("wd"), cinp, coutp)
    w2k = _prep_conv2_weights(params["w2"], coutp)
    g1, b1 = _prep_affine(params["g1"], params["b1"], coutp)
    g2, b2 = _prep_affine(params["g2"], params["b2"], coutp)

    # A) conv1 (+ packed 1x1 shortcut) + per-tile BN partial stats
    ycat, st1 = _conv1_pallas(x, w1k, th)

    if downsample:
        sc1, sh1 = _bn_scale_shift(st1[..., :coutp], g1, b1, count)
        gd, bd = _prep_affine(params["gd"], params["bd"], coutp)
        scd, shd = _bn_scale_shift(st1[..., coutp:], gd, bd, count)
    else:
        sc1, sh1 = _bn_scale_shift(st1, g1, b1, count)

    # B) BN1-apply + ReLU + conv2 + per-tile BN2 partial stats
    y2, st2 = _conv2_pallas(ycat, sc1, sh1, w2k, th)
    sc2, sh2 = _bn_scale_shift(st2, g2, b2, count)

    # C) BN2-apply (+ shortcut BN-apply) + residual add + ReLU
    if downsample:
        out = _bn_add_relu_ds_pallas(y2, sc2, sh2, ycat, scd, shd, th)
    else:
        out = _bn_add_relu_id_pallas(y2, sc2, sh2, x, th)

    out = out[..., :cout]
    return jnp.transpose(out, (0, 3, 1, 2))            # NHWC -> NCHW


# ----------------------------------------------------------------------------
# pure-JAX reference (f32) for the correctness check
# ----------------------------------------------------------------------------
def _bn_ref(x, g, b):
    mean = jnp.mean(x, axis=(0, 1, 2), keepdims=True)
    var = jnp.mean(jnp.square(x - mean), axis=(0, 1, 2), keepdims=True)
    return (x - mean) / jnp.sqrt(var + EPS) * g.reshape(1, 1, 1, -1) + b.reshape(1, 1, 1, -1)


def _conv_ref(x, w):
    return jax.lax.conv_general_dilated(
        x, w, window_strides=(1, 1), padding="SAME",
        dimension_numbers=("NHWC", "HWIO", "NHWC"))


def basic_block_ref(params, x_nchw):
    x = jnp.transpose(x_nchw, (0, 2, 3, 1))
    identity = x
    out = jnp.maximum(_bn_ref(_conv_ref(x, params["w1"]), params["g1"], params["b1"]), 0.0)
    out = _bn_ref(_conv_ref(out, params["w2"]), params["g2"], params["b2"])
    if "wd" in params:
        identity = _bn_ref(jnp.einsum("nhwc,cd->nhwd", x, params["wd"]),
                           params["gd"], params["bd"])
    out = jnp.maximum(out + identity, 0.0)
    return jnp.transpose(out, (0, 3, 1, 2))


# ----------------------------------------------------------------------------
if __name__ == "__main__":
    def make_params(key, cin, cout, downsample):
        ks = jax.random.split(key, 9)
        p = {
            "w1": 0.1 * jax.random.normal(ks[0], (3, 3, cin, cout), jnp.float32),
            "g1": 1.0 + 0.1 * jax.random.normal(ks[1], (cout,), jnp.float32),
            "b1": 0.1 * jax.random.normal(ks[2], (cout,), jnp.float32),
            "w2": 0.1 * jax.random.normal(ks[3], (3, 3, cout, cout), jnp.float32),
            "g2": 1.0 + 0.1 * jax.random.normal(ks[4], (cout,), jnp.float32),
            "b2": 0.1 * jax.random.normal(ks[5], (cout,), jnp.float32),
        }
        if downsample:
            p["wd"] = 0.1 * jax.random.normal(ks[6], (cin, cout), jnp.float32)
            p["gd"] = 1.0 + 0.1 * jax.random.normal(ks[7], (cout,), jnp.float32)
            p["bd"] = 0.1 * jax.random.normal(ks[8], (cout,), jnp.float32)
        return p

    key = jax.random.PRNGKey(0)
    k_x, k_p1, k_p2 = jax.random.split(key, 3)

    # tolerance: bf16 inter-kernel activations (BN stats stay f32)
    ATOL = RTOL = 3e-2

    # case 1: in_ch != out_ch -> downsample branch (conv1x1 + BN shortcut, packed)
    N, C_IN, C_OUT, H, W = 2, 4, 8, 16, 16
    x = jax.random.normal(k_x, (N, C_IN, H, W), jnp.float32)
    params = make_params(k_p1, C_IN, C_OUT, True)
    out = jax.block_until_ready(jax.jit(basic_block_forward)(params, x))
    ref = jax.block_until_ready(basic_block_ref(params, x))
    assert out.shape == (N, C_OUT, H, W), out.shape
    assert jnp.allclose(out, ref, atol=ATOL, rtol=RTOL), float(jnp.max(jnp.abs(out - ref)))

    # case 2: in_ch == out_ch -> plain identity shortcut
    x2 = jax.random.normal(k_x, (N, C_OUT, H, W), jnp.float32)
    params2 = make_params(k_p2, C_OUT, C_OUT, False)
    out2 = jax.block_until_ready(jax.jit(basic_block_forward)(params2, x2))
    ref2 = jax.block_until_ready(basic_block_ref(params2, x2))
    assert out2.shape == (N, C_OUT, H, W), out2.shape
    assert jnp.allclose(out2, ref2, atol=ATOL, rtol=RTOL), float(jnp.max(jnp.abs(out2 - ref2)))

    print("KERNEL_OK")
</pallas_src>

<mosaic_0001>
module attributes {stable_mosaic.version = 11 : i64} {
  func.func @_conv1_kernel(%arg0: i32, %arg1: i32, %arg2: memref<1x8x16x128xbf16, #tpu.memory_space<vmem>>, %arg3: memref<1x1x16x128xbf16, #tpu.memory_space<vmem>>, %arg4: memref<1x1x16x128xbf16, #tpu.memory_space<vmem>>, %arg5: memref<3x384x256xbf16, #tpu.memory_space<vmem>>, %arg6: memref<1x8x16x256xbf16, #tpu.memory_space<vmem>>, %arg7: memref<1x1x2x256xf32, #tpu.memory_space<vmem>>, %arg8: memref<10x48x128xbf16, #tpu.memory_space<vmem>>) attributes {dimension_semantics = [#tpu.dimension_semantics<parallel>, #tpu.dimension_semantics<parallel>], iteration_bounds = array<i64: 2, 2>, scalar_prefetch = 0 : i64, scratch_operands = 1 : i64, tpu.core_type = #tpu.core_type<tc>, window_params = [{transform_indices = @transform_0, window_bounds = array<i64: 1, 8, 16, 128>}, {transform_indices = @transform_1, window_bounds = array<i64: 1, 1, 16, 128>}, {transform_indices = @transform_2, window_bounds = array<i64: 1, 1, 16, 128>}, {pipeline_mode = #tpu.pipeline_mode<synchronous>, transform_indices = @transform_3, window_bounds = array<i64: 3, 384, 256>}, {transform_indices = @transform_4, window_bounds = array<i64: 1, 8, 16, 256>}, {transform_indices = @transform_5, window_bounds = array<i64: 1, 1, 2, 256>}]} {
    %c0 = arith.constant 0 : index
    %c0_0 = arith.constant 0 : index
    %c0_1 = arith.constant 0 : index
    %c0_2 = arith.constant 0 : index
    %0 = vector.load %arg2[%c0, %c0_0, %c0_1, %c0_2] : memref<1x8x16x128xbf16, #tpu.memory_space<vmem>>, vector<1x8x16x128xbf16>
    %1 = vector.shape_cast %0 : vector<1x8x16x128xbf16> to vector<8x16x128xbf16>
    %c0_3 = arith.constant 0 : index
    %c0_4 = arith.constant 0 : index
    %c0_5 = arith.constant 0 : index
    %c0_6 = arith.constant 0 : index
    %2 = vector.load %arg3[%c0_3, %c0_4, %c0_5, %c0_6] : memref<1x1x16x128xbf16, #tpu.memory_space<vmem>>, vector<1x1x16x128xbf16>
    %3 = vector.shape_cast %2 : vector<1x1x16x128xbf16> to vector<1x16x128xbf16>
    %c0_7 = arith.constant 0 : index
    %c0_8 = arith.constant 0 : index
    %c0_9 = arith.constant 0 : index
    %c0_10 = arith.constant 0 : index
    %4 = vector.load %arg4[%c0_7, %c0_8, %c0_9, %c0_10] : memref<1x1x16x128xbf16, #tpu.memory_space<vmem>>, vector<1x1x16x128xbf16>
    %5 = vector.shape_cast %4 : vector<1x1x16x128xbf16> to vector<1x16x128xbf16>
    %cst = arith.constant 0.000000e+00 : bf16
    %6 = vector.broadcast %cst : bf16 to vector<10x1x128xbf16>
    %c0_11 = arith.constant 0 : index
    %c15 = arith.constant 15 : index
    %c0_12 = arith.constant 0 : index
    %7 = vector.load %arg8[%c0_11, %c15, %c0_12] : memref<10x48x128xbf16, #tpu.memory_space<vmem>>, vector<10x1x128xbf16>
    tpu.vector_store %arg8[%c0_11, %c15, %c0_12], %6 {strides = array<i32>} : memref<10x48x128xbf16, #tpu.memory_space<vmem>>, vector<10x1x128xbf16>,
    %c0_13 = arith.constant 0 : index
    %c32 = arith.constant 32 : index
    %c0_14 = arith.constant 0 : index
    %8 = vector.load %arg8[%c0_13, %c32, %c0_14] : memref<10x48x128xbf16, #tpu.memory_space<vmem>>, vector<10x1x128xbf16>
    tpu.vector_store %arg8[%c0_13, %c32, %c0_14], %6 {strides = array<i32>} : memref<10x48x128xbf16, #tpu.memory_space<vmem>>, vector<10x1x128xbf16>,
    %c1 = arith.constant 1 : index
    %c16 = arith.constant 16 : index
    %c0_15 = arith.constant 0 : index
    %9 = vector.load %arg8[%c1, %c16, %c0_15] : memref<10x48x128xbf16, #tpu.memory_space<vmem>>, vector<8x16x128xbf16>
    tpu.vector_store %arg8[%c1, %c16, %c0_15], %1 {strides = array<i32>} : memref<10x48x128xbf16, #tpu.memory_space<vmem>>, vector<8x16x128xbf16>,
    %c0_16 = arith.constant 0 : index
    %c16_17 = arith.constant 16 : index
    %c0_18 = arith.constant 0 : index
    %10 = vector.load %arg8[%c0_16, %c16_17, %c0_18] : memref<10x48x128xbf16, #tpu.memory_space<vmem>>, vector<1x16x128xbf16>
    tpu.vector_store %arg8[%c0_16, %c16_17, %c0_18], %3 {strides = array<i32>} : memref<10x48x128xbf16, #tpu.memory_space<vmem>>, vector<1x16x128xbf16>,
    %c9 = arith.constant 9 : index
    %c16_19 = arith.constant 16 : index
    %c0_20 = arith.constant 0 : index
    %11 = vector.load %arg8[%c9, %c16_19, %c0_20] : memref<10x48x128xbf16, #tpu.memory_space<vmem>>, vector<1x16x128xbf16>
    tpu.vector_store %arg8[%c9, %c16_19, %c0_20], %5 {strides = array<i32>} : memref<10x48x128xbf16, #tpu.memory_space<vmem>>, vector<1x16x128xbf16>,
    %cst_21 = arith.constant 0.000000e+00 : bf16
    %12 = vector.broadcast %cst_21 : bf16 to vector<1x16x128xbf16>
    %c0_i32 = arith.constant 0 : i32
    %13 = arith.cmpi eq, %arg1, %c0_i32 : i32
    %14 = arith.extui %13 : i1 to i32
    %c0_i32_22 = arith.constant 0 : i32
    %15 = arith.cmpi ne, %14, %c0_i32_22 : i32
    scf.if %15 {
      %c0_54 = arith.constant 0 : index
      %c16_55 = arith.constant 16 : index
      %c0_56 = arith.constant 0 : index
      %53 = vector.load %arg8[%c0_54, %c16_55, %c0_56] : memref<10x48x128xbf16, #tpu.memory_space<vmem>>, vector<1x16x128xbf16>
      tpu.vector_store %arg8[%c0_54, %c16_55, %c0_56], %12 {strides = array<i32>} : memref<10x48x128xbf16, #tpu.memory_space<vmem>>, vector<1x16x128xbf16>,
    } else {
    }
    %c1_i32 = arith.constant 1 : i32
    %16 = arith.cmpi eq, %arg1, %c1_i32 : i32
    %17 = arith.extui %16 : i1 to i32
    %c0_i32_23 = arith.constant 0 : i32
    %18 = arith.cmpi ne, %17, %c0_i32_23 : i32
    scf.if %18 {
      %c9_54 = arith.constant 9 : index
      %c16_55 = arith.constant 16 : index
      %c0_56 = arith.constant 0 : index
      %53 = vector.load %arg8[%c9_54, %c16_55, %c0_56] : memref<10x48x128xbf16, #tpu.memory_space<vmem>>, vector<1x16x128xbf16>
      tpu.vector_store %arg8[%c9_54, %c16_55, %c0_56], %12 {strides = array<i32>} : memref<10x48x128xbf16, #tpu.memory_space<vmem>>, vector<1x16x128xbf16>,
    } else {
    }
    %c0_24 = arith.constant 0 : index
    %c15_25 = arith.constant 15 : index
    %c0_26 = arith.constant 0 : index
    %19 = vector.load %arg8[%c0_24, %c15_25, %c0_26] : memref<10x48x128xbf16, #tpu.memory_space<vmem>>, vector<10x16x128xbf16>
    %c0_27 = arith.constant 0 : index
    %c16_28 = arith.constant 16 : index
    %c0_29 = arith.constant 0 : index
    %20 = vector.load %arg8[%c0_27, %c16_28, %c0_29] : memref<10x48x128xbf16, #tpu.memory_space<vmem>>, vector<10x16x128xbf16>
    %c0_30 = arith.constant 0 : index
    %c17 = arith.constant 17 : index
    %c0_31 = arith.constant 0 : index
    %21 = vector.load %arg8[%c0_30, %c17, %c0_31] : memref<10x48x128xbf16, #tpu.memory_space<vmem>>, vector<10x16x128xbf16>
    %22 = tpu.concatenate %19, %20, %21 in 2 : vector<10x16x128xbf16>, vector<10x16x128xbf16>, vector<10x16x128xbf16> -> vector<10x16x384xbf16>
    %cst_32 = arith.constant 0.000000e+00 : f32
    %23 = vector.broadcast %cst_32 : f32 to vector<128x256xf32>
    %24 = vector.extract_strided_slice %22 {offsets = [0, 0, 0], sizes = [8, 16, 384], strides = [1, 1, 1]} : vector<10x16x384xbf16> to vector<8x16x384xbf16>
    %25 = vector.shape_cast %24 : vector<8x16x384xbf16> to vector<128x384xbf16>
    %c0_33 = arith.constant 0 : index
    %c0_34 = arith.constant 0 : index
    %c0_35 = arith.constant 0 : index
    %26 = vector.load %arg5[%c0_33, %c0_34, %c0_35] : memref<3x384x256xbf16, #tpu.memory_space<vmem>>, vector<1x384x256xbf16>
    %27 = vector.shape_cast %26 : vector<1x384x256xbf16> to vector<384x256xbf16>
    %cst_36 = arith.constant dense<0.000000e+00> : vector<128x256xf32>
    %28 = tpu.matmul %25, %27, %cst_36 {dimension_numbers = #tpu.dot_dimension_numbers<[1], [0], [0], [1], [0, 0, 1, 1], [], []>} : vector<128x384xbf16>, vector<384x256xbf16>, vector<128x256xf32> -> vector<128x256xf32>
    %29 = arith.addf %23, %28 : vector<128x256xf32>
    %30 = vector.extract_strided_slice %22 {offsets = [1, 0, 0], sizes = [8, 16, 384], strides = [1, 1, 1]} : vector<10x16x384xbf16> to vector<8x16x384xbf16>
    %31 = vector.shape_cast %30 : vector<8x16x384xbf16> to vector<128x384xbf16>
    %c1_37 = arith.constant 1 : index
    %c0_38 = arith.constant 0 : index
    %c0_39 = arith.constant 0 : index
    %32 = vector.load %arg5[%c1_37, %c0_38, %c0_39] : memref<3x384x256xbf16, #tpu.memory_space<vmem>>, vector<1x384x256xbf16>
    %33 = vector.shape_cast %32 : vector<1x384x256xbf16> to vector<384x256xbf16>
    %cst_40 = arith.constant dense<0.000000e+00> : vector<128x256xf32>
    %34 = tpu.matmul %31, %33, %cst_40 {dimension_numbers = #tpu.dot_dimension_numbers<[1], [0], [0], [1], [0, 0, 1, 1], [], []>} : vector<128x384xbf16>, vector<384x256xbf16>, vector<128x256xf32> -> vector<128x256xf32>
    %35 = arith.addf %29, %34 : vector<128x256xf32>
    %36 = vector.extract_strided_slice %22 {offsets = [2, 0, 0], sizes = [8, 16, 384], strides = [1, 1, 1]} : vector<10x16x384xbf16> to vector<8x16x384xbf16>
    %37 = vector.shape_cast %36 : vector<8x16x384xbf16> to vector<128x384xbf16>
    %c2 = arith.constant 2 : index
    %c0_41 = arith.constant 0 : index
    %c0_42 = arith.constant 0 : index
    %38 = vector.load %arg5[%c2, %c0_41, %c0_42] : memref<3x384x256xbf16, #tpu.memory_space<vmem>>, vector<1x384x256xbf16>
    %39 = vector.shape_cast %38 : vector<1x384x256xbf16> to vector<384x256xbf16>
    %cst_43 = arith.constant dense<0.000000e+00> : vector<128x256xf32>
    %40 = tpu.matmul %37, %39, %cst_43 {dimension_numbers = #tpu.dot_dimension_numbers<[1], [0], [0], [1], [0, 0, 1, 1], [], []>} : vector<128x384xbf16>, vector<384x256xbf16>, vector<128x256xf32> -> vector<128x256xf32>
    %41 = arith.addf %35, %40 : vector<128x256xf32>
    %42 = vector.shape_cast %41 : vector<128x256xf32> to vector<1x8x16x256xf32>
    %43 = arith.truncf %42 : vector<1x8x16x256xf32> to vector<1x8x16x256xbf16>
    %c0_44 = arith.constant 0 : index
    %c0_45 = arith.constant 0 : index
    %c0_46 = arith.constant 0 : index
    %c0_47 = arith.constant 0 : index
    %44 = vector.load %arg6[%c0_44, %c0_45, %c0_46, %c0_47] : memref<1x8x16x256xbf16, #tpu.memory_space<vmem>>, vector<1x8x16x256xbf16>
    tpu.vector_store %arg6[%c0_44, %c0_45, %c0_46, %c0_47], %43 {strides = array<i32>} : memref<1x8x16x256xbf16, #tpu.memory_space<vmem>>, vector<1x8x16x256xbf16>,
    %cst_48 = arith.constant dense<0.000000e+00> : vector<256xf32>
    %45 = vector.multi_reduction <add>, %41, %cst_48 [0] : vector<128x256xf32> to vector<256xf32>
    %46 = vector.shape_cast %45 : vector<256xf32> to vector<1x256xf32>
    %47 = arith.mulf %41, %41 : vector<128x256xf32>
    %cst_49 = arith.constant dense<0.000000e+00> : vector<256xf32>
    %48 = vector.multi_reduction <add>, %47, %cst_49 [0] : vector<128x256xf32> to vector<256xf32>
    %49 = vector.shape_cast %48 : vector<256xf32> to vector<1x256xf32>
    %50 = tpu.concatenate %46, %49 in 0 : vector<1x256xf32>, vector<1x256xf32> -> vector<2x256xf32>
    %51 = vector.shape_cast %50 : vector<2x256xf32> to vector<1x1x2x256xf32>
    %c0_50 = arith.constant 0 : index
    %c0_51 = arith.constant 0 : index
    %c0_52 = arith.constant 0 : index
    %c0_53 = arith.constant 0 : index
    %52 = vector.load %arg7[%c0_50, %c0_51, %c0_52, %c0_53] : memref<1x1x2x256xf32, #tpu.memory_space<vmem>>, vector<1x1x2x256xf32>
    tpu.vector_store %arg7[%c0_50, %c0_51, %c0_52, %c0_53], %51 {strides = array<i32>} : memref<1x1x2x256xf32, #tpu.memory_space<vmem>>, vector<1x1x2x256xf32>,
    return
  }
  func.func @transform_0(%arg0: i32, %arg1: i32) -> (i32, i32, i32, i32) {
    %c0_i32 = arith.constant 0 : i32
    %c0_i32_0 = arith.constant 0 : i32
    %c0_i32_1 = arith.constant 0 : i32
    return %arg0, %arg1, %c0_i32, %c0_i32_0 : i32, i32, i32, i32
  }
  func.func @transform_1(%arg0: i32, %arg1: i32) -> (i32, i32, i32, i32) {
    %c8_i32 = arith.constant 8 : i32
    %0 = arith.muli %arg1, %c8_i32 : i32
    %c1_i32 = arith.constant 1 : i32
    %1 = arith.subi %0, %c1_i32 : i32
    %c0_i32 = arith.constant 0 : i32
    %2 = arith.maxsi %1, %c0_i32 : i32
    %c0_i32_0 = arith.constant 0 : i32
    %c0_i32_1 = arith.constant 0 : i32
    %c0_i32_2 = arith.constant 0 : i32
    return %arg0, %2, %c0_i32_0, %c0_i32_1 : i32, i32, i32, i32
  }
  func.func @transform_2(%arg0: i32, %arg1: i32) -> (i32, i32, i32, i32) {
    %c8_i32 = arith.constant 8 : i32
    %0 = arith.muli %arg1, %c8_i32 : i32
    %c8_i32_0 = arith.constant 8 : i32
    %1 = arith.addi %0, %c8_i32_0 : i32
    %c15_i32 = arith.constant 15 : i32
    %2 = arith.minsi %1, %c15_i32 : i32
    %c0_i32 = arith.constant 0 : i32
    %c0_i32_1 = arith.constant 0 : i32
    %c0_i32_2 = arith.constant 0 : i32
    return %arg0, %2, %c0_i32, %c0_i32_1 : i32, i32, i32, i32
  }
  func.func @transform_3(%arg0: i32, %arg1: i32) -> (i32, i32, i32) {
    %c0_i32 = arith.constant 0 : i32
    %c0_i32_0 = arith.constant 0 : i32
    %c0_i32_1 = arith.constant 0 : i32
    %c0_i32_2 = arith.constant 0 : i32
    return %c0_i32, %c0_i32_0, %c0_i32_1 : i32, i32, i32
  }
  func.func @transform_4(%arg0: i32, %arg1: i32) -> (i32, i32, i32, i32) {
    %c0_i32 = arith.constant 0 : i32
    %c0_i32_0 = arith.constant 0 : i32
    %c0_i32_1 = arith.constant 0 : i32
    return %arg0, %arg1, %c0_i32, %c0_i32_0 : i32, i32, i32, i32
  }
  func.func @transform_5(%arg0: i32, %arg1: i32) -> (i32, i32, i32, i32) {
    %c0_i32 = arith.constant 0 : i32
    %c0_i32_0 = arith.constant 0 : i32
    %c0_i32_1 = arith.constant 0 : i32
    return %arg0, %arg1, %c0_i32, %c0_i32_0 : i32, i32, i32, i32
  }
}

module attributes {stable_mosaic.version = 11 : i64} {
  func.func @_bn_add_relu_ds_kernel(%arg0: i32, %arg1: i32, %arg2: memref<1x8x16x128xbf16, #tpu.memory_space<vmem>>, %arg3: memref<1x128xf32, #tpu.memory_space<vmem>>, %arg4: memref<1x128xf32, #tpu.memory_space<vmem>>, %arg5: memref<1x8x16x128xbf16, #tpu.memory_space<vmem>>, %arg6: memref<1x128xf32, #tpu.memory_space<vmem>>, %arg7: memref<1x128xf32, #tpu.memory_space<vmem>>, %arg8: memref<1x8x16x128xf32, #tpu.memory_space<vmem>>) attributes {dimension_semantics = [#tpu.dimension_semantics<parallel>, #tpu.dimension_semantics<parallel>], iteration_bounds = array<i64: 2, 2>, scalar_prefetch = 0 : i64, scratch_operands = 0 : i64, tpu.core_type = #tpu.core_type<tc>, window_params = [{transform_indices = @transform_0, window_bounds = array<i64: 1, 8, 16, 128>}, {pipeline_mode = #tpu.pipeline_mode<synchronous>, transform_indices = @transform_1, window_bounds = array<i64: 1, 128>}, {pipeline_mode = #tpu.pipeline_mode<synchronous>, transform_indices = @transform_2, window_bounds = array<i64: 1, 128>}, {transform_indices = @transform_3, window_bounds = array<i64: 1, 8, 16, 128>}, {pipeline_mode = #tpu.pipeline_mode<synchronous>, transform_indices = @transform_4, window_bounds = array<i64: 1, 128>}, {pipeline_mode = #tpu.pipeline_mode<synchronous>, transform_indices = @transform_5, window_bounds = array<i64: 1, 128>}, {transform_indices = @transform_6, window_bounds = array<i64: 1, 8, 16, 128>}]} {
    %c0 = arith.constant 0 : index
    %c0_0 = arith.constant 0 : index
    %c0_1 = arith.constant 0 : index
    %c0_2 = arith.constant 0 : index
    %0 = vector.load %arg2[%c0, %c0_0, %c0_1, %c0_2] : memref<1x8x16x128xbf16, #tpu.memory_space<vmem>>, vector<1x8x16x128xbf16>
    %1 = vector.shape_cast %0 : vector<1x8x16x128xbf16> to vector<8x16x128xbf16>
    %2 = arith.extf %1 : vector<8x16x128xbf16> to vector<8x16x128xf32>
    %c0_3 = arith.constant 0 : index
    %c0_4 = arith.constant 0 : index
    %3 = vector.load %arg3[%c0_3, %c0_4] : memref<1x128xf32, #tpu.memory_space<vmem>>, vector<1x128xf32>
    %4 = vector.shape_cast %3 : vector<1x128xf32> to vector<1x1x128xf32>
    %5 = vector.broadcast %4 : vector<1x1x128xf32> to vector<8x16x128xf32>
    %6 = arith.mulf %2, %5 : vector<8x16x128xf32>
    %c0_5 = arith.constant 0 : index
    %c0_6 = arith.constant 0 : index
    %7 = vector.load %arg4[%c0_5, %c0_6] : memref<1x128xf32, #tpu.memory_space<vmem>>, vector<1x128xf32>
    %8 = vector.shape_cast %7 : vector<1x128xf32> to vector<1x1x128xf32>
    %9 = vector.broadcast %8 : vector<1x1x128xf32> to vector<8x16x128xf32>
    %10 = arith.addf %6, %9 : vector<8x16x128xf32>
    %c0_7 = arith.constant 0 : index
    %c0_8 = arith.constant 0 : index
    %c0_9 = arith.constant 0 : index
    %c0_10 = arith.constant 0 : index
    %11 = vector.load %arg5[%c0_7, %c0_8, %c0_9, %c0_10] : memref<1x8x16x128xbf16, #tpu.memory_space<vmem>>, vector<1x8x16x128xbf16>
    %12 = vector.shape_cast %11 : vector<1x8x16x128xbf16> to vector<8x16x128xbf16>
    %13 = arith.extf %12 : vector<8x16x128xbf16> to vector<8x16x128xf32>
    %c0_11 = arith.constant 0 : index
    %c0_12 = arith.constant 0 : index
    %14 = vector.load %arg6[%c0_11, %c0_12] : memref<1x128xf32, #tpu.memory_space<vmem>>, vector<1x128xf32>
    %15 = vector.shape_cast %14 : vector<1x128xf32> to vector<1x1x128xf32>
    %16 = vector.broadcast %15 : vector<1x1x128xf32> to vector<8x16x128xf32>
    %17 = arith.mulf %13, %16 : vector<8x16x128xf32>
    %c0_13 = arith.constant 0 : index
    %c0_14 = arith.constant 0 : index
    %18 = vector.load %arg7[%c0_13, %c0_14] : memref<1x128xf32, #tpu.memory_space<vmem>>, vector<1x128xf32>
    %19 = vector.shape_cast %18 : vector<1x128xf32> to vector<1x1x128xf32>
    %20 = vector.broadcast %19 : vector<1x1x128xf32> to vector<8x16x128xf32>
    %21 = arith.addf %17, %20 : vector<8x16x128xf32>
    %22 = arith.addf %10, %21 : vector<8x16x128xf32>
    %cst = arith.constant 0.000000e+00 : f32
    %23 = vector.broadcast %cst : f32 to vector<8x16x128xf32>
    %24 = arith.maximumf %22, %23 : vector<8x16x128xf32>
    %25 = vector.shape_cast %24 : vector<8x16x128xf32> to vector<1x8x16x128xf32>
    %c0_15 = arith.constant 0 : index
    %c0_16 = arith.constant 0 : index
    %c0_17 = arith.constant 0 : index
    %c0_18 = arith.constant 0 : index
    %26 = vector.load %arg8[%c0_15, %c0_16, %c0_17, %c0_18] : memref<1x8x16x128xf32, #tpu.memory_space<vmem>>, vector<1x8x16x128xf32>
    tpu.vector_store %arg8[%c0_15, %c0_16, %c0_17, %c0_18], %25 {strides = array<i32>} : memref<1x8x16x128xf32, #tpu.memory_space<vmem>>, vector<1x8x16x128xf32>,
    return
  }
  func.func @transform_0(%arg0: i32, %arg1: i32) -> (i32, i32, i32, i32) {
    %c0_i32 = arith.constant 0 : i32
    %c0_i32_0 = arith.constant 0 : i32
    %c0_i32_1 = arith.constant 0 : i32
    return %arg0, %arg1, %c0_i32, %c0_i32_0 : i32, i32, i32, i32
  }
  func.func @transform_1(%arg0: i32, %arg1: i32) -> (i32, i32) {
    %c0_i32 = arith.constant 0 : i32
    %c0_i32_0 = arith.constant 0 : i32
    %c0_i32_1 = arith.constant 0 : i32
    return %c0_i32, %c0_i32_0 : i32, i32
  }
  func.func @transform_2(%arg0: i32, %arg1: i32) -> (i32, i32) {
    %c0_i32 = arith.constant 0 : i32
    %c0_i32_0 = arith.constant 0 : i32
    %c0_i32_1 = arith.constant 0 : i32
    return %c0_i32, %c0_i32_0 : i32, i32
  }
  func.func @transform_3(%arg0: i32, %arg1: i32) -> (i32, i32, i32, i32) {
    %c0_i32 = arith.constant 0 : i32
    %c1_i32 = arith.constant 1 : i32
    %c0_i32_0 = arith.constant 0 : i32
    return %arg0, %arg1, %c0_i32, %c1_i32 : i32, i32, i32, i32
  }
  func.func @transform_4(%arg0: i32, %arg1: i32) -> (i32, i32) {
    %c0_i32 = arith.constant 0 : i32
    %c0_i32_0 = arith.constant 0 : i32
    %c0_i32_1 = arith.constant 0 : i32
    return %c0_i32, %c0_i32_0 : i32, i32
  }
  func.func @transform_5(%arg0: i32, %arg1: i32) -> (i32, i32) {
    %c0_i32 = arith.constant 0 : i32
    %c0_i32_0 = arith.constant 0 : i32
    %c0_i32_1 = arith.constant 0 : i32
    return %c0_i32, %c0_i32_0 : i32, i32
  }
  func.func @transform_6(%arg0: i32, %arg1: i32) -> (i32, i32, i32, i32) {
    %c0_i32 = arith.constant 0 : i32
    %c0_i32_0 = arith.constant 0 : i32
    %c0_i32_1 = arith.constant 0 : i32
    return %arg0, %arg1, %c0_i32, %c0_i32_0 : i32, i32, i32, i32
  }
}

module attributes {stable_mosaic.version = 11 : i64} {
  func.func @_bn_relu_conv2_kernel(%arg0: i32, %arg1: i32, %arg2: memref<1x8x16x128xbf16, #tpu.memory_space<vmem>>, %arg3: memref<1x1x16x128xbf16, #tpu.memory_space<vmem>>, %arg4: memref<1x1x16x128xbf16, #tpu.memory_space<vmem>>, %arg5: memref<1x128xf32, #tpu.memory_space<vmem>>, %arg6: memref<1x128xf32, #tpu.memory_space<vmem>>, %arg7: memref<3x384x128xbf16, #tpu.memory_space<vmem>>, %arg8: memref<1x8x16x128xbf16, #tpu.memory_space<vmem>>, %arg9: memref<1x1x2x128xf32, #tpu.memory_space<vmem>>, %arg10: memref<10x48x128xbf16, #tpu.memory_space<vmem>>) attributes {dimension_semantics = [#tpu.dimension_semantics<parallel>, #tpu.dimension_semantics<parallel>], iteration_bounds = array<i64: 2, 2>, scalar_prefetch = 0 : i64, scratch_operands = 1 : i64, tpu.core_type = #tpu.core_type<tc>, window_params = [{transform_indices = @transform_0, window_bounds = array<i64: 1, 8, 16, 128>}, {transform_indices = @transform_1, window_bounds = array<i64: 1, 1, 16, 128>}, {transform_indices = @transform_2, window_bounds = array<i64: 1, 1, 16, 128>}, {pipeline_mode = #tpu.pipeline_mode<synchronous>, transform_indices = @transform_3, window_bounds = array<i64: 1, 128>}, {pipeline_mode = #tpu.pipeline_mode<synchronous>, transform_indices = @transform_4, window_bounds = array<i64: 1, 128>}, {pipeline_mode = #tpu.pipeline_mode<synchronous>, transform_indices = @transform_5, window_bounds = array<i64: 3, 384, 128>}, {transform_indices = @transform_6, window_bounds = array<i64: 1, 8, 16, 128>}, {transform_indices = @transform_7, window_bounds = array<i64: 1, 1, 2, 128>}]} {
    %c0 = arith.constant 0 : index
    %c0_0 = arith.constant 0 : index
    %0 = vector.load %arg5[%c0, %c0_0] : memref<1x128xf32, #tpu.memory_space<vmem>>, vector<1x128xf32>
    %1 = vector.shape_cast %0 : vector<1x128xf32> to vector<1x1x128xf32>
    %c0_1 = arith.constant 0 : index
    %c0_2 = arith.constant 0 : index
    %2 = vector.load %arg6[%c0_1, %c0_2] : memref<1x128xf32, #tpu.memory_space<vmem>>, vector<1x128xf32>
    %3 = vector.shape_cast %2 : vector<1x128xf32> to vector<1x1x128xf32>
    %c0_3 = arith.constant 0 : index
    %c0_4 = arith.constant 0 : index
    %c0_5 = arith.constant 0 : index
    %c0_6 = arith.constant 0 : index
    %4 = vector.load %arg2[%c0_3, %c0_4, %c0_5, %c0_6] : memref<1x8x16x128xbf16, #tpu.memory_space<vmem>>, vector<1x8x16x128xbf16>
    %5 = vector.shape_cast %4 : vector<1x8x16x128xbf16> to vector<8x16x128xbf16>
    %6 = arith.extf %5 : vector<8x16x128xbf16> to vector<8x16x128xf32>
    %7 = vector.broadcast %1 : vector<1x1x128xf32> to vector<8x16x128xf32>
    %8 = arith.mulf %6, %7 : vector<8x16x128xf32>
    %9 = vector.broadcast %3 : vector<1x1x128xf32> to vector<8x16x128xf32>
    %10 = arith.addf %8, %9 : vector<8x16x128xf32>
    %cst = arith.constant 0.000000e+00 : f32
    %11 = vector.broadcast %cst : f32 to vector<8x16x128xf32>
    %12 = arith.maximumf %10, %11 : vector<8x16x128xf32>
    %13 = arith.truncf %12 : vector<8x16x128xf32> to vector<8x16x128xbf16>
    %c0_7 = arith.constant 0 : index
    %c0_8 = arith.constant 0 : index
    %c0_9 = arith.constant 0 : index
    %c0_10 = arith.constant 0 : index
    %14 = vector.load %arg3[%c0_7, %c0_8, %c0_9, %c0_10] : memref<1x1x16x128xbf16, #tpu.memory_space<vmem>>, vector<1x1x16x128xbf16>
    %15 = vector.shape_cast %14 : vector<1x1x16x128xbf16> to vector<1x16x128xbf16>
    %16 = arith.extf %15 : vector<1x16x128xbf16> to vector<1x16x128xf32>
    %17 = vector.broadcast %1 : vector<1x1x128xf32> to vector<1x16x128xf32>
    %18 = arith.mulf %16, %17 : vector<1x16x128xf32>
    %19 = vector.broadcast %3 : vector<1x1x128xf32> to vector<1x16x128xf32>
    %20 = arith.addf %18, %19 : vector<1x16x128xf32>
    %cst_11 = arith.constant 0.000000e+00 : f32
    %21 = vector.broadcast %cst_11 : f32 to vector<1x16x128xf32>
    %22 = arith.maximumf %20, %21 : vector<1x16x128xf32>
    %23 = arith.truncf %22 : vector<1x16x128xf32> to vector<1x16x128xbf16>
    %c0_12 = arith.constant 0 : index
    %c0_13 = arith.constant 0 : index
    %c0_14 = arith.constant 0 : index
    %c0_15 = arith.constant 0 : index
    %24 = vector.load %arg4[%c0_12, %c0_13, %c0_14, %c0_15] : memref<1x1x16x128xbf16, #tpu.memory_space<vmem>>, vector<1x1x16x128xbf16>
    %25 = vector.shape_cast %24 : vector<1x1x16x128xbf16> to vector<1x16x128xbf16>
    %26 = arith.extf %25 : vector<1x16x128xbf16> to vector<1x16x128xf32>
    %27 = vector.broadcast %1 : vector<1x1x128xf32> to vector<1x16x128xf32>
    %28 = arith.mulf %26, %27 : vector<1x16x128xf32>
    %29 = vector.broadcast %3 : vector<1x1x128xf32> to vector<1x16x128xf32>
    %30 = arith.addf %28, %29 : vector<1x16x128xf32>
    %cst_16 = arith.constant 0.000000e+00 : f32
    %31 = vector.broadcast %cst_16 : f32 to vector<1x16x128xf32>
    %32 = arith.maximumf %30, %31 : vector<1x16x128xf32>
    %33 = arith.truncf %32 : vector<1x16x128xf32> to vector<1x16x128xbf16>
    %cst_17 = arith.constant 0.000000e+00 : bf16
    %34 = vector.broadcast %cst_17 : bf16 to vector<10x1x128xbf16>
    %c0_18 = arith.constant 0 : index
    %c15 = arith.constant 15 : index
    %c0_19 = arith.constant 0 : index
    %35 = vector.load %arg10[%c0_18, %c15, %c0_19] : memref<10x48x128xbf16, #tpu.memory_space<vmem>>, vector<10x1x128xbf16>
    tpu.vector_store %arg10[%c0_18, %c15, %c0_19], %34 {strides = array<i32>} : memref<10x48x128xbf16, #tpu.memory_space<vmem>>, vector<10x1x128xbf16>,
    %c0_20 = arith.constant 0 : index
    %c32 = arith.constant 32 : index
    %c0_21 = arith.constant 0 : index
    %36 = vector.load %arg10[%c0_20, %c32, %c0_21] : memref<10x48x128xbf16, #tpu.memory_space<vmem>>, vector<10x1x128xbf16>
    tpu.vector_store %arg10[%c0_20, %c32, %c0_21], %34 {strides = array<i32>} : memref<10x48x128xbf16, #tpu.memory_space<vmem>>, vector<10x1x128xbf16>,
    %c1 = arith.constant 1 : index
    %c16 = arith.constant 16 : index
    %c0_22 = arith.constant 0 : index
    %37 = vector.load %arg10[%c1, %c16, %c0_22] : memref<10x48x128xbf16, #tpu.memory_space<vmem>>, vector<8x16x128xbf16>
    tpu.vector_store %arg10[%c1, %c16, %c0_22], %13 {strides = array<i32>} : memref<10x48x128xbf16, #tpu.memory_space<vmem>>, vector<8x16x128xbf16>,
    %c0_23 = arith.constant 0 : index
    %c16_24 = arith.constant 16 : index
    %c0_25 = arith.constant 0 : index
    %38 = vector.load %arg10[%c0_23, %c16_24, %c0_25] : memref<10x48x128xbf16, #tpu.memory_space<vmem>>, vector<1x16x128xbf16>
    tpu.vector_store %arg10[%c0_23, %c16_24, %c0_25], %23 {strides = array<i32>} : memref<10x48x128xbf16, #tpu.memory_space<vmem>>, vector<1x16x128xbf16>,
    %c9 = arith.constant 9 : index
    %c16_26 = arith.constant 16 : index
    %c0_27 = arith.constant 0 : index
    %39 = vector.load %arg10[%c9, %c16_26, %c0_27] : memref<10x48x128xbf16, #tpu.memory_space<vmem>>, vector<1x16x128xbf16>
    tpu.vector_store %arg10[%c9, %c16_26, %c0_27], %33 {strides = array<i32>} : memref<10x48x128xbf16, #tpu.memory_space<vmem>>, vector<1x16x128xbf16>,
    %cst_28 = arith.constant 0.000000e+00 : bf16
    %40 = vector.broadcast %cst_28 : bf16 to vector<1x16x128xbf16>
    %c0_i32 = arith.constant 0 : i32
    %41 = arith.cmpi eq, %arg1, %c0_i32 : i32
    %42 = arith.extui %41 : i1 to i32
    %c0_i32_29 = arith.constant 0 : i32
    %43 = arith.cmpi ne, %42, %c0_i32_29 : i32
    scf.if %43 {
      %c0_61 = arith.constant 0 : index
      %c16_62 = arith.constant 16 : index
      %c0_63 = arith.constant 0 : index
      %81 = vector.load %arg10[%c0_61, %c16_62, %c0_63] : memref<10x48x128xbf16, #tpu.memory_space<vmem>>, vector<1x16x128xbf16>
      tpu.vector_store %arg10[%c0_61, %c16_62, %c0_63], %40 {strides = array<i32>} : memref<10x48x128xbf16, #tpu.memory_space<vmem>>, vector<1x16x128xbf16>,
    } else {
    }
    %c1_i32 = arith.constant 1 : i32
    %44 = arith.cmpi eq, %arg1, %c1_i32 : i32
    %45 = arith.extui %44 : i1 to i32
    %c0_i32_30 = arith.constant 0 : i32
    %46 = arith.cmpi ne, %45, %c0_i32_30 : i32
    scf.if %46 {
      %c9_61 = arith.constant 9 : index
      %c16_62 = arith.constant 16 : index
      %c0_63 = arith.constant 0 : index
      %81 = vector.load %arg10[%c9_61, %c16_62, %c0_63] : memref<10x48x128xbf16, #tpu.memory_space<vmem>>, vector<1x16x128xbf16>
      tpu.vector_store %arg10[%c9_61, %c16_62, %c0_63], %40 {strides = array<i32>} : memref<10x48x128xbf16, #tpu.memory_space<vmem>>, vector<1x16x128xbf16>,
    } else {
    }
    %c0_31 = arith.constant 0 : index
    %c15_32 = arith.constant 15 : index
    %c0_33 = arith.constant 0 : index
    %47 = vector.load %arg10[%c0_31, %c15_32, %c0_33] : memref<10x48x128xbf16, #tpu.memory_space<vmem>>, vector<10x16x128xbf16>
    %c0_34 = arith.constant 0 : index
    %c16_35 = arith.constant 16 : index
    %c0_36 = arith.constant 0 : index
    %48 = vector.load %arg10[%c0_34, %c16_35, %c0_36] : memref<10x48x128xbf16, #tpu.memory_space<vmem>>, vector<10x16x128xbf16>
    %c0_37 = arith.constant 0 : index
    %c17 = arith.constant 17 : index
    %c0_38 = arith.constant 0 : index
    %49 = vector.load %arg10[%c0_37, %c17, %c0_38] : memref<10x48x128xbf16, #tpu.memory_space<vmem>>, vector<10x16x128xbf16>
    %50 = tpu.concatenate %47, %48, %49 in 2 : vector<10x16x128xbf16>, vector<10x16x128xbf16>, vector<10x16x128xbf16> -> vector<10x16x384xbf16>
    %cst_39 = arith.constant 0.000000e+00 : f32
    %51 = vector.broadcast %cst_39 : f32 to vector<128x128xf32>
    %52 = vector.extract_strided_slice %50 {offsets = [0, 0, 0], sizes = [8, 16, 384], strides = [1, 1, 1]} : vector<10x16x384xbf16> to vector<8x16x384xbf16>
    %53 = vector.shape_cast %52 : vector<8x16x384xbf16> to vector<128x384xbf16>
    %c0_40 = arith.constant 0 : index
    %c0_41 = arith.constant 0 : index
    %c0_42 = arith.constant 0 : index
    %54 = vector.load %arg7[%c0_40, %c0_41, %c0_42] : memref<3x384x128xbf16, #tpu.memory_space<vmem>>, vector<1x384x128xbf16>
    %55 = vector.shape_cast %54 : vector<1x384x128xbf16> to vector<384x128xbf16>
    %cst_43 = arith.constant dense<0.000000e+00> : vector<128x128xf32>
    %56 = tpu.matmul %53, %55, %cst_43 {dimension_numbers = #tpu.dot_dimension_numbers<[1], [0], [0], [1], [0, 0, 1, 1], [], []>} : vector<128x384xbf16>, vector<384x128xbf16>, vector<128x128xf32> -> vector<128x128xf32>
    %57 = arith.addf %51, %56 : vector<128x128xf32>
    %58 = vector.extract_strided_slice %50 {offsets = [1, 0, 0], sizes = [8, 16, 384], strides = [1, 1, 1]} : vector<10x16x384xbf16> to vector<8x16x384xbf16>
    %59 = vector.shape_cast %58 : vector<8x16x384xbf16> to vector<128x384xbf16>
    %c1_44 = arith.constant 1 : index
    %c0_45 = arith.constant 0 : index
    %c0_46 = arith.constant 0 : index
    %60 = vector.load %arg7[%c1_44, %c0_45, %c0_46] : memref<3x384x128xbf16, #tpu.memory_space<vmem>>, vector<1x384x128xbf16>
    %61 = vector.shape_cast %60 : vector<1x384x128xbf16> to vector<384x128xbf16>
    %cst_47 = arith.constant dense<0.000000e+00> : vector<128x128xf32>
    %62 = tpu.matmul %59, %61, %cst_47 {dimension_numbers = #tpu.dot_dimension_numbers<[1], [0], [0], [1], [0, 0, 1, 1], [], []>} : vector<128x384xbf16>, vector<384x128xbf16>, vector<128x128xf32> -> vector<128x128xf32>
    %63 = arith.addf %57, %62 : vector<128x128xf32>
    %64 = vector.extract_strided_slice %50 {offsets = [2, 0, 0], sizes = [8, 16, 384], strides = [1, 1, 1]} : vector<10x16x384xbf16> to vector<8x16x384xbf16>
    %65 = vector.shape_cast %64 : vector<8x16x384xbf16> to vector<128x384xbf16>
    %c2 = arith.constant 2 : index
    %c0_48 = arith.constant 0 : index
    %c0_49 = arith.constant 0 : index
    %66 = vector.load %arg7[%c2, %c0_48, %c0_49] : memref<3x384x128xbf16, #tpu.memory_space<vmem>>, vector<1x384x128xbf16>
    %67 = vector.shape_cast %66 : vector<1x384x128xbf16> to vector<384x128xbf16>
    %cst_50 = arith.constant dense<0.000000e+00> : vector<128x128xf32>
    %68 = tpu.matmul %65, %67, %cst_50 {dimension_numbers = #tpu.dot_dimension_numbers<[1], [0], [0], [1], [0, 0, 1, 1], [], []>} : vector<128x384xbf16>, vector<384x128xbf16>, vector<128x128xf32> -> vector<128x128xf32>
    %69 = arith.addf %63, %68 : vector<128x128xf32>
    %70 = vector.shape_cast %69 : vector<128x128xf32> to vector<1x8x16x128xf32>
    %71 = arith.truncf %70 : vector<1x8x16x128xf32> to vector<1x8x16x128xbf16>
    %c0_51 = arith.constant 0 : index
    %c0_52 = arith.constant 0 : index
    %c0_53 = arith.constant 0 : index
    %c0_54 = arith.constant 0 : index
    %72 = vector.load %arg8[%c0_51, %c0_52, %c0_53, %c0_54] : memref<1x8x16x128xbf16, #tpu.memory_space<vmem>>, vector<1x8x16x128xbf16>
    tpu.vector_store %arg8[%c0_51, %c0_52, %c0_53, %c0_54], %71 {strides = array<i32>} : memref<1x8x16x128xbf16, #tpu.memory_space<vmem>>, vector<1x8x16x128xbf16>,
    %cst_55 = arith.constant dense<0.000000e+00> : vector<128xf32>
    %73 = vector.multi_reduction <add>, %69, %cst_55 [0] : vector<128x128xf32> to vector<128xf32>
    %74 = vector.shape_cast %73 : vector<128xf32> to vector<1x128xf32>
    %75 = arith.mulf %69, %69 : vector<128x128xf32>
    %cst_56 = arith.constant dense<0.000000e+00> : vector<128xf32>
    %76 = vector.multi_reduction <add>, %75, %cst_56 [0] : vector<128x128xf32> to vector<128xf32>
    %77 = vector.shape_cast %76 : vector<128xf32> to vector<1x128xf32>
    %78 = tpu.concatenate %74, %77 in 0 : vector<1x128xf32>, vector<1x128xf32> -> vector<2x128xf32>
    %79 = vector.shape_cast %78 : vector<2x128xf32> to vector<1x1x2x128xf32>
    %c0_57 = arith.constant 0 : index
    %c0_58 = arith.constant 0 : index
    %c0_59 = arith.constant 0 : index
    %c0_60 = arith.constant 0 : index
    %80 = vector.load %arg9[%c0_57, %c0_58, %c0_59, %c0_60] : memref<1x1x2x128xf32, #tpu.memory_space<vmem>>, vector<1x1x2x128xf32>
    tpu.vector_store %arg9[%c0_57, %c0_58, %c0_59, %c0_60], %79 {strides = array<i32>} : memref<1x1x2x128xf32, #tpu.memory_space<vmem>>, vector<1x1x2x128xf32>,
    return
  }
  func.func @transform_0(%arg0: i32, %arg1: i32) -> (i32, i32, i32, i32) {
    %c0_i32 = arith.constant 0 : i32
    %c0_i32_0 = arith.constant 0 : i32
    %c0_i32_1 = arith.constant 0 : i32
    return %arg0, %arg1, %c0_i32, %c0_i32_0 : i32, i32, i32, i32
  }
  func.func @transform_1(%arg0: i32, %arg1: i32) -> (i32, i32, i32, i32) {
    %c8_i32 = arith.constant 8 : i32
    %0 = arith.muli %arg1, %c8_i32 : i32
    %c1_i32 = arith.constant 1 : i32
    %1 = arith.subi %0, %c1_i32 : i32
    %c0_i32 = arith.constant 0 : i32
    %2 = arith.maxsi %1, %c0_i32 : i32
    %c0_i32_0 = arith.constant 0 : i32
    %c0_i32_1 = arith.constant 0 : i32
    %c0_i32_2 = arith.constant 0 : i32
    return %arg0, %2, %c0_i32_0, %c0_i32_1 : i32, i32, i32, i32
  }
  func.func @transform_2(%arg0: i32, %arg1: i32) -> (i32, i32, i32, i32) {
    %c8_i32 = arith.constant 8 : i32
    %0 = arith.muli %arg1, %c8_i32 : i32
    %c8_i32_0 = arith.constant 8 : i32
    %1 = arith.addi %0, %c8_i32_0 : i32
    %c15_i32 = arith.constant 15 : i32
    %2 = arith.minsi %1, %c15_i32 : i32
    %c0_i32 = arith.constant 0 : i32
    %c0_i32_1 = arith.constant 0 : i32
    %c0_i32_2 = arith.constant 0 : i32
    return %arg0, %2, %c0_i32, %c0_i32_1 : i32, i32, i32, i32
  }
  func.func @transform_3(%arg0: i32, %arg1: i32) -> (i32, i32) {
    %c0_i32 = arith.constant 0 : i32
    %c0_i32_0 = arith.constant 0 : i32
    %c0_i32_1 = arith.constant 0 : i32
    return %c0_i32, %c0_i32_0 : i32, i32
  }
  func.func @transform_4(%arg0: i32, %arg1: i32) -> (i32, i32) {
    %c0_i32 = arith.constant 0 : i32
    %c0_i32_0 = arith.constant 0 : i32
    %c0_i32_1 = arith.constant 0 : i32
    return %c0_i32, %c0_i32_0 : i32, i32
  }
  func.func @transform_5(%arg0: i32, %arg1: i32) -> (i32, i32, i32) {
    %c0_i32 = arith.constant 0 : i32
    %c0_i32_0 = arith.constant 0 : i32
    %c0_i32_1 = arith.constant 0 : i32
    %c0_i32_2 = arith.constant 0 : i32
    return %c0_i32, %c0_i32_0, %c0_i32_1 : i32, i32, i32
  }
  func.func @transform_6(%arg0: i32, %arg1: i32) -> (i32, i32, i32, i32) {
    %c0_i32 = arith.constant 0 : i32
    %c0_i32_0 = arith.constant 0 : i32
    %c0_i32_1 = arith.constant 0 : i32
    return %arg0, %arg1, %c0_i32, %c0_i32_0 : i32, i32, i32, i32
  }
  func.func @transform_7(%arg0: i32, %arg1: i32) -> (i32, i32, i32, i32) {
    %c0_i32 = arith.constant 0 : i32
    %c0_i32_0 = arith.constant 0 : i32
    %c0_i32_1 = arith.constant 0 : i32
    return %arg0, %arg1, %c0_i32, %c0_i32_0 : i32, i32, i32, i32
  }
}

</mosaic_0001>

<bundles_post_ra>
// kernel: basic_block_forward.5
= control target key start
LH: loop header
LB: loop body
LE: loop exit
PB: predicated region body
PF: predicated region fallthrough
CT: control target
= control target key end

     0   :  { %s1015_s21 = smov 0   ;;  %s1017_s22 = smov 0   ;;  %s1260_s0 = inlined_call_operand.vmem [shape: bf16[2,16,16,128], index: 0, kind: input, shape index: {}]   ;;  %s1261_s1 = inlined_call_operand.vmem [shape: f32[1,128], index: 1, kind: input, shape index: {}]   ;;  %s1262_s2 = inlined_call_operand.vmem [shape: f32[1,128], index: 2, kind: input, shape index: {}]   ;;  %s1263_s3 = inlined_call_operand.vmem [shape: bf16[2,16,16,256], index: 3, kind: input, shape index: {}]   ;;  %s1264_s4 = inlined_call_operand.vmem [shape: f32[1,128], index: 4, kind: input, shape index: {}]   ;;  %s1265_s5 = inlined_call_operand.vmem [shape: f32[1,128], index: 5, kind: input, shape index: {}]   ;;  %s1266_s6 = inlined_call_operand.vmem [shape: f32[2,16,16,128], index: 6, kind: output, shape index: {}]  }
   0x1   :  { %s1019_s23 = smov 0   ;;  %s1021_s24 = smov 0  }
   0x2   :  { %s1023_s25 = smov 0   ;;  %s1025_s26 = smov 0  }
   0x3   :  { %s1027_s27 = smov 0  }
   0x4 LB: > { %s25_s28 = sadd.s32 1, %s970_s25  ;;  %s28_s29 = sadd.s32 1, %s974_s26  ;;  %s978_s27 = sphi %s1027_s27, %s16_s27   ;;  %s974_s26 = sphi %s1025_s26, %s1272_s26   ;;  %s970_s25 = sphi %s1023_s25, %s1271_s25   ;;  %s966_s24 = sphi %s1021_s24, %s1270_s24   ;;  %s962_s23 = sphi %s1019_s23, %s1269_s23   ;;  %s958_s22 = sphi %s1017_s22, %s1268_s22   ;;  %s954_s21 = sphi %s1015_s21, %s1267_s21  }
   0x5   : > { %p26_p0 = scmp.ge.s32.totalorder %s25_s28, 2  ;;  %p114_p1 = scmp.ne.s32.totalorder %s958_s22, %s954_s21 }
   0x6   : > { %p115_p2 = scmp.eq.s32.totalorder %s978_s27, 0  ;;  %s107_s9 = sadd.s32 1, %s958_s22 }
   0x7   : > { %s1274_s28 = smov (%p26_p0, %s25_s28), 0  ;;  %s1276_s29 = smov (!%p26_p0, %s28_s29), %s974_s26 }
   0x8   : > { %p116_p3 = por %p115_p2, %p114_p1  ;;  %p30_p4 = scmp.ge.s32.totalorder %s1276_s29, 2 }
   0x9   : > { %s103_s30 = ssub.s32 %s970_s25, %s1274_s28  ;;  %p753_p6 = scmp.ge.s32.totalorder %s978_s27, 4 }
   0xa   : > { %s1278_s29 = smov (%p30_p4, %s1276_s29), 0 }
   0xb   : > { %s102_s7 = ssub.s32 %s974_s26, %s1278_s29  ;;  %222 = sbr.rel (%p753_p6) target bundleno = 35 (0x23), region = 32 }
   0xc   : > { %s104_s8 = sor.u32 %s103_s30, %s102_s7 }
   0xd   : > { %p105_p5 = scmp.eq.s32.totalorder %s104_s8, 0 }
   0xf   : > { %s1066_s10 = scalar_select %p105_p5, %s958_s22, %s107_s9  }
  0x12   : > { %239 = sbr.rel (!%p116_p3) target bundleno = 35 (0x23), region = 40  ;;  %s241_s11 = sand.u32 (%p116_p3), 1, %s958_s22  }
  0x13   : > { %s755_s12 = sshll.u32 (%p116_p3), %s970_s25, 5  ;;  %s754_s13 = sshll.u32 (%p116_p3), %s241_s11, 6 }
  0x14   : > { %s756_s14 = sshll.u32 (%p116_p3), %s974_s26, 6  ;;  %s243_s20 = scalar_lea.vmem (%p116_p3), [#allocation2], %s754_s13 }
  0x15   : > { %s670_s15 = sadd.s32 (%p116_p3), %s756_s14, %s755_s12 }
  0x16   : > { %s757_s16 = sshll.u32 (%p116_p3), %s670_s15, 2 }
  0x17   : > { %s1075_s19 = scalar_lea.vmem (%p116_p3), %s1263_s3, %s757_s16 }
  0x18   : > { %v758_v0 = vld [vmem:[%s1075_s19 + $0x4] sm:$0xf] (%p116_p3)  ;;  %v759_v1 = vld [vmem:[%s1075_s19 + $0xc] sm:$0xf] (%p116_p3)  ;;  %v760_v2 = vld [vmem:[%s1075_s19 + $0x14] sm:$0xf] (%p116_p3) }
  0x19   : > { %267 = vst [vmem:[%s243_s20] sm:$0xf] %v758_v0  ;;  %269 = vst [vmem:[%s243_s20 + $0x4] sm:$0xf] %v759_v1  ;;  %v761_v3 = vld [vmem:[%s1075_s19 + $0x1c] sm:$0xf] }
  0x1a   : > { %271 = vst [vmem:[%s243_s20 + $0x8] sm:$0xf] %v760_v2  ;;  %v762_v4 = vld [vmem:[%s1075_s19 + $0x24] sm:$0xf]  ;;  %v763_v5 = vld [vmem:[%s1075_s19 + $0x2c] sm:$0xf] }
  0x1b   : > { %273 = vst [vmem:[%s243_s20 + $0xc] sm:$0xf] %v761_v3  ;;  %275 = vst [vmem:[%s243_s20 + $0x10] sm:$0xf] %v762_v4  ;;  %v764_v6 = vld [vmem:[%s1075_s19 + $0x34] sm:$0xf] }
  0x1c   : > { %277 = vst [vmem:[%s243_s20 + $0x14] sm:$0xf] %v763_v5  ;;  %v765_v7 = vld [vmem:[%s1075_s19 + $0x3c] sm:$0xf]  ;;  %v766_v8 = vld [vmem:[%s1075_s19 + $0x44] sm:$0xf] }
  0x1d   : > { %279 = vst [vmem:[%s243_s20 + $0x18] sm:$0xf] %v764_v6  ;;  %281 = vst [vmem:[%s243_s20 + $0x1c] sm:$0xf] %v765_v7  ;;  %v767_v9 = vld [vmem:[%s1075_s19 + $0x4c] sm:$0xf] }
  0x1e   : > { %283 = vst [vmem:[%s243_s20 + $0x20] sm:$0xf] %v766_v8  ;;  %v768_v10 = vld [vmem:[%s1075_s19 + $0x54] sm:$0xf]  ;;  %v769_v11 = vld [vmem:[%s1075_s19 + $0x5c] sm:$0xf] }
  0x1f   : > { %285 = vst [vmem:[%s243_s20 + $0x24] sm:$0xf] %v767_v9  ;;  %287 = vst [vmem:[%s243_s20 + $0x28] sm:$0xf] %v768_v10  ;;  %v770_v12 = vld [vmem:[%s1075_s19 + $0x64] sm:$0xf] }
  0x20   : > { %289 = vst [vmem:[%s243_s20 + $0x2c] sm:$0xf] %v769_v11  ;;  %v771_v13 = vld [vmem:[%s1075_s19 + $0x6c] sm:$0xf]  ;;  %v772_v14 = vld [vmem:[%s1075_s19 + $0x74] sm:$0xf] }
  0x21   : > { %291 = vst [vmem:[%s243_s20 + $0x30] sm:$0xf] %v770_v12  ;;  %293 = vst [vmem:[%s243_s20 + $0x34] sm:$0xf] %v771_v13  ;;  %v773_v15 = vld [vmem:[%s1075_s19 + $0x7c] sm:$0xf] }
  0x22   : > { %295 = vst [vmem:[%s243_s20 + $0x38] sm:$0xf] %v772_v14  ;;  %297 = vst [vmem:[%s243_s20 + $0x3c] sm:$0xf] %v773_v15 }
  0x23 PF: > { %p774_p7 = scmp.ge.s32.totalorder %s978_s27, 1  ;;  %p351_p8 = scmp.lt.s32.totalorder %s978_s27, 5 }
  0x25   : > { %p352_p9 = pnand %p774_p7, %p351_p8 }
  0x26   : > { %s358_s30 = sand.u32 (!%p352_p9), 1, %s954_s21   ;;  %s776_s7 = sshll.u32 (!%p352_p9), %s962_s23, 3  ;;  %v1101_v16 = vld [vmem:[%s1264_s4] ss:$0 sm:$0xff] (!%p352_p9) }
  0x27   : > { %355 = sbr.rel (%p352_p9) target bundleno = 83 (0x53), region = 81  ;;  %s775_s8 = sshll.u32 (!%p352_p9), %s358_s30, 6  ;;  %v1113_v25 = vld [vmem:[%s1265_s5] ss:$0 sm:$0xff] (!%p352_p9) }
  0x28   : > { %p403_p10 = scmp.lt.s32.totalorder (!%p352_p9), %s966_s24, 1  ;;  %p405_p11 = scmp.lt.s32.totalorder (!%p352_p9), %s776_s7, 15  ;;  %v1144_v44 = vld [vmem:[%s1261_s1] ss:$0 sm:$0xff] (!%p352_p9) }
  0x29   : > { %s1104_s12 = scalar_lea.vmem (!%p352_p9), [#allocation2], %s775_s8  ;;  %v1161_v61 = vld [vmem:[%s1262_s2] ss:$0 sm:$0xff] (!%p352_p9) }
  0x2a   : > { %v823_v17 = vld [vmem:[%s1104_s12] sm:$0xff] (!%p352_p9)   ;;  %v861_v18 = vld [vmem:[%s1104_s12 + $0x8] sm:$0xff] (!%p352_p9)   ;;  %v862_v19 = vld [vmem:[%s1104_s12 + $0x10] sm:$0xff] (!%p352_p9)  }
  0x2b   : > { %v824_v20 = vunpack.c.l.bf16 (!%p352_p9), %v823_v17  ;;  %v825_v21 = vunpack.c.h.bf16 (!%p352_p9), %v823_v17  ;;  %v828_v22 = vunpack.c.l.bf16 (!%p352_p9), %v861_v18  ;;  %v829_v23 = vunpack.c.h.bf16 (!%p352_p9), %v861_v18  ;;  %v863_v24 = vld [vmem:[%s1104_s12 + $0x18] sm:$0xff] (!%p352_p9)   ;;  %v1126_v38 = vld [vmem:[%s1104_s12 + $0x20] sm:$0xff] (!%p352_p9)   ;;  %v1129_v39 = vld [vmem:[%s1104_s12 + $0x28] sm:$0xff] (!%p352_p9)  }
  0x2c   : > { %v832_v26 = vunpack.c.l.bf16 (!%p352_p9), %v862_v19  ;;  %v833_v27 = vunpack.c.h.bf16 (!%p352_p9), %v862_v19  ;;  %v836_v28 = vunpack.c.l.bf16 (!%p352_p9), %v863_v24  ;;  %v837_v29 = vunpack.c.h.bf16 (!%p352_p9), %v863_v24 }
  0x2d   : > { %v542_v30 = vmul.f32 (!%p352_p9), %v824_v20, %v1101_v16  ;;  %v543_v31 = vmul.f32 (!%p352_p9), %v825_v21, %v1101_v16  ;;  %v544_v32 = vmul.f32 (!%p352_p9), %v828_v22, %v1101_v16  ;;  %v545_v33 = vmul.f32 (!%p352_p9), %v829_v23, %v1101_v16 }
  0x2e   : > { %s1280_s24 = smov (!%p403_p10, %s966_s24), 1  ;;  %s1282_s7 = smov (!%p405_p11, %s776_s7), 15  ;;  %v546_v34 = vmul.f32 %v832_v26, %v1101_v16  ;;  %v547_v35 = vmul.f32 %v833_v27, %v1101_v16  ;;  %v548_v36 = vmul.f32 %v836_v28, %v1101_v16  ;;  %v549_v37 = vmul.f32 %v837_v29, %v1101_v16 }
  0x2f   : > { %s778_s21 = sshll.u32 %s1280_s24, 5  ;;  %s777_s14 = sshll.u32 %s1282_s7, 1  ;;  %v565_v40 = vadd.f32 %v1113_v25, %v542_v30  ;;  %v566_v41 = vadd.f32 %v1113_v25, %v543_v31  ;;  %v567_v42 = vadd.f32 %v1113_v25, %v544_v32  ;;  %v568_v43 = vadd.f32 %v1113_v25, %v545_v33 }
  0x30   : > { %s1119_s24 = sadd.s32 %s778_s21, %s777_s14  ;;  %v569_v45 = vadd.f32 %v1113_v25, %v546_v34  ;;  %v570_v46 = vadd.f32 %v1113_v25, %v547_v35  ;;  %v571_v47 = vadd.f32 %v1113_v25, %v548_v36  ;;  %v572_v48 = vadd.f32 %v1113_v25, %v549_v37 }
  0x31   : > { %s779_s15 = sshll.u32 %s1119_s24, 2  ;;  %v840_v52 = vunpack.c.l.bf16 %v1126_v38  ;;  %v841_v53 = vunpack.c.h.bf16 %v1126_v38  ;;  %v844_v54 = vunpack.c.l.bf16 %v1129_v39  ;;  %v845_v55 = vunpack.c.h.bf16 %v1129_v39  ;;  %s783_s8 = sshll.u32 %s1119_s24, 3 }
  0x32   : > { %s1139_s18 = scalar_lea.vmem %s1260_s0, %s779_s15  ;;  %s1183_s21 = scalar_lea.vmem %s1266_s6, %s783_s8 }
  0x33   : > { %v791_v49 = vld [vmem:[%s1139_s18] sm:$0xff]   ;;  %v854_v50 = vld [vmem:[%s1139_s18 + $0x8] sm:$0xff]   ;;  %v855_v51 = vld [vmem:[%s1139_s18 + $0x10] sm:$0xff]   ;;  %v550_v39 = vmul.f32 %v840_v52, %v1101_v16 }
  0x34   : > { %v792_v56 = vunpack.c.l.bf16 %v791_v49  ;;  %v793_v57 = vunpack.c.h.bf16 %v791_v49  ;;  %v796_v58 = vunpack.c.l.bf16 %v854_v50  ;;  %v797_v59 = vunpack.c.h.bf16 %v854_v50  ;;  %v856_v60 = vld [vmem:[%s1139_s18 + $0x18] sm:$0xff]   ;;  %v857_v28 = vld [vmem:[%s1139_s18 + $0x20] sm:$0xff]   ;;  %v858_v33 = vld [vmem:[%s1139_s18 + $0x28] sm:$0xff]  }
  0x35   : > { %v800_v62 = vunpack.c.l.bf16 %v855_v51  ;;  %v801_v63 = vunpack.c.h.bf16 %v855_v51  ;;  %v804_v0 = vunpack.c.l.bf16 %v856_v60  ;;  %v805_v1 = vunpack.c.h.bf16 %v856_v60 }
  0x36   : > { %v464_v2 = vmul.f32 %v792_v56, %v1144_v44  ;;  %v465_v3 = vmul.f32 %v793_v57, %v1144_v44  ;;  %v466_v4 = vmul.f32 %v796_v58, %v1144_v44  ;;  %v467_v5 = vmul.f32 %v797_v59, %v1144_v44 }
  0x37   : > { %v468_v6 = vmul.f32 %v800_v62, %v1144_v44  ;;  %v469_v7 = vmul.f32 %v801_v63, %v1144_v44  ;;  %v470_v8 = vmul.f32 %v804_v0, %v1144_v44  ;;  %v471_v9 = vmul.f32 %v805_v1, %v1144_v44 }
  0x38   : > { %v487_v10 = vadd.f32 %v1161_v61, %v464_v2  ;;  %v488_v11 = vadd.f32 %v1161_v61, %v465_v3  ;;  %v489_v12 = vadd.f32 %v1161_v61, %v466_v4  ;;  %v490_v13 = vadd.f32 %v1161_v61, %v467_v5 }
  0x39   : > { %v491_v14 = vadd.f32 %v1161_v61, %v468_v6  ;;  %v492_v15 = vadd.f32 %v1161_v61, %v469_v7  ;;  %v493_v17 = vadd.f32 %v1161_v61, %v470_v8  ;;  %v494_v18 = vadd.f32 %v1161_v61, %v471_v9 }
  0x3a   : > { %v581_v19 = vadd.f32 %v565_v40, %v487_v10  ;;  %v582_v20 = vadd.f32 %v566_v41, %v488_v11  ;;  %v583_v21 = vadd.f32 %v567_v42, %v489_v12  ;;  %v584_v22 = vadd.f32 %v568_v43, %v490_v13  ;;  %v860_v10 = vld [vmem:[%s1139_s18 + $0x38] sm:$0xff]  }
  0x3b   : > { %v585_v23 = vadd.f32 %v569_v45, %v491_v14  ;;  %v586_v24 = vadd.f32 %v570_v46, %v492_v15  ;;  %v587_v26 = vadd.f32 %v571_v47, %v493_v17  ;;  %v588_v27 = vadd.f32 %v572_v48, %v494_v18  ;;  %v859_v47 = vld [vmem:[%s1139_s18 + $0x30] sm:$0xff]   ;;  %v867_v11 = vld [vmem:[%s1104_s12 + $0x38] sm:$0xff]  }
  0x3c   : > { %v597_v29 = vmax.f32 %v581_v19, 0.0  ;;  %v598_v30 = vmax.f32 %v582_v20, 0.0  ;;  %v599_v31 = vmax.f32 %v583_v21, 0.0  ;;  %v600_v32 = vmax.f32 %v584_v22, 0.0  ;;  %v866_v48 = vld [vmem:[%s1104_s12 + $0x30] sm:$0xff]  }
  0x3d   : > { %v601_v34 = vmax.f32 %v585_v23, 0.0  ;;  %v602_v35 = vmax.f32 %v586_v24, 0.0  ;;  %v603_v36 = vmax.f32 %v587_v26, 0.0  ;;  %v604_v37 = vmax.f32 %v588_v27, 0.0 }
  0x3e   : > { %613 = vst [vmem:[%s1183_s21] sm:$0xff] %v597_v29  ;;  %614 = vst [vmem:[%s1183_s21 + $0x8] sm:$0xff] %v598_v30  ;;  %v808_v38 = vunpack.c.l.bf16 %v857_v28  ;;  %v809_v40 = vunpack.c.h.bf16 %v857_v28  ;;  %v551_v41 = vmul.f32 %v841_v53, %v1101_v16  ;;  %v812_v42 = vunpack.c.l.bf16 %v858_v33 }
  0x3f   : > { %615 = vst [vmem:[%s1183_s21 + $0x10] sm:$0xff] %v599_v31  ;;  %616 = vst [vmem:[%s1183_s21 + $0x18] sm:$0xff] %v600_v32  ;;  %v552_v43 = vmul.f32 %v844_v54, %v1101_v16  ;;  %v813_v45 = vunpack.c.h.bf16 %v858_v33  ;;  %v553_v46 = vmul.f32 %v845_v55, %v1101_v16  ;;  %v573_v50 = vadd.f32 %v1113_v25, %v550_v39 }
  0x40   : > { %617 = vst [vmem:[%s1183_s21 + $0x20] sm:$0xff] %v601_v34  ;;  %618 = vst [vmem:[%s1183_s21 + $0x28] sm:$0xff] %v602_v35  ;;  %v472_v49 = vmul.f32 %v808_v38, %v1144_v44  ;;  %v473_v51 = vmul.f32 %v809_v40, %v1144_v44  ;;  %v574_v52 = vadd.f32 %v1113_v25, %v551_v41  ;;  %v816_v59 = vunpack.c.l.bf16 %v859_v47 }
  0x41   : > { %619 = vst [vmem:[%s1183_s21 + $0x30] sm:$0xff] %v603_v36  ;;  %620 = vst [vmem:[%s1183_s21 + $0x38] sm:$0xff] %v604_v37  ;;  %v474_v53 = vmul.f32 %v812_v42, %v1144_v44  ;;  %v575_v56 = vadd.f32 %v1113_v25, %v552_v43  ;;  %v475_v57 = vmul.f32 %v813_v45, %v1144_v44  ;;  %v848_v60 = vunpack.c.l.bf16 %v866_v48 }
  0x42   : > { %v576_v54 = vadd.f32 %v1113_v25, %v553_v46  ;;  %v495_v55 = vadd.f32 %v1161_v61, %v472_v49  ;;  %v496_v58 = vadd.f32 %v1161_v61, %v473_v51  ;;  %v817_v0 = vunpack.c.h.bf16 %v859_v47 }
  0x43   : > { %v497_v62 = vadd.f32 %v1161_v61, %v474_v53  ;;  %v498_v63 = vadd.f32 %v1161_v61, %v475_v57  ;;  %v849_v1 = vunpack.c.h.bf16 %v866_v48  ;;  %v476_v4 = vmul.f32 %v816_v59, %v1144_v44 }
  0x44   : > { %v589_v2 = vadd.f32 %v573_v50, %v495_v55  ;;  %v590_v3 = vadd.f32 %v574_v52, %v496_v58  ;;  %v554_v5 = vmul.f32 %v848_v60, %v1101_v16  ;;  %v477_v8 = vmul.f32 %v817_v0, %v1144_v44 }
  0x45   : > { %v591_v6 = vadd.f32 %v575_v56, %v497_v62  ;;  %v592_v7 = vadd.f32 %v576_v54, %v498_v63  ;;  %v555_v9 = vmul.f32 %v849_v1, %v1101_v16  ;;  %v499_v14 = vadd.f32 %v1161_v61, %v476_v4 }
  0x46   : > { %v605_v12 = vmax.f32 %v589_v2, 0.0  ;;  %v606_v13 = vmax.f32 %v590_v3, 0.0  ;;  %v577_v15 = vadd.f32 %v1113_v25, %v554_v5  ;;  %v500_v19 = vadd.f32 %v1161_v61, %v477_v8 }
  0x47   : > { %v607_v17 = vmax.f32 %v591_v6, 0.0  ;;  %v608_v18 = vmax.f32 %v592_v7, 0.0  ;;  %v578_v20 = vadd.f32 %v1113_v25, %v555_v9  ;;  %v820_v22 = vunpack.c.l.bf16 %v860_v10 }
  0x48   : > { %621 = vst [vmem:[%s1183_s21 + $0x40] sm:$0xff] %v605_v12  ;;  %622 = vst [vmem:[%s1183_s21 + $0x48] sm:$0xff] %v606_v13  ;;  %v593_v21 = vadd.f32 %v577_v15, %v499_v14  ;;  %v852_v23 = vunpack.c.l.bf16 %v867_v11  ;;  %v821_v24 = vunpack.c.h.bf16 %v860_v10  ;;  %v853_v27 = vunpack.c.h.bf16 %v867_v11 }
  0x49   : > { %623 = vst [vmem:[%s1183_s21 + $0x50] sm:$0xff] %v607_v17  ;;  %624 = vst [vmem:[%s1183_s21 + $0x58] sm:$0xff] %v608_v18  ;;  %v594_v26 = vadd.f32 %v578_v20, %v500_v19  ;;  %v478_v29 = vmul.f32 %v820_v22, %v1144_v44 }
  0x4a   : > { %v609_v28 = vmax.f32 %v593_v21, 0.0  ;;  %v556_v30 = vmul.f32 %v852_v23, %v1101_v16  ;;  %v479_v31 = vmul.f32 %v821_v24, %v1144_v44  ;;  %v557_v33 = vmul.f32 %v853_v27, %v1101_v16 }
  0x4b   : > { %v610_v32 = vmax.f32 %v594_v26, 0.0  ;;  %v501_v34 = vadd.f32 %v1161_v61, %v478_v29 }
  0x4c   : > { %625 = vst [vmem:[%s1183_s21 + $0x60] sm:$0xff] %v609_v28  ;;  %v579_v35 = vadd.f32 %v1113_v25, %v556_v30  ;;  %v502_v36 = vadd.f32 %v1161_v61, %v479_v31  ;;  %v580_v37 = vadd.f32 %v1113_v25, %v557_v33 }
  0x4d   : > { %626 = vst [vmem:[%s1183_s21 + $0x68] sm:$0xff] %v610_v32 }
  0x4e   : > { %v595_v38 = vadd.f32 %v579_v35, %v501_v34  ;;  %v596_v39 = vadd.f32 %v580_v37, %v502_v36 }
  0x50   : > { %v611_v40 = vmax.f32 %v595_v38, 0.0  ;;  %v612_v41 = vmax.f32 %v596_v39, 0.0 }
  0x52   : > { %627 = vst [vmem:[%s1183_s21 + $0x70] sm:$0xff] %v611_v40  ;;  %628 = vst [vmem:[%s1183_s21 + $0x78] sm:$0xff] %v612_v41 }
  0x53 PF: > { %s16_s27 = sadd.s32 1, %s978_s27   ;;  %s1267_s21 = smov %s958_s22 }
  0x54   : > { %p13_p12 = scmp.ge.s32.totalorder %s16_s27, 6   ;;  %s1268_s22 = smov %s1066_s10 }
  0x55   : > { %s1269_s23 = smov %s970_s25  ;;  %s1270_s24 = smov %s974_s26 }
  0x56   : > { %s1271_s25 = smov %s1274_s28  ;;  %s1272_s26 = smov %s1278_s29 }
  0x57   :  { %15 = sbr.rel (!%p13_p12) target bundleno = 4 (0x4), region = 123 }

// kernel: basic_block_forward.4
= control target key start
LH: loop header
LB: loop body
LE: loop exit
PB: predicated region body
PF: predicated region fallthrough
CT: control target
= control target key end

     0   :  { %s4737_s0 = inlined_call_operand.vmem [shape: bf16[2,16,16,256], index: 0, kind: input, shape index: {}, may-alias: {0,1,2}]   ;;  %s4738_s1 = inlined_call_operand.vmem [shape: bf16[2,16,16,256], index: 1, kind: input, shape index: {}, may-alias: {0,1,2}]   ;;  %s4739_s2 = inlined_call_operand.vmem [shape: bf16[2,16,16,256], index: 2, kind: input, shape index: {}, may-alias: {0,1,2}]   ;;  %s4740_s3 = inlined_call_operand.vmem [shape: f32[1,128], index: 3, kind: input, shape index: {}]   ;;  %s4741_s4 = inlined_call_operand.vmem [shape: f32[1,128], index: 4, kind: input, shape index: {}]   ;;  %s4742_s5 = inlined_call_operand.vmem [shape: bf16[3,384,128], index: 5, kind: input, shape index: {}]   ;;  %s4743_s6 = inlined_call_operand.vmem [shape: bf16[2,16,16,128], index: 6, kind: output, shape index: {0}]   ;;  %s4744_s7 = inlined_call_operand.vmem [shape: f32[2,2,2,128], index: 7, kind: output, shape index: {1}]  }
   0x1   :  { %4749 = sst [smem:[#allocation11_spill]] %s4740_s3 }
   0x2   :  { %4750 = sst [smem:[#allocation12_spill]] %s4741_s4 }
   0x3   :  { %4751 = sst [smem:[#allocation13_spill]] %s4742_s5 }
   0x4   :  { %s3885_s24 = smov 0   ;;  %s3887_s25 = smov 0  }
   0x5   :  { %s3889_s26 = smov 0   ;;  %s3891_s27 = smov 0  }
   0x6   :  { %s3893_s28 = smov 0   ;;  %s3895_s29 = smov 0  }
   0x7   :  { %s3897_s30 = smov 0   ;;  %s3899_s8 = smov 0  }
   0x8   :  { %s3901_s9 = smov 0   ;;  %s3903_s10 = smov 0  }
   0x9   :  { %s3905_s11 = smov 0  }
   0xa LB: > { %4752 = sst [smem:[#allocation6_spill]] %s3809_s26  ;;  %s27_s12 = sadd.s32 1, %s3833_s9  ;;  %s3841_s11 = sphi %s3905_s11, %s18_s11   ;;  %s3837_s10 = sphi %s3903_s10, %s4781_s10   ;;  %s3833_s9 = sphi %s3901_s9, %s4780_s9   ;;  %s3829_s8 = sphi %s3899_s8, %s4779_s8   ;;  %s3825_s30 = sphi %s3897_s30, %s4778_s30   ;;  %s3821_s29 = sphi %s3895_s29, %s4777_s29   ;;  %s3817_s28 = sphi %s3893_s28, %s4776_s28   ;;  %s3813_s27 = sphi %s3891_s27, %s4775_s27   ;;  %s3809_s26 = sphi %s3889_s26, %s4774_s26   ;;  %s3805_s25 = sphi %s3887_s25, %s4773_s25   ;;  %s3801_s24 = sphi %s3885_s24, %s4772_s24  }
   0xb   : > { %s30_s13 = sadd.s32 1, %s3837_s10  ;;  %p28_p0 = scmp.ge.s32.totalorder %s27_s12, 2 }
   0xc   : > { %s39_s14 = sadd.s32 1, %s3821_s29  ;;  %p46_p1 = scmp.ne.s32.totalorder %s3821_s29, %s3817_s28 }
   0xd   : > { %p47_p2 = scmp.eq.s32.totalorder %s3841_s11, 0  ;;  %s4783_s12 = smov (%p28_p0, %s27_s12), 0 }
   0xe   : > { %4753 = sst [smem:[#allocation7_spill]] %s4783_s12  ;;  %s4785_s13 = smov (!%p28_p0, %s30_s13), %s3837_s10 }
   0xf   : > { %s35_s15 = ssub.s32 %s3833_s9, %s4783_s12  ;;  %p3953_p3 = por %p47_p2, %p46_p1 }
  0x10   : > { %p32_p4 = scmp.ge.s32.totalorder %s4785_s13, 2  ;;  %s2826_s17 = sshll.u32 %s3833_s9, 3 }
  0x11   : > { %s2827_s18 = sadd.s32 4294967295, %s2826_s17  ;;  %s2828_s19 = sshll.u32 %s4783_s12, 3 }
  0x12   : > { %s4787_s13 = smov (%p32_p4, %s4785_s13), 0  ;;  %p64_p5 = scmp.gt.s32.totalorder %s2827_s18, 0 }
  0x13   : > { %4755 = sst [smem:[#allocation8_spill]] %s4787_s13  ;;  %s2829_s20 = sadd.s32 4294967295, %s2828_s19 }
  0x14   : > { %s34_s21 = ssub.s32 %s3837_s10, %s4787_s13  ;;  %p68_p6 = scmp.gt.s32.totalorder %s2829_s20, 0 }
  0x15   : > { %s36_s22 = sor.u32 %s35_s15, %s34_s21  ;;  %s75_s23 = sadd.s32 1, %s3813_s27 }
  0x16   : > { %p37_p7 = scmp.eq.s32.totalorder %s36_s22, 0  ;;  %p82_p8 = scmp.ne.s32.totalorder %s3813_s27, %s3809_s26 }
  0x17   : > { %s4789_s18 = smov (!%p64_p5, %s2827_s18), 0  ;;  %s4791_s20 = smov (!%p68_p6, %s2829_s20), 0 }
  0x18   : > { %s3969_s5 = scalar_select %p37_p7, %s3821_s29, %s39_s14  }
  0x19   : > { %p3973_p9 = por %p82_p8, %p47_p2  ;;  %s99_s15 = sadd.s32 8, %s2826_s17 }
  0x1a   : > { %4756 = sst [smem:[#allocation9_spill]] %s3969_s5  ;;  %s71_s13 = ssub.s32 %s4789_s18, %s4791_s20 }
  0x1b   : > { %p100_p10 = scmp.lt.s32.totalorder %s99_s15, 15  ;;  %s72_s22 = sor.u32 %s71_s13, %s34_s21 }
  0x1c   : > { %s103_s4 = sadd.s32 8, %s2828_s19  ;;  %p73_p11 = scmp.eq.s32.totalorder %s72_s22, 0 }
  0x1d   : > { %p104_p12 = scmp.lt.s32.totalorder %s103_s4, 15  ;;  %s4793_s15 = smov (!%p100_p10, %s99_s15), 15 }
  0x1e   : > { %s3981_s14 = scalar_select %p73_p11, %s3813_s27, %s75_s23  }
  0x1f   : > { %s4795_s4 = smov (!%p104_p12, %s103_s4), 15  ;;  %p118_p13 = scmp.ne.s32.totalorder %s3805_s25, %s3801_s24 }
  0x20   : > { %4758 = sst [smem:[#allocation10_spill]] %s3981_s14  ;;  %s107_s5 = ssub.s32 %s4793_s15, %s4795_s4 }
  0x21   : > { %s111_s26 = sadd.s32 1, %s3805_s25  ;;  %s108_s3 = sor.u32 %s107_s5, %s34_s21 }
  0x22   : > { %p3989_p0 = por %p118_p13, %p47_p2  ;;  %p109_p1 = scmp.eq.s32.totalorder %s108_s3, 0 }
  0x23   : > { %p2833_p4 = scmp.ge.s32.totalorder %s3841_s11, 4 }
  0x24   : > { %s3994_s13 = scalar_select %p109_p1, %s3805_s25, %s111_s26  }
  0x25   : > { %272 = sbr.rel (%p2833_p4) target bundleno = 77 (0x4d), region = 28 }
  0x2c   : > { %275 = sbr.rel (!%p3953_p3) target bundleno = 61 (0x3d), region = 32  ;;  %s277_s4 = sand.u32 (%p3953_p3), 1, %s3821_s29  }
  0x2d   : > { %s3050_s19 = sshll.u32 (%p3953_p3), %s3833_s9, 5  ;;  %s2834_s5 = sshll.u32 (%p3953_p3), %s277_s4, 6 }
  0x2e   : > { %s2837_s20 = sshll.u32 (%p3953_p3), %s3837_s10, 6  ;;  %s279_s26 = scalar_lea.vmem (%p3953_p3), [#allocation3], %s2834_s5 }
  0x2f   : > { %s283_s21 = sadd.s32 (%p3953_p3), %s3050_s19, %s2837_s20 }
  0x30   : > { %s2838_s23 = sshll.u32 (%p3953_p3), %s283_s21, 2 }
  0x31   : > { %s4005_s3 = scalar_lea.vmem (%p3953_p3), %s4737_s0, %s2838_s23 }
  0x32   : > { %v301_v0 = vld [vmem:[%s4005_s3] sm:$0xf] (%p3953_p3)  ;;  %v303_v1 = vld [vmem:[%s4005_s3 + $0x8] sm:$0xf] (%p3953_p3)  ;;  %v305_v2 = vld [vmem:[%s4005_s3 + $0x10] sm:$0xf] (%p3953_p3) }
  0x33   : > { %302 = vst [vmem:[%s279_s26] sm:$0xf] %v301_v0  ;;  %304 = vst [vmem:[%s279_s26 + $0x4] sm:$0xf] %v303_v1  ;;  %v307_v3 = vld [vmem:[%s4005_s3 + $0x18] sm:$0xf] }
  0x34   : > { %306 = vst [vmem:[%s279_s26 + $0x8] sm:$0xf] %v305_v2  ;;  %v309_v4 = vld [vmem:[%s4005_s3 + $0x20] sm:$0xf]  ;;  %v311_v5 = vld [vmem:[%s4005_s3 + $0x28] sm:$0xf] }
  0x35   : > { %308 = vst [vmem:[%s279_s26 + $0xc] sm:$0xf] %v307_v3  ;;  %310 = vst [vmem:[%s279_s26 + $0x10] sm:$0xf] %v309_v4  ;;  %v313_v6 = vld [vmem:[%s4005_s3 + $0x30] sm:$0xf] }
  0x36   : > { %312 = vst [vmem:[%s279_s26 + $0x14] sm:$0xf] %v311_v5  ;;  %v315_v7 = vld [vmem:[%s4005_s3 + $0x38] sm:$0xf]  ;;  %v317_v8 = vld [vmem:[%s4005_s3 + $0x40] sm:$0xf] }
  0x37   : > { %314 = vst [vmem:[%s279_s26 + $0x18] sm:$0xf] %v313_v6  ;;  %316 = vst [vmem:[%s279_s26 + $0x1c] sm:$0xf] %v315_v7  ;;  %v319_v9 = vld [vmem:[%s4005_s3 + $0x48] sm:$0xf] }
  0x38   : > { %318 = vst [vmem:[%s279_s26 + $0x20] sm:$0xf] %v317_v8  ;;  %v321_v10 = vld [vmem:[%s4005_s3 + $0x50] sm:$0xf]  ;;  %v323_v11 = vld [vmem:[%s4005_s3 + $0x58] sm:$0xf] }
  0x39   : > { %320 = vst [vmem:[%s279_s26 + $0x24] sm:$0xf] %v319_v9  ;;  %322 = vst [vmem:[%s279_s26 + $0x28] sm:$0xf] %v321_v10  ;;  %v325_v12 = vld [vmem:[%s4005_s3 + $0x60] sm:$0xf] }
  0x3a   : > { %324 = vst [vmem:[%s279_s26 + $0x2c] sm:$0xf] %v323_v11  ;;  %v327_v13 = vld [vmem:[%s4005_s3 + $0x68] sm:$0xf]  ;;  %v329_v14 = vld [vmem:[%s4005_s3 + $0x70] sm:$0xf] }
  0x3b   : > { %326 = vst [vmem:[%s279_s26 + $0x30] sm:$0xf] %v325_v12  ;;  %328 = vst [vmem:[%s279_s26 + $0x34] sm:$0xf] %v327_v13  ;;  %v331_v15 = vld [vmem:[%s4005_s3 + $0x78] sm:$0xf] }
  0x3c   : > { %330 = vst [vmem:[%s279_s26 + $0x38] sm:$0xf] %v329_v14  ;;  %332 = vst [vmem:[%s279_s26 + $0x3c] sm:$0xf] %v331_v15 }
  0x3d PF: > { %387 = sbr.rel (!%p3973_p9) target bundleno = 69 (0x45), region = 73  ;;  %s389_s16 = sand.u32 (%p3973_p9), 1, %s3813_s27  }
  0x3e   : > { %s2842_s14 = sshll.u32 (%p3973_p9), %s4789_s18, 2  ;;  %s2839_s4 = sshll.u32 (%p3973_p9), %s389_s16, 3 }
  0x3f   : > { %s2843_s19 = sshll.u32 (%p3973_p9), %s3837_s10, 6  ;;  %s391_s3 = scalar_lea.vmem (%p3973_p9), [#allocation4], %s2839_s4 }
  0x40   : > { %s398_s5 = sadd.s32 (%p3973_p9), %s2843_s19, %s2842_s14 }
  0x41   : > { %s2844_s20 = sshll.u32 (%p3973_p9), %s398_s5, 2 }
  0x42   : > { %s400_s22 = scalar_lea.vmem (%p3973_p9), %s4738_s1, %s2844_s20 }
  0x43   : > { %v416_v16 = vld [vmem:[%s400_s22] sm:$0xf] (%p3973_p9)  ;;  %v418_v17 = vld [vmem:[%s400_s22 + $0x8] sm:$0xf] (%p3973_p9) }
  0x44   : > { %417 = vst [vmem:[%s391_s3] sm:$0xf] %v416_v16  ;;  %419 = vst [vmem:[%s391_s3 + $0x4] sm:$0xf] %v418_v17 }
  0x45 PF: > { %446 = sbr.rel (!%p3989_p0) target bundleno = 77 (0x4d), region = 114  ;;  %s448_s12 = sand.u32 (%p3989_p0), 1, %s3805_s25  }
  0x46   : > { %s2847_s18 = sshll.u32 (%p3989_p0), %s4793_s15, 2  ;;  %s2845_s26 = sshll.u32 (%p3989_p0), %s448_s12, 3 }
  0x47   : > { %s2848_s16 = sshll.u32 (%p3989_p0), %s3837_s10, 6  ;;  %s450_s4 = scalar_lea.vmem (%p3989_p0), [#allocation5], %s2845_s26 }
  0x48   : > { %s457_s14 = sadd.s32 (%p3989_p0), %s2848_s16, %s2847_s18 }
  0x49   : > { %s2849_s19 = sshll.u32 (%p3989_p0), %s457_s14, 2 }
  0x4a   : > { %s459_s21 = scalar_lea.vmem (%p3989_p0), %s4739_s2, %s2849_s19 }
  0x4b   : > { %v475_v18 = vld [vmem:[%s459_s21] sm:$0xf] (%p3989_p0)  ;;  %v477_v19 = vld [vmem:[%s459_s21 + $0x8] sm:$0xf] (%p3989_p0) }
  0x4c   : > { %476 = vst [vmem:[%s450_s4] sm:$0xf] %v475_v18  ;;  %478 = vst [vmem:[%s450_s4 + $0x4] sm:$0xf] %v477_v19 }
  0x4d PF: > { %p2850_p2 = scmp.ge.s32.totalorder %s3841_s11, 1  ;;  %p504_p3 = scmp.lt.s32.totalorder %s3841_s11, 5 }
  0x4f   : > { %p505_p5 = pnand %p2850_p2, %p504_p3 }
  0x50   : > { %s2854_s15 = sshll.u32 (!%p505_p5), %s3825_s30, 3  ;;  %p587_p6 = scmp.lt.s32.totalorder (!%p505_p5), %s3829_s8, 1  ;;  %vm730_vm0 = vcmask (!%p505_p5), 1047559   ;;  %vm731_vm1 = vsmask.f32 (!%p505_p5), 7966  ;;  %vm763_vm3 = vcmask (!%p505_p5), 1040384  }
  0x51   : > { %508 = sbr.rel (%p505_p5) target bundleno = 570 (0x23a), region = 155  ;;  %p589_p7 = scmp.lt.s32.totalorder (!%p505_p5), %s2854_s15, 15  ;;  %vm4044_vm2 = vmand (!%p505_p5), %vm730_vm0, %vm731_vm1  ;;  %v733_v21 = vld [vmem:[#allocation2] sm:$0x80] (!%p505_p5)  ;;  %v736_v22 = vld [vmem:[#allocation2 + $0x18] sm:$0x80] (!%p505_p5) }
  0x52   : > { %p599_p8 = scmp.lt.s32.totalorder (!%p505_p5), %s3825_s30, 1  ;;  %v734_v23 = vsel (!%p505_p5), %vm4044_vm2, 0, %v733_v21  ;;  %v737_v24 = vsel (!%p505_p5), %vm4044_vm2, 0, %v736_v22  ;;  %v739_v25 = vld [vmem:[#allocation2 + $0x30] sm:$0x80] (!%p505_p5)  ;;  %s511_s18 = sand.u32 (!%p505_p5), 1, %s3817_s28  }
  0x53   : > { %735 = vst [vmem:[#allocation2] sm:$0x80] (!%p505_p5), %v734_v23  ;;  %738 = vst [vmem:[#allocation2 + $0x18] sm:$0x80] (!%p505_p5), %v737_v24  ;;  %v740_v26 = vsel (!%p505_p5), %vm4044_vm2, 0, %v739_v25  ;;  %s2851_s19 = sshll.u32 (!%p505_p5), %s511_s18, 6 }
  0x54   : > { %v742_v27 = vld [vmem:[#allocation2 + $0x48] sm:$0x80] (!%p505_p5)  ;;  %v745_v28 = vld [vmem:[#allocation2 + $0x60] sm:$0x80] (!%p505_p5)  ;;  %741 = vst [vmem:[#allocation2 + $0x30] sm:$0x80] (!%p505_p5), %v740_v26 }
  0x55   : > { %v743_v29 = vsel (!%p505_p5), %vm4044_vm2, 0, %v742_v27  ;;  %v746_v30 = vsel (!%p505_p5), %vm4044_vm2, 0, %v745_v28  ;;  %v748_v31 = vld [vmem:[#allocation2 + $0x78] sm:$0x80] (!%p505_p5)  ;;  %v751_v33 = vld [vmem:[#allocation2 + $0x90] sm:$0x80] (!%p505_p5) }
  0x56   : > { %744 = vst [vmem:[#allocation2 + $0x48] sm:$0x80] (!%p505_p5), %v743_v29  ;;  %747 = vst [vmem:[#allocation2 + $0x60] sm:$0x80] (!%p505_p5), %v746_v30  ;;  %v749_v32 = vsel (!%p505_p5), %vm4044_vm2, 0, %v748_v31  ;;  %v752_v35 = vsel (!%p505_p5), %vm4044_vm2, 0, %v751_v33 }
  0x57   : > { %v754_v34 = vld [vmem:[#allocation2 + $0xa8] sm:$0x80] (!%p505_p5)  ;;  %750 = vst [vmem:[#allocation2 + $0x78] sm:$0x80] (!%p505_p5), %v749_v32  ;;  %v757_v37 = vld [vmem:[#allocation2 + $0xc0] sm:$0x80] (!%p505_p5) }
  0x58   : > { %s4797_s8 = smov (!%p587_p6, %s3829_s8), 1  ;;  %s4799_s15 = smov (!%p589_p7, %s2854_s15), 15  ;;  %v755_v36 = vsel %vm4044_vm2, 0, %v754_v34  ;;  %v760_v38 = vld [vmem:[#allocation2 + $0xd8] sm:$0x80]  ;;  %v758_v39 = vsel %vm4044_vm2, 0, %v757_v37 }
  0x59   : > { %s2856_s17 = sshll.u32 %s4797_s8, 5  ;;  %s2858_s23 = sshll.u32 %s4797_s8, 1  ;;  %753 = vst [vmem:[#allocation2 + $0x90] sm:$0x80] %v752_v35  ;;  %756 = vst [vmem:[#allocation2 + $0xa8] sm:$0x80] %v755_v36 }
  0x5a   : > { %s2855_s22 = sshll.u32 %s4799_s15, 1  ;;  %v761_v40 = vsel %vm4044_vm2, 0, %v760_v38  ;;  %vm764_vm4 = vsmask.f32 256  ;;  %759 = vst [vmem:[#allocation2 + $0xc0] sm:$0x80] %v758_v39 }
  0x5b   : > { %s593_s3 = sadd.s32 %s2856_s17, %s2855_s22  ;;  %762 = vst [vmem:[#allocation2 + $0xd8] sm:$0x80] %v761_v40  ;;  %vm4081_vm5 = vmand %vm763_vm3, %vm764_vm4  ;;  %v766_v42 = vld [vmem:[#allocation2 + $0x10] sm:$0x1]  ;;  %v769_v43 = vld [vmem:[#allocation2 + $0x28] sm:$0x1] }
  0x5c   : > { %s2857_s12 = sshll.u32 %s593_s3, 2  ;;  %v767_v44 = vsel %vm4081_vm5, 0, %v766_v42  ;;  %v770_v45 = vsel %vm4081_vm5, 0, %v769_v43  ;;  %v772_v46 = vld [vmem:[#allocation2 + $0x40] sm:$0x1]  ;;  %s4104_s8 = scalar_lea.vmem [#allocation3], %s2851_s19 }
  0x5d   : > { %s4077_s14 = scalar_lea.vmem %s4743_s6, %s2857_s12  ;;  %768 = vst [vmem:[#allocation2 + $0x10] sm:$0x1] %v767_v44  ;;  %771 = vst [vmem:[#allocation2 + $0x28] sm:$0x1] %v770_v45  ;;  %v773_v47 = vsel %vm4081_vm5, 0, %v772_v46  ;;  %v3068_v57 = vld [vmem:[%s4104_s8] sm:$0xff]  }
  0x5e   : > { %s600_s5 = scalar_select %p599_p8, %s3825_s30, 1  ;;  %v775_v48 = vld [vmem:[#allocation2 + $0x58] sm:$0x1]  ;;  %v778_v49 = vld [vmem:[#allocation2 + $0x70] sm:$0x1]  ;;  %v3069_v61 = vunpack.c.l.bf16 %v3068_v57  ;;  %v3070_v62 = vunpack.c.h.bf16 %v3068_v57  ;;  %v3148_v8 = vld [vmem:[%s4104_s8 + $0x10] sm:$0xff]  }
  0x5f   : > { %774 = vst [vmem:[#allocation2 + $0x40] sm:$0x1] %v773_v47  ;;  %v776_v50 = vsel %vm4081_vm5, 0, %v775_v48  ;;  %v779_v51 = vsel %vm4081_vm5, 0, %v778_v49  ;;  %v781_v52 = vld [vmem:[#allocation2 + $0x88] sm:$0x1]  ;;  %v3077_v12 = vunpack.c.l.bf16 %v3148_v8  ;;  %v3078_v13 = vunpack.c.h.bf16 %v3148_v8 }
  0x60   : > { %s602_s28 = sadd.s32 %s2858_s23, %s600_s5  ;;  %v784_v53 = vld [vmem:[#allocation2 + $0xa0] sm:$0x1]  ;;  %777 = vst [vmem:[#allocation2 + $0x58] sm:$0x1] %v776_v50  ;;  %780 = vst [vmem:[#allocation2 + $0x70] sm:$0x1] %v779_v51 }
  0x61   : > { %s2859_s20 = sshll.u32 %s602_s28, 1  ;;  %v782_v54 = vsel %vm4081_vm5, 0, %v781_v52  ;;  %v785_v55 = vsel %vm4081_vm5, 0, %v784_v53  ;;  %v787_v56 = vld [vmem:[#allocation2 + $0xb8] sm:$0x1]  ;;  %s4764_s22 = sld [smem:[#allocation11_spill]] }
  0x62   : > { %s4110_s15 = scalar_lea.vmem %s4744_s7, %s2859_s20  ;;  %783 = vst [vmem:[#allocation2 + $0x88] sm:$0x1] %v782_v54  ;;  %786 = vst [vmem:[#allocation2 + $0xa0] sm:$0x1] %v785_v55  ;;  %v788_v58 = vsel %vm4081_vm5, 0, %v787_v56  ;;  %v3147_v63 = vld [vmem:[%s4104_s8 + $0x8] sm:$0xff]  }
  0x63   : > { %v790_v59 = vld [vmem:[#allocation2 + $0xd0] sm:$0x1]  ;;  %v793_v60 = vld [vmem:[#allocation2 + $0xe8] sm:$0x1]  ;;  %789 = vst [vmem:[#allocation2 + $0xb8] sm:$0x1] %v788_v58  ;;  %v3073_v4 = vunpack.c.l.bf16 %v3147_v63  ;;  %v3074_v5 = vunpack.c.h.bf16 %v3147_v63 }
  0x64   : > { %v791_v0 = vsel %vm4081_vm5, 0, %v790_v59  ;;  %v794_v1 = vsel %vm4081_vm5, 0, %v793_v60  ;;  %s4765_s18 = sld [smem:[#allocation12_spill]]  ;;  %s4766_s26 = sld [smem:[#allocation6_spill]]  ;;  %v3149_v9 = vld [vmem:[%s4104_s8 + $0x18] sm:$0xff]   ;;  %v3150_v22 = vld [vmem:[%s4104_s8 + $0x20] sm:$0xff]  }
  0x65   : > { %792 = vst [vmem:[#allocation2 + $0xd0] sm:$0x1] %v791_v0  ;;  %795 = vst [vmem:[#allocation2 + $0xe8] sm:$0x1] %v794_v1  ;;  %v3081_v16 = vunpack.c.l.bf16 %v3149_v9  ;;  %v3082_v17 = vunpack.c.h.bf16 %v3149_v9  ;;  %v3151_v31 = vld [vmem:[%s4104_s8 + $0x28] sm:$0xff]   ;;  %s525_s5 = sand.u32 1, %s3801_s24   ;;  %v3085_v35 = vunpack.c.l.bf16 %v3150_v22  ;;  %v3086_v40 = vunpack.c.h.bf16 %v3150_v22 }
  0x66   : > { %v3152_v36 = vld [vmem:[%s4104_s8 + $0x30] sm:$0xff]   ;;  %v3089_v44 = vunpack.c.l.bf16 %v3151_v31  ;;  %v3153_v45 = vld [vmem:[%s4104_s8 + $0x38] sm:$0xff]   ;;  %s4156_s24 = sshll.u32 %s525_s5, 3  ;;  %v3090_v48 = vunpack.c.h.bf16 %v3151_v31  ;;  %p2862_p9 = scmp.ne.s32.totalorder %s3825_s30, 0 }
  0x67   : > { %v4122_v2 = vld [vmem:[%s4764_s22] ss:$0 sm:$0xff]  ;;  %v3093_v49 = vunpack.c.l.bf16 %v3152_v36  ;;  %v3094_v53 = vunpack.c.h.bf16 %v3152_v36  ;;  %v3097_v57 = vunpack.c.l.bf16 %v3153_v45  ;;  %s527_s20 = scalar_lea.vmem [#allocation5], %s4156_s24 }
  0x68   : > { %v646_v6 = vmul.f32 %v3069_v61, %v4122_v2  ;;  %v647_v7 = vmul.f32 %v3070_v62, %v4122_v2  ;;  %v648_v10 = vmul.f32 %v3073_v4, %v4122_v2  ;;  %v649_v11 = vmul.f32 %v3074_v5, %v4122_v2  ;;  %v3104_v9 = vld [vmem:[%s527_s20] sm:$0xff]  }
  0x69   : > { %v650_v20 = vmul.f32 %v3077_v12, %v4122_v2  ;;  %v651_v21 = vmul.f32 %v3078_v13, %v4122_v2  ;;  %v652_v25 = vmul.f32 %v3081_v16, %v4122_v2  ;;  %v653_v26 = vmul.f32 %v3082_v17, %v4122_v2 }
  0x6a   : > { %v4127_v3 = vld [vmem:[%s4765_s18] ss:$0 sm:$0xff]  ;;  %s518_s16 = sand.u32 1, %s4766_s26   ;;  %v654_v43 = vmul.f32 %v3085_v35, %v4122_v2  ;;  %v655_v47 = vmul.f32 %v3086_v40, %v4122_v2  ;;  %v656_v52 = vmul.f32 %v3089_v44, %v4122_v2  ;;  %v657_v55 = vmul.f32 %v3090_v48, %v4122_v2 }
  0x6b   : > { %v668_v14 = vadd.f32 %v4127_v3, %v646_v6  ;;  %v669_v15 = vadd.f32 %v4127_v3, %v647_v7  ;;  %v670_v18 = vadd.f32 %v4127_v3, %v648_v10  ;;  %v671_v19 = vadd.f32 %v4127_v3, %v649_v11  ;;  %s4148_s19 = sshll.u32 %s518_s16, 3 }
  0x6c   : > { %v672_v29 = vadd.f32 %v4127_v3, %v650_v20  ;;  %v673_v30 = vadd.f32 %v4127_v3, %v651_v21  ;;  %v674_v33 = vadd.f32 %v4127_v3, %v652_v25  ;;  %v675_v34 = vadd.f32 %v4127_v3, %v653_v26  ;;  %s520_s28 = scalar_lea.vmem [#allocation4], %s4148_s19 }
  0x6d   : > { %v684_v23 = vmax.f32 %v668_v14, 0.0  ;;  %v685_v24 = vmax.f32 %v669_v15, 0.0  ;;  %v686_v27 = vmax.f32 %v670_v18, 0.0  ;;  %v687_v28 = vmax.f32 %v671_v19, 0.0  ;;  %v3100_v58 = vld [vmem:[%s520_s28] sm:$0xff]  }
  0x6e   : > { %v688_v38 = vmax.f32 %v672_v29, 0.0  ;;  %v689_v39 = vmax.f32 %v673_v30, 0.0  ;;  %v690_v41 = vmax.f32 %v674_v33, 0.0  ;;  %v691_v42 = vmax.f32 %v675_v34, 0.0 }
  0x6f   : > { %v700_v32 = vpack.c.bf16 %v685_v24, %v684_v23  ;;  %v701_v37 = vpack.c.bf16 %v687_v28, %v686_v27  ;;  %v676_v51 = vadd.f32 %v4127_v3, %v654_v43  ;;  %v677_v54 = vadd.f32 %v4127_v3, %v655_v47 }
  0x70   : > { %v702_v46 = vpack.c.bf16 %v689_v39, %v688_v38  ;;  %v703_v50 = vpack.c.bf16 %v691_v42, %v690_v41  ;;  %v658_v56 = vmul.f32 %v3093_v49, %v4122_v2  ;;  %v678_v60 = vadd.f32 %v4127_v3, %v656_v52 }
  0x71   : > { %797 = vst [vmem:[#allocation2 + $0x20] sm:$0xff] %v700_v32  ;;  %798 = vst [vmem:[#allocation2 + $0x38] sm:$0xff] %v701_v37  ;;  %v692_v59 = vmax.f32 %v676_v51, 0.0  ;;  %v659_v61 = vmul.f32 %v3094_v53, %v4122_v2  ;;  %v3098_v62 = vunpack.c.h.bf16 %v3153_v45  ;;  %v693_v63 = vmax.f32 %v677_v54, 0.0 }
  0x72   : > { %799 = vst [vmem:[#allocation2 + $0x50] sm:$0xff] %v702_v46  ;;  %800 = vst [vmem:[#allocation2 + $0x68] sm:$0xff] %v703_v50  ;;  %v679_v0 = vadd.f32 %v4127_v3, %v657_v55  ;;  %v680_v1 = vadd.f32 %v4127_v3, %v658_v56  ;;  %v660_v4 = vmul.f32 %v3097_v57, %v4122_v2  ;;  %v694_v5 = vmax.f32 %v678_v60, 0.0 }
  0x73   : > { %v681_v6 = vadd.f32 %v4127_v3, %v659_v61  ;;  %v661_v7 = vmul.f32 %v3098_v62, %v4122_v2  ;;  %v3101_v8 = vunpack.c.l.bf16 %v3100_v58  ;;  %v704_v10 = vpack.c.bf16 %v693_v63, %v692_v59 }
  0x74   : > { %v695_v11 = vmax.f32 %v679_v0, 0.0  ;;  %v696_v12 = vmax.f32 %v680_v1, 0.0  ;;  %v682_v13 = vadd.f32 %v4127_v3, %v660_v4  ;;  %v3102_v16 = vunpack.c.h.bf16 %v3100_v58 }
  0x75   : > { %v697_v14 = vmax.f32 %v681_v6, 0.0  ;;  %v683_v15 = vadd.f32 %v4127_v3, %v661_v7  ;;  %v712_v17 = vmul.f32 %v3101_v8, %v4122_v2  ;;  %801 = vst [vmem:[#allocation2 + $0x80] sm:$0xff] %v704_v10  ;;  %v3105_v20 = vunpack.c.l.bf16 %v3104_v9 }
  0x76   : > { %v705_v18 = vpack.c.bf16 %v695_v11, %v694_v5  ;;  %v698_v19 = vmax.f32 %v682_v13, 0.0  ;;  %v3106_v21 = vunpack.c.h.bf16 %v3104_v9  ;;  %v713_v24 = vmul.f32 %v3102_v16, %v4122_v2 }
  0x77   : > { %v706_v22 = vpack.c.bf16 %v697_v14, %v696_v12  ;;  %v699_v23 = vmax.f32 %v683_v15, 0.0  ;;  %v714_v25 = vadd.f32 %v4127_v3, %v712_v17  ;;  %v723_v26 = vmul.f32 %v3105_v20, %v4122_v2 }
  0x78   : > { %802 = vst [vmem:[#allocation2 + $0x98] sm:$0xff] %v705_v18  ;;  %v724_v27 = vmul.f32 %v3106_v21, %v4122_v2  ;;  %v715_v29 = vadd.f32 %v4127_v3, %v713_v24  ;;  %v3843_v2 = vmov (!%p2862_p9), 0  }
  0x79   : > { %803 = vst [vmem:[#allocation2 + $0xb0] sm:$0xff] %v706_v22  ;;  %v707_v28 = vpack.c.bf16 %v699_v23, %v698_v19  ;;  %v716_v30 = vmax.f32 %v714_v25, 0.0  ;;  %v725_v31 = vadd.f32 %v4127_v3, %v723_v26 }
  0x7a   : > { %v726_v32 = vadd.f32 %v4127_v3, %v724_v27  ;;  %v717_v33 = vmax.f32 %v715_v29, 0.0  ;;  %811 = sbr.rel (%p2862_p9) target bundleno = 129 (0x81), region = 171 }
  0x7b   : > { %804 = vst [vmem:[#allocation2 + $0xc8] sm:$0xff] %v707_v28  ;;  %v727_v34 = vmax.f32 %v725_v31, 0.0 }
  0x7c   : > { %v728_v35 = vmax.f32 %v726_v32, 0.0  ;;  %v718_v36 = vpack.c.bf16 %v717_v33, %v716_v30 }
  0x7e   : > { %v729_v37 = vpack.c.bf16 %v728_v35, %v727_v34  ;;  %805 = vst [vmem:[#allocation2 + $0x8] sm:$0xff] %v718_v36 }
  0x7f   : > { %812 = vst [vmem:[#allocation2 + $0x8] sm:$0xff] (!%p2862_p9), %v3843_v2 }
  0x80   : > { %807 = vst [vmem:[#allocation2 + $0xe0] sm:$0xff] %v729_v37 }
  0x81 PF: > { %p2863_p10 = scmp.ne.s32.totalorder %s3825_s30, 1 }
  0x82   : > { %v3844_v38 = vmov (!%p2863_p10), 0  }
  0x83   : > { %816 = sbr.rel (%p2863_p10) target bundleno = 138 (0x8a), region = 175  ;;  %817 = vst [vmem:[#allocation2 + $0xe0] sm:$0xff] (!%p2863_p10), %v3844_v38 }
  0x8a PF: > { %s4767_s4 = sld [smem:[#allocation13_spill]]  ;;  %v821_v60 = vld [vmem:[#allocation2 + $0x20] sm:$0xff]  ;;  %v841_v61 = vld [vmem:[#allocation2 + $0x28] sm:$0x1]  ;;  %vm948_vm6 = vcmask 1046528   ;;  %v4254_v6 = vld [vmem:[#allocation2 + $0x38] sm:$0xff] }
  0x8b   : > { %v820_v62 = vld [vmem:[#allocation2 + $0x18] sm:$0x80]  ;;  %v866_v0 = vshll.u32 %v821_v60, 16  ;;  %v869_v1 = vshrl.u32 %v821_v60, 16  ;;  %v952_v4 = vrot.slane %v821_v60, 1  ;;  %v953_v5 = vrot.slane %v841_v61, 1 }
  0x8c   : > { %v1011_v8 = vshrl.u32 %v820_v62, 16  ;;  %v843_v9 = vld [vmem:[#allocation2 + $0x40] sm:$0x1]  ;;  %v955_v10 = vrot.slane %v4254_v6, 1  ;;  %v873_v36 = vshll.u32 %v4254_v6, 16 }
  0x8d   : > { %v868_v11 = vrot.slane %v866_v0, 1  ;;  %v954_v12 = vsel %vm948_vm6, %v952_v4, %v953_v5  ;;  %v1030_v13 = vshrl.u32 %v952_v4, 16  ;;  %v1014_v14 = vrot.slane %v869_v1, 7 }
  0x8e   : > { %v1034_v16 = vshrl.u32 %v954_v12, 16  ;;  %v1037_v17 = vshll.u32 %v954_v12, 16  ;;  %v956_v18 = vrot.slane %v843_v9, 1  ;;  %v1013_v22 = vrot.slane %v1011_v8, 7 }
  0x8f   : > { %v871_v20 = vor.u32 %v869_v1, %v868_v11  ;;  %v1018_v21 = vshrl.u32 %v868_v11, 16  ;;  %v1032_v23 = vrot.slane %v1030_v13, 7  ;;  %v1061_v26 = vshrl.u32 %v955_v10, 16 }
  0x90   : > { %v3683_v3 = vld [vmem:[%s4767_s4 + $0x100] sm:$0xff]   ;;  %v3686_v41 = vld [vmem:[%s4767_s4 + $0x108] sm:$0xff]   ;;  %v3689_v44 = vld [vmem:[%s4767_s4 + $0x110] sm:$0xff]   ;;  %v1036_v24 = vrot.slane %v1034_v16, 7  ;;  %v957_v25 = vsel %vm948_vm6, %v955_v10, %v956_v18  ;;  %v1015_v30 = vor.u32 %v1014_v14, %v866_v0 }
  0x91   : > { %v3684_v39 = vld [vmem:[%s4767_s4 + $0x140] sm:$0xff]   ;;  %3161 = vmatprep.subr.bf16.mxu0 %v3683_v3  ;;  %v3687_v42 = vld [vmem:[%s4767_s4 + $0x148] sm:$0xff]   ;;  %v3690_v45 = vld [vmem:[%s4767_s4 + $0x150] sm:$0xff]   ;;  %v1020_v27 = vrot.slane %v1018_v21, 7  ;;  %v1022_v28 = vshrl.u32 %v871_v20, 16  ;;  %v1025_v29 = vshll.u32 %v871_v20, 16 }
  0x92   : > { %v3685_v40 = vld [vmem:[%s4767_s4 + $0xc0] sm:$0xff]   ;;  %3401 = vmatprep.subr.bf16.mxu1 %v3684_v39  ;;  %v3688_v43 = vld [vmem:[%s4767_s4 + $0xc8] sm:$0xff]   ;;  %v3691_v46 = vld [vmem:[%s4767_s4 + $0xd0] sm:$0xff]   ;;  %v1039_v31 = vor.u32 %v1037_v17, %v1036_v24  ;;  %v1063_v32 = vrot.slane %v1061_v26, 7  ;;  %v1065_v33 = vshrl.u32 %v957_v25, 16  ;;  %v1068_v34 = vshll.u32 %v957_v25, 16 }
  0x93   : > { %3162 = vmatpush3.bf16.msra.mxu0 %v3685_v40  ;;  %3402 = vmatpush3.bf16.msra.mxu1 %v3684_v39  ;;  %v3692_v47 = vld [vmem:[%s4767_s4 + $0x118] sm:$0xff]   ;;  %v3695_v50 = vld [vmem:[%s4767_s4 + $0x120] sm:$0xff]   ;;  %v3698_v53 = vld [vmem:[%s4767_s4 + $0x128] sm:$0xff]   ;;  %v1024_v35 = vrot.slane %v1022_v28, 7  ;;  %v876_v39 = vshrl.u32 %v4254_v6, 16 }
  0x94   : > { %3163 = vmatprep.subr.bf16.mxu0 %v3686_v41  ;;  %3403 = vmatprep.subr.bf16.mxu1 %v3687_v42  ;;  %v3693_v48 = vld [vmem:[%s4767_s4 + $0x158] sm:$0xff]   ;;  %v3696_v51 = vld [vmem:[%s4767_s4 + $0x160] sm:$0xff]   ;;  %v3699_v54 = vld [vmem:[%s4767_s4 + $0x168] sm:$0xff]   ;;  %v4270_v37 = vsel %vm764_vm4, %v1032_v23, %v1039_v31  ;;  %v1067_v2 = vrot.slane %v1065_v33, 7  ;;  %v4281_v41 = vsel %vm764_vm4, %v1013_v22, %v1015_v30 }
  0x95   : > { %v3694_v49 = vld [vmem:[%s4767_s4 + $0xd8] sm:$0xff]   ;;  %v3697_v52 = vld [vmem:[%s4767_s4 + $0xe0] sm:$0xff]   ;;  %v3700_v55 = vld [vmem:[%s4767_s4 + $0xe8] sm:$0xff]   ;;  %v1027_v40 = vor.u32 %v1025_v29, %v1024_v35  ;;  %3417 = vmatprep.mubr.bf16.mxu1 %v4270_v37 }
  0x96   : > { %v3701_v56 = vld [vmem:[%s4767_s4 + $0x130] sm:$0xff]   ;;  %v3704_v59 = vld [vmem:[%s4767_s4 + $0x138] sm:$0xff]   ;;  %v3707_v15 = vld [vmem:[%s4767_s4 + $0x40] sm:$0xff]  }
  0x97   : > { %3164 = vmatpush3.bf16.msra.mxu0 %v3688_v43  ;;  %3404 = vmatpush3.bf16.msra.mxu1 %v3687_v42  ;;  %v3702_v57 = vld [vmem:[%s4767_s4 + $0x170] sm:$0xff]   ;;  %v3705_v63 = vld [vmem:[%s4767_s4 + $0x178] sm:$0xff]   ;;  %v3708_v19 = vld [vmem:[%s4767_s4 + $0x1c0] sm:$0xff]   ;;  %v875_v43 = vrot.slane %v873_v36, 1 }
  0x98   : > { %3165 = vmatprep.subr.bf16.mxu0 %v3689_v44  ;;  %3405 = vmatprep.subr.bf16.mxu1 %v3690_v45  ;;  %v3703_v58 = vld [vmem:[%s4767_s4 + $0xf0] sm:$0xff]   ;;  %v3706_v7 = vld [vmem:[%s4767_s4 + $0xf8] sm:$0xff]   ;;  %v3709_v38 = vld [vmem:[%s4767_s4] sm:$0xff]  }
  0x99   : > { %v3710_v3 = vld [vmem:[%s4767_s4 + $0x180] sm:$0xff]   ;;  %v3711_v42 = vld [vmem:[%s4767_s4 + $0x48] sm:$0xff]   ;;  %v4286_v44 = vld [vmem:[#allocation2 + $0x50] sm:$0xff] }
  0x9a   : > { %v3714_v62 = vld [vmem:[%s4767_s4 + $0x1c8] sm:$0xff]   ;;  %v3713_v9 = vld [vmem:[%s4767_s4 + $0x50] sm:$0xff]   ;;  %v3717_v23 = vld [vmem:[%s4767_s4 + $0x58] sm:$0xff]   ;;  %v880_v26 = vshll.u32 %v4286_v44, 16 }
  0x9b   : > { %3166 = vmatpush3.bf16.msra.mxu0 %v3691_v46  ;;  %3406 = vmatpush3.bf16.msra.mxu1 %v3690_v45  ;;  %v845_v45 = vld [vmem:[#allocation2 + $0x58] sm:$0x1]  ;;  %v822_v46 = vld [vmem:[#allocation2 + $0x30] sm:$0x80]  ;;  %v3716_v13 = vld [vmem:[%s4767_s4 + $0x188] sm:$0xff]  }
  0x9c   : > { %3167 = vmatprep.subr.bf16.mxu0 %v3692_v47  ;;  %3407 = vmatprep.subr.bf16.mxu1 %v3693_v48  ;;  %v1070_v47 = vor.u32 %v1068_v34, %v1067_v2  ;;  %v4332_v28 = vld [vmem:[#allocation2 + $0x80] sm:$0xff]  ;;  %v849_v29 = vld [vmem:[#allocation2 + $0x88] sm:$0x1]  ;;  %v4334_v30 = vld [vmem:[#allocation2 + $0x98] sm:$0xff]  ;;  %v882_v2 = vrot.slane %v880_v26, 1 }
  0x9d   : > { %v964_v33 = vrot.slane %v4332_v28, 1  ;;  %v965_v34 = vrot.slane %v849_v29, 1  ;;  %v824_v35 = vld [vmem:[#allocation2 + $0x48] sm:$0x80] }
  0x9e   : > { %v4383_v29 = vld [vmem:[#allocation2 + $0xc8] sm:$0xff] }
  0x9f   : > { %3168 = vmatpush3.bf16.msra.mxu0 %v3694_v49  ;;  %3408 = vmatpush3.bf16.msra.mxu1 %v3693_v48  ;;  %v958_v48 = vrot.slane %v4286_v44, 1  ;;  %v959_v49 = vrot.slane %v845_v45, 1 }
  0xa0   : > { %3169 = vmatprep.subr.bf16.mxu0 %v3695_v50  ;;  %3409 = vmatprep.subr.bf16.mxu1 %v3696_v51  ;;  %v1042_v50 = vshrl.u32 %v822_v46, 16 }
  0xa1   : > { %v1092_v60 = vshrl.u32 %v958_v48, 16 }
  0xa2   : > { %v1044_v61 = vrot.slane %v1042_v50, 7  ;;  %v3720_v50 = vld [vmem:[%s4767_s4 + $0x1d0] sm:$0xff]  }
  0xa3   : > { %3170 = vmatpush3.bf16.msra.mxu0 %v3697_v52  ;;  %3410 = vmatpush3.bf16.msra.mxu1 %v3696_v51  ;;  %v4289_v51 = vld [vmem:[#allocation2 + $0x68] sm:$0xff]  ;;  %v847_v52 = vld [vmem:[#allocation2 + $0x70] sm:$0x1]  ;;  %v1094_v5 = vrot.slane %v1092_v60, 7 }
  0xa4   : > { %3171 = vmatprep.subr.bf16.mxu0 %v3698_v53  ;;  %3411 = vmatprep.subr.bf16.mxu1 %v3699_v54  ;;  %v4292_v53 = vsel %vm764_vm4, %v1020_v27, %v1027_v40  ;;  %v961_v8 = vrot.slane %v4289_v51, 1  ;;  %v962_v12 = vrot.slane %v847_v52, 1  ;;  %v883_v27 = vshrl.u32 %v4286_v44, 16  ;;  %v3719_v40 = vld [vmem:[%s4767_s4 + $0x60] sm:$0xff]  }
  0xa5   : > { %1558 = vmatprep.mubr.bf16.mxu0 %v4292_v53  ;;  %v1154_v44 = vshrl.u32 %v964_v33, 16 }
  0xa6   : > { %v1123_v14 = vshrl.u32 %v961_v8, 16  ;;  %v963_v18 = vsel %vm948_vm6, %v961_v8, %v962_v12  ;;  %v885_v46 = vor.u32 %v883_v27, %v882_v2 }
  0xa7   : > { %3172 = vmatpush3.bf16.msra.mxu0 %v3700_v55  ;;  %3412 = vmatpush3.bf16.msra.mxu1 %v3699_v54  ;;  %v878_v54 = vor.u32 %v876_v39, %v875_v43  ;;  %v1049_v55 = vshrl.u32 %v875_v43, 16  ;;  %v1127_v21 = vshrl.u32 %v963_v18, 16  ;;  %v1130_v22 = vshll.u32 %v963_v18, 16  ;;  %v853_v18 = vld [vmem:[#allocation2 + $0xb8] sm:$0x1] }
  0xa8   : > { %3173 = vmatprep.subr.bf16.mxu0 %v3701_v56  ;;  %3413 = vmatprep.subr.bf16.mxu1 %v3702_v57  ;;  %v1045_v56 = vrot.slane %v876_v39, 7  ;;  %v1125_v20 = vrot.slane %v1123_v14, 7  ;;  %v851_v39 = vld [vmem:[#allocation2 + $0xa0] sm:$0x1]  ;;  %v966_v43 = vsel %vm948_vm6, %v964_v33, %v965_v34  ;;  %v887_v14 = vshll.u32 %v4289_v51, 16 }
  0xa9   : > { %v1053_v0 = vshrl.u32 %v878_v54, 16  ;;  %v1056_v1 = vshll.u32 %v878_v54, 16  ;;  %v1129_v31 = vrot.slane %v1127_v21, 7  ;;  %v968_v45 = vrot.slane %v851_v39, 1  ;;  %v826_v21 = vld [vmem:[#allocation2 + $0x60] sm:$0x80] }
  0xaa   : > { %v1156_v54 = vrot.slane %v1154_v44, 7  ;;  %v1104_v33 = vshrl.u32 %v826_v21, 16  ;;  %v3726_v39 = vld [vmem:[%s4767_s4 + $0x1d8] sm:$0xff]  }
  0xab   : > { %3174 = vmatpush3.bf16.msra.mxu0 %v3703_v58  ;;  %3414 = vmatpush3.bf16.msra.mxu1 %v3702_v57  ;;  %v4296_v57 = vsel %vm764_vm4, %v1063_v32, %v1070_v47  ;;  %v3712_v58 = vld [vmem:[%s4767_s4 + $0x8] sm:$0xff]   ;;  %v1055_v10 = vrot.slane %v1053_v0, 7  ;;  %v3718_v32 = vld [vmem:[%s4767_s4 + $0x18] sm:$0xff]   ;;  %v1080_v47 = vshrl.u32 %v882_v2, 16  ;;  %v3721_v0 = vld [vmem:[%s4767_s4 + $0x20] sm:$0xff]  }
  0xac   : > { %3175 = vmatprep.subr.bf16.mxu0 %v3704_v59  ;;  %3415 = vmatprep.subr.bf16.mxu1 %v3705_v63  ;;  %v960_v59 = vsel %vm948_vm6, %v958_v48, %v959_v49  ;;  %v1158_v48 = vshrl.u32 %v966_v43, 16  ;;  %v1161_v49 = vshll.u32 %v966_v43, 16  ;;  %v1106_v44 = vrot.slane %v1104_v33, 7 }
  0xad   : > { %v1096_v4 = vshrl.u32 %v960_v59, 16  ;;  %v1099_v6 = vshll.u32 %v960_v59, 16  ;;  %v1058_v16 = vor.u32 %v1056_v1, %v1055_v10  ;;  %v1087_v59 = vshll.u32 %v885_v46, 16 }
  0xae   : > { %v1160_v60 = vrot.slane %v1158_v48, 7  ;;  %v3727_v48 = vld [vmem:[%s4767_s4 + $0x30] sm:$0xff]  }
  0xaf   : > { %3176 = vmatpush3.bf16.msra.mxu0 %v3706_v7  ;;  %3416 = vmatpush3.bf16.msra.mxu1 %v3705_v63  ;;  %v1051_v63 = vrot.slane %v1049_v55, 7  ;;  %v1046_v7 = vor.u32 %v1045_v56, %v873_v36  ;;  %v1098_v11 = vrot.slane %v1096_v4, 7  ;;  %v967_v36 = vrot.slane %v4334_v30, 1 }
  0xb0   : > { %3241 = vmatprep.subr.bf16.mxu1 %v3707_v15  ;;  %3321 = vmatprep.subr.bf16.mxu0 %v3708_v19  ;;  %v3715_v15 = vld [vmem:[%s4767_s4 + $0x10] sm:$0xff]   ;;  %v1082_v56 = vrot.slane %v1080_v47, 7  ;;  %v1163_v4 = vor.u32 %v1161_v49, %v1160_v60 }
  0xb1   : > { %v1101_v17 = vor.u32 %v1099_v6, %v1098_v11  ;;  %v4319_v19 = vsel %vm764_vm4, %v1044_v61, %v1046_v7  ;;  %v4325_v24 = vsel %vm764_vm4, %v1051_v63, %v1058_v16  ;;  %v1185_v63 = vshrl.u32 %v967_v36, 16  ;;  %v3722_v7 = vld [vmem:[%s4767_s4 + $0x190] sm:$0xff]  }
  0xb2   : > { %1559 = vmatmul.mubr.bf16.vlgmr.msra.gmra.mrb[0].mxu0 %v4281_v41  ;;  %3418 = vmatmul.mubr.bf16.vlgmr.msra.gmra.mrb[0].mxu1 %v4296_v57  ;;  %v4366_v11 = vsel %vm764_vm4, %v1156_v54, %v1163_v4 }
  0xb3   : > { %3242 = vmatpush3.bf16.msra.mxu1 %v3709_v38  ;;  %3322 = vmatpush3.bf16.msra.mxu0 %v3710_v3  ;;  %v4328_v25 = vsel %vm764_vm4, %v1094_v5, %v1101_v17  ;;  %v1073_v38 = vshrl.u32 %v824_v35, 16  ;;  %v1076_v3 = vrot.slane %v883_v27, 7  ;;  %v1187_v8 = vrot.slane %v1185_v63, 7  ;;  %v3730_v63 = vld [vmem:[%s4767_s4 + $0x38] sm:$0xff]  }
  0xb4   : > { %3243 = vmatprep.subr.bf16.mxu1 %v3711_v42  ;;  %3323 = vmatprep.subr.bf16.mxu0 %v3714_v62  ;;  %v1132_v42 = vor.u32 %v1130_v22, %v1129_v31  ;;  %v969_v62 = vsel %vm948_vm6, %v967_v36, %v968_v45  ;;  %v890_v17 = vshrl.u32 %v4289_v51, 16  ;;  %v971_v27 = vrot.slane %v853_v18, 1  ;;  %v855_v31 = vld [vmem:[#allocation2 + $0xd0] sm:$0x1] }
  0xb5   : > { %1566 = vmatprep.mubr.bf16.mxu0 %v4325_v24  ;;  %3421 = vmatprep.mubr.bf16.mxu1 %v4328_v25  ;;  %v1075_v55 = vrot.slane %v1073_v38, 7  ;;  %v1077_v61 = vor.u32 %v1076_v3, %v880_v26  ;;  %v1189_v5 = vshrl.u32 %v969_v62, 16  ;;  %v1192_v6 = vshll.u32 %v969_v62, 16 }
  0xb6   : > { %v4352_v52 = vsel %vm764_vm4, %v1125_v20, %v1132_v42  ;;  %v889_v26 = vrot.slane %v887_v14, 1  ;;  %v1107_v34 = vrot.slane %v890_v17, 7  ;;  %v973_v35 = vrot.slane %v4383_v29, 1 }
  0xb7   : > { %3244 = vmatpush3.bf16.msra.mxu1 %v3712_v58  ;;  %3324 = vmatpush3.bf16.msra.mxu0 %v3716_v13  ;;  %v1084_v58 = vshrl.u32 %v885_v46, 16  ;;  %v1191_v12 = vrot.slane %v1189_v5, 7  ;;  %v3724_v13 = vld [vmem:[%s4767_s4 + $0x28] sm:$0xff]   ;;  %v4376_v16 = vsel %vm764_vm4, %v1075_v55, %v1077_v61  ;;  %v974_v54 = vrot.slane %v855_v31, 1 }
  0xb8   : > { %3245 = vmatprep.subr.bf16.mxu1 %v3713_v9  ;;  %3325 = vmatprep.subr.bf16.mxu0 %v3720_v50  ;;  %v3723_v9 = vld [vmem:[%s4767_s4 + $0x68] sm:$0xff]   ;;  %v892_v2 = vor.u32 %v890_v17, %v889_v26  ;;  %v1111_v38 = vshrl.u32 %v889_v26, 16  ;;  %v1108_v50 = vor.u32 %v1107_v34, %v887_v14  ;;  %v1319_v55 = vshrl.u32 %v973_v35, 16 }
  0xb9   : > { %v1086_v1 = vrot.slane %v1084_v58, 7  ;;  %v975_v61 = vsel %vm948_vm6, %v973_v35, %v974_v54 }
  0xba   : > { %1567 = vmatmul.mubr.bf16.gmra.mrb[4].mxu0 %v4319_v19  ;;  %3422 = vmatmul.mubr.bf16.gmra.mrb[4].mxu1 %v4352_v52  ;;  %v1113_v45 = vrot.slane %v1111_v38, 7  ;;  %v1115_v46 = vshrl.u32 %v892_v2, 16  ;;  %v1118_v47 = vshll.u32 %v892_v2, 16  ;;  %v1321_v62 = vrot.slane %v1319_v55, 7 }
  0xbb   : > { %3246 = vmatpush3.bf16.msra.mxu1 %v3715_v15  ;;  %v1089_v10 = vor.u32 %v1087_v59, %v1086_v1  ;;  %3326 = vmatpush3.bf16.msra.mxu0 %v3722_v7  ;;  %v4372_v15 = vld [vmem:[#allocation2 + $0xb0] sm:$0xff]  ;;  %v3729_v59 = vld [vmem:[%s4767_s4 + $0x78] sm:$0xff]   ;;  %v1323_v1 = vshrl.u32 %v975_v61, 16  ;;  %v1326_v4 = vshll.u32 %v975_v61, 16  ;;  %v894_v7 = vshll.u32 %v4332_v28, 16 }
  0xbc   : > { %3247 = vmatprep.subr.bf16.mxu1 %v3717_v23  ;;  %3425 = vmatprep.mubr.bf16.mxu1 %v4366_v11  ;;  %v970_v20 = vrot.slane %v4372_v15, 1  ;;  %v1194_v23 = vor.u32 %v1192_v6, %v1191_v12  ;;  %v1117_v58 = vrot.slane %v1115_v46, 7  ;;  %v4416_v6 = vsel %vm764_vm4, %v1106_v44, %v1108_v50  ;;  %v3731_v12 = vld [vmem:[%s4767_s4 + $0x1e0] sm:$0xff]   ;;  %v3734_v50 = vld [vmem:[%s4767_s4 + $0x1a8] sm:$0xff]  }
  0xbd   : > { %v4381_v22 = vsel %vm764_vm4, %v1082_v56, %v1089_v10  ;;  %3327 = vmatprep.subr.bf16.mxu0 %v3726_v39  ;;  %v3728_v56 = vld [vmem:[%s4767_s4 + $0x198] sm:$0xff]   ;;  %v1325_v14 = vrot.slane %v1323_v1, 7  ;;  %v896_v21 = vrot.slane %v894_v7, 1  ;;  %v911_v61 = vshrl.u32 %v4372_v15, 16 }
  0xbe   : > { %1574 = vmatprep.mubr.bf16.mxu0 %v4381_v22  ;;  %v1216_v51 = vshrl.u32 %v970_v20, 16  ;;  %v4392_v36 = vsel %vm764_vm4, %v1187_v8, %v1194_v23  ;;  %v972_v3 = vsel %vm948_vm6, %v970_v20, %v971_v27  ;;  %v897_v8 = vshrl.u32 %v4332_v28, 16  ;;  %v828_v10 = vld [vmem:[#allocation2 + $0x78] sm:$0x80]  ;;  %v818_v20 = vld [vmem:[#allocation2] sm:$0x80] }
  0xbf   : > { %3248 = vmatpush3.bf16.msra.mxu1 %v3718_v32  ;;  %v3725_v32 = vld [vmem:[%s4767_s4 + $0x70] sm:$0xff]   ;;  %v1220_v42 = vshrl.u32 %v972_v3, 16  ;;  %v1223_v43 = vshll.u32 %v972_v3, 16  ;;  %3328 = vmatpush3.bf16.msra.mxu0 %v3728_v56  ;;  %v3732_v28 = vld [vmem:[%s4767_s4 + $0x1a0] sm:$0xff]   ;;  %v1135_v23 = vshrl.u32 %v828_v10, 16  ;;  %v980_v26 = vshrl.u32 %v818_v20, 16 }
  0xc0   : > { %3249 = vmatprep.subr.bf16.mxu1 %v3719_v40  ;;  %v1218_v40 = vrot.slane %v1216_v51, 7  ;;  %3329 = vmatprep.subr.bf16.mxu0 %v3731_v12  ;;  %v1328_v27 = vor.u32 %v1326_v4, %v1325_v14  ;;  %v899_v51 = vor.u32 %v897_v8, %v896_v21  ;;  %v1142_v33 = vshrl.u32 %v896_v21, 16  ;;  %v3736_v4 = vld [vmem:[%s4767_s4 + $0x1f0] sm:$0xff]  }
  0xc1   : > { %v1222_v49 = vrot.slane %v1220_v42, 7  ;;  %v1137_v34 = vrot.slane %v1135_v23, 7  ;;  %v982_v39 = vrot.slane %v980_v26, 7  ;;  %v901_v56 = vshll.u32 %v4334_v30, 16  ;;  %v3737_v12 = vld [vmem:[%s4767_s4 + $0x1b0] sm:$0xff]  }
  0xc2   : > { %1575 = vmatmul.mubr.bf16.gmra.mrb[8].mxu0 %v4376_v16  ;;  %3426 = vmatmul.mubr.bf16.gmra.mrb[8].mxu1 %v4392_v36  ;;  %v4437_v2 = vsel %vm764_vm4, %v1321_v62, %v1328_v27  ;;  %v1144_v42 = vrot.slane %v1142_v33, 7  ;;  %v1149_v44 = vshll.u32 %v899_v51, 16  ;;  %v3735_v62 = vld [vmem:[%s4767_s4 + $0x80] sm:$0xff]   ;;  %v832_v26 = vld [vmem:[#allocation2 + $0xa8] sm:$0x80]  ;;  %v3739_v33 = vld [vmem:[%s4767_s4 + $0x1f8] sm:$0xff]  }
  0xc3   : > { %3250 = vmatpush3.bf16.msra.mxu1 %v3721_v0  ;;  %v1225_v60 = vor.u32 %v1223_v43, %v1222_v49  ;;  %v1120_v0 = vor.u32 %v1118_v47, %v1117_v58  ;;  %3330 = vmatpush3.bf16.msra.mxu0 %v3732_v28  ;;  %v1146_v43 = vshrl.u32 %v899_v51, 16  ;;  %v904_v58 = vshrl.u32 %v4334_v30, 16  ;;  %v3738_v27 = vld [vmem:[%s4767_s4 + $0x88] sm:$0xff]  }
  0xc4   : > { %3251 = vmatprep.subr.bf16.mxu1 %v3723_v9  ;;  %v4420_v9 = vld [vmem:[#allocation2 + $0x8] sm:$0xff] }
  0xc5   : > { %v4413_v5 = vsel %vm764_vm4, %v1218_v40, %v1225_v60  ;;  %v859_v17 = vshll.u32 %v4420_v9, 16  ;;  %v862_v18 = vshrl.u32 %v4420_v9, 16  ;;  %v830_v40 = vld [vmem:[#allocation2 + $0x90] sm:$0x80]  ;;  %v1148_v54 = vrot.slane %v1146_v43, 7 }
  0xc6   : > { %3429 = vmatprep.mubr.bf16.mxu1 %v4413_v5  ;;  %v908_v60 = vshll.u32 %v4372_v15, 16  ;;  %v1166_v1 = vshrl.u32 %v830_v40, 16  ;;  %v915_v43 = vshll.u32 %v4383_v29, 16 }
  0xc7   : > { %3252 = vmatpush3.bf16.msra.mxu1 %v3724_v13  ;;  %v4426_v13 = vsel %vm764_vm4, %v1113_v45, %v1120_v0  ;;  %v861_v31 = vrot.slane %v859_v17, 1  ;;  %v983_v35 = vrot.slane %v862_v18, 7  ;;  %v3733_v45 = vld [vmem:[%s4767_s4 + $0x1e8] sm:$0xff]   ;;  %v903_v0 = vrot.slane %v901_v56, 1 }
  0xc8   : > { %3253 = vmatprep.subr.bf16.mxu1 %v3725_v32  ;;  %1582 = vmatprep.mubr.bf16.mxu0 %v4426_v13  ;;  %v1138_v32 = vrot.slane %v897_v8, 7  ;;  %v1169_v8 = vrot.slane %v904_v58, 7  ;;  %v910_v10 = vrot.slane %v908_v60, 1  ;;  %v1168_v51 = vrot.slane %v1166_v1, 7 }
  0xc9   : > { %v864_v38 = vor.u32 %v862_v18, %v861_v31  ;;  %v987_v3 = vshrl.u32 %v861_v31, 16  ;;  %v984_v55 = vor.u32 %v983_v35, %v859_v17  ;;  %3331 = vmatprep.subr.bf16.mxu0 %v3733_v45  ;;  %v906_v18 = vor.u32 %v904_v58, %v903_v0 }
  0xca   : > { %1583 = vmatmul.mubr.bf16.gmra.mrb[12].mxu0 %v4416_v6  ;;  %3430 = vmatmul.mubr.bf16.gmra.mrb[12].mxu1 %v4437_v2  ;;  %v1139_v49 = vor.u32 %v1138_v32, %v894_v7  ;;  %v1173_v20 = vshrl.u32 %v903_v0, 16  ;;  %v913_v21 = vor.u32 %v911_v61, %v910_v10  ;;  %v1204_v23 = vshrl.u32 %v910_v10, 16  ;;  %v3745_v10 = vld [vmem:[%s4767_s4 + $0xa0] sm:$0xff]  }
  0xcb   : > { %3254 = vmatpush3.bf16.msra.mxu1 %v3727_v48  ;;  %v989_v46 = vrot.slane %v987_v3, 7  ;;  %v991_v47 = vshrl.u32 %v864_v38, 16  ;;  %v994_v48 = vshll.u32 %v864_v38, 16  ;;  %3332 = vmatpush3.bf16.msra.mxu0 %v3734_v50  ;;  %v985_v17 = vsel %vm764_vm4, %v982_v39, %v984_v55  ;;  %v3740_v39 = vld [vmem:[%s4767_s4 + $0x1b8] sm:$0xff]  }
  0xcc   : > { %3255 = vmatprep.subr.bf16.mxu1 %v3729_v59  ;;  %v4457_v30 = vsel %vm764_vm4, %v1137_v34, %v1139_v49  ;;  %3333 = vmatprep.subr.bf16.mxu0 %v3736_v4  ;;  %v1177_v31 = vshrl.u32 %v906_v18, 16  ;;  %v1180_v32 = vshll.u32 %v906_v18, 16  ;;  %v1175_v34 = vrot.slane %v1173_v20, 7  ;;  %v834_v4 = vld [vmem:[#allocation2 + $0xc0] sm:$0x80] }
  0xcd   : > { %v993_v59 = vrot.slane %v991_v47, 7  ;;  %v1170_v35 = vor.u32 %v1169_v8, %v901_v56  ;;  %v1208_v38 = vshrl.u32 %v913_v21, 16  ;;  %v1211_v3 = vshll.u32 %v913_v21, 16  ;;  %v3748_v21 = vld [vmem:[%s4767_s4 + $0xb0] sm:$0xff]  }
  0xce   : > { %v1179_v40 = vrot.slane %v1177_v31, 7  ;;  %v1200_v49 = vrot.slane %v911_v61, 7  ;;  %v917_v50 = vrot.slane %v915_v43, 1  ;;  %v839_v31 = vld [vmem:[#allocation2 + $0x10] sm:$0x1] }
  0xcf   : > { %3256 = vmatpush3.bf16.msra.mxu1 %v3730_v63  ;;  %v1151_v63 = vor.u32 %v1149_v44, %v1148_v54  ;;  %v996_v7 = vor.u32 %v994_v48, %v993_v59  ;;  %3334 = vmatpush3.bf16.msra.mxu0 %v3737_v12  ;;  %v918_v44 = vshrl.u32 %v4383_v29, 16  ;;  %v1210_v45 = vrot.slane %v1208_v38, 7  ;;  %v3743_v59 = vld [vmem:[%s4767_s4 + $0x98] sm:$0xff]  }
  0xd0   : > { %3433 = vmatprep.subr.bf16.mxu1 %v3735_v62  ;;  %3335 = vmatprep.subr.bf16.mxu0 %v3739_v33  ;;  %v1182_v47 = vor.u32 %v1180_v32, %v1179_v40  ;;  %v1197_v48 = vshrl.u32 %v832_v26, 16  ;;  %v4492_v54 = vsel %vm764_vm4, %v1168_v51, %v1170_v35  ;;  %v1307_v58 = vshrl.u32 %v917_v50, 16  ;;  %v3750_v26 = vld [vmem:[%s4767_s4 + $0xb8] sm:$0xff]   ;;  %v4585_v40 = vld [vmem:[#allocation2 + $0xe0] sm:$0xff] }
  0xd1   : > { %v4465_v14 = vsel %vm764_vm4, %v1144_v42, %v1151_v63  ;;  %v997_v28 = vsel %vm764_vm4, %v989_v46, %v996_v7  ;;  %v1206_v42 = vrot.slane %v1204_v23, 7  ;;  %v3741_v46 = vld [vmem:[%s4767_s4 + $0x90] sm:$0xff]   ;;  %v1213_v29 = vor.u32 %v1211_v3, %v1210_v45 }
  0xd2   : > { %1590 = vmatprep.mubr.bf16.mxu0 %v4465_v14  ;;  %1896 = vmatprep.mubr.bf16.mxu1 %v997_v28  ;;  %v4495_v55 = vsel %vm764_vm4, %v1175_v34, %v1182_v47  ;;  %v920_v56 = vor.u32 %v918_v44, %v917_v50  ;;  %v1201_v1 = vor.u32 %v1200_v49, %v908_v60  ;;  %v1309_v7 = vrot.slane %v1307_v58, 7  ;;  %v3747_v60 = vld [vmem:[%s4767_s4 + $0xa8] sm:$0xff]   ;;  %v836_v50 = vld [vmem:[#allocation2 + $0xd8] sm:$0x80] }
  0xd3   : > { %1591 = vmatmul.mubr.bf16.gmra.mrb[16].mxu0 %v4457_v30  ;;  %1897 = vmatmul.mubr.bf16.vlgmr.msra.gmra.mrb[16].mxu1 %v985_v17  ;;  %v4503_v61 = vsel %vm764_vm4, %v1206_v42, %v1213_v29  ;;  %v1303_v18 = vrot.slane %v918_v44, 7  ;;  %v949_v32 = vrot.slane %v4420_v9, 1  ;;  %v950_v51 = vrot.slane %v839_v31, 1  ;;  %v4567_v9 = vld [vmem:[%s4767_s4 + $0x220] sm:$0xff]   ;;  %v3754_v42 = vld [vmem:[%s4767_s4 + $0x238] sm:$0xff]  }
  0xd4   : > { %1904 = vmatprep.mubr.bf16.mxu1 %v4292_v53  ;;  %3434 = vmatpush3.bf16.msra.mxu1 %v3735_v62  ;;  %v4489_v53 = vld [vmem:[%s4767_s4 + $0x200] sm:$0xff]   ;;  %v1199_v62 = vrot.slane %v1197_v48, 7  ;;  %v1311_v63 = vshrl.u32 %v920_v56, 16  ;;  %v1314_v0 = vshll.u32 %v920_v56, 16  ;;  %v925_v44 = vshrl.u32 %v4585_v40, 16 }
  0xd5   : > { %3435 = vmatprep.subr.bf16.mxu1 %v3738_v27  ;;  %3336 = vmatpush3.bf16.msra.mxu0 %v3740_v39  ;;  %v1304_v28 = vor.u32 %v1303_v18, %v915_v43  ;;  %v951_v33 = vsel %vm948_vm6, %v949_v32, %v950_v51  ;;  %v3753_v39 = vld [vmem:[%s4767_s4 + $0x230] sm:$0xff]  }
  0xd6   : > { %3465 = vmatprep.subr.bf16.mxu0 %v4489_v53  ;;  %1598 = vmatprep.mubr.bf16.mxu0 %v4495_v55  ;;  %v1313_v8 = vrot.slane %v1311_v63, 7  ;;  %v4515_v17 = vsel %vm764_vm4, %v1199_v62, %v1201_v1  ;;  %v1006_v35 = vshll.u32 %v951_v33, 16 }
  0xd8   : > { %3436 = vmatpush3.bf16.msra.mxu1 %v3738_v27  ;;  %v1316_v12 = vor.u32 %v1314_v0, %v1313_v8  ;;  %v3744_v27 = vld [vmem:[%s4767_s4 + $0x208] sm:$0xff]  }
  0xd9   : > { %3437 = vmatprep.subr.bf16.mxu1 %v3741_v46 }
  0xda   : > { %v4518_v15 = vsel %vm764_vm4, %v1309_v7, %v1316_v12 }
  0xdb   : > { %1599 = vmatmul.mubr.bf16.gmra.mrb[20].mxu0 %v4492_v54  ;;  %1905 = vmatmul.mubr.bf16.gmra.mrb[20].mxu1 %v4281_v41  ;;  %v1300_v41 = vshrl.u32 %v834_v4, 16 }
  0xdc   : > { %1606 = vmatprep.mubr.bf16.mxu0 %v4503_v61  ;;  %1912 = vmatprep.mubr.bf16.mxu1 %v4325_v24 }
  0xdd   : > { %3438 = vmatpush3.bf16.msra.mxu1 %v3741_v46  ;;  %v1302_v20 = vrot.slane %v1300_v41, 7 }
  0xde   : > { %3439 = vmatprep.subr.bf16.mxu1 %v3743_v59 }
  0xdf   : > { %v4531_v23 = vsel %vm764_vm4, %v1302_v20, %v1304_v28 }
  0xe1   : > { %3440 = vmatpush3.bf16.msra.mxu1 %v3743_v59  ;;  %v976_v59 = vrot.slane %v4585_v40, 1 }
  0xe2   : > { %3441 = vmatprep.subr.bf16.mxu1 %v3745_v10 }
  0xe3   : > { %1607 = vmatmul.mubr.bf16.gmra.mrb[24].mxu0 %v4515_v17  ;;  %1913 = vmatmul.mubr.bf16.gmra.mrb[24].mxu1 %v4319_v19  ;;  %v2078_v1 = vshrl.u32 %v976_v59, 16 }
  0xe4   : > { %1614 = vmatprep.mubr.bf16.mxu0 %v4518_v15  ;;  %1920 = vmatprep.mubr.bf16.mxu1 %v4381_v22 }
  0xe5   : > { %3442 = vmatpush3.bf16.msra.mxu1 %v3745_v10  ;;  %v2080_v8 = vrot.slane %v2078_v1, 7 }
  0xe6   : > { %3443 = vmatprep.subr.bf16.mxu1 %v3747_v60 }
  0xe9   : > { %3444 = vmatpush3.bf16.msra.mxu1 %v3747_v60 }
  0xea   : > { %3445 = vmatprep.subr.bf16.mxu1 %v3748_v21 }
  0xeb   : > { %1615 = vmatmul.mubr.bf16.gmra.mrb[28].mxu0 %v4531_v23  ;;  %1921 = vmatmul.mubr.bf16.gmra.mrb[28].mxu1 %v4376_v16 }
  0xec   : > { %2317 = vmatprep.mubr.bf16.mxu0 %v4325_v24  ;;  %1928 = vmatprep.mubr.bf16.mxu1 %v4426_v13  ;;  %v3746_v24 = vld [vmem:[%s4767_s4 + $0x210] sm:$0xff]  }
  0xed   : > { %3446 = vmatpush3.bf16.msra.mxu1 %v3748_v21 }
  0xee   : > { %3447 = vmatprep.subr.bf16.mxu1 %v3750_v26 }
  0xf1   : > { %3448 = vmatpush3.bf16.msra.mxu1 %v3750_v26 }
  0xf2   : > { %3497 = vmatprep.subr.bf16.mxu1 %v4489_v53 }
  0xf3   : > { %2318 = vmatmul.mubr.bf16.vlgmr.msra.gmra.mrb[32].mxu0 %v4319_v19  ;;  %1929 = vmatmul.mubr.bf16.gmra.mrb[32].mxu1 %v4416_v6  ;;  %v4556_v19 = vld [vmem:[%s4767_s4 + $0x218] sm:$0xff]  }
  0xf4   : > { %3466 = vmatpush3.bf16.msra.mxu0 %v4489_v53  ;;  %1936 = vmatprep.mubr.bf16.mxu1 %v4465_v14 }
  0xf5   : > { %2325 = vmatprep.mubr.bf16.mxu0 %v4381_v22  ;;  %3467 = vmatprep.subr.bf16.mxu0 %v3744_v27  ;;  %v1003_v22 = vshrl.u32 %v951_v33, 16 }
  0xf7   : > { %v1005_v34 = vrot.slane %v1003_v22, 7 }
  0xf8   : > { %3468 = vmatpush3.bf16.msra.mxu0 %v3744_v27 }
  0xf9   : > { %3469 = vmatprep.subr.bf16.mxu0 %v3746_v24  ;;  %v1008_v3 = vor.u32 %v1006_v35, %v1005_v34 }
  0xfb   : > { %2326 = vmatmul.mubr.bf16.gmra.mrb[36].mxu0 %v4376_v16  ;;  %1937 = vmatmul.mubr.bf16.gmra.mrb[36].mxu1 %v4457_v30  ;;  %v999_v16 = vshrl.u32 %v949_v32, 16 }
  0xfc   : > { %2333 = vmatprep.mubr.bf16.mxu0 %v4426_v13  ;;  %1944 = vmatprep.mubr.bf16.mxu1 %v4495_v55  ;;  %v4574_v13 = vld [vmem:[%s4767_s4 + $0x228] sm:$0xff]  }
  0xfd   : > { %3470 = vmatpush3.bf16.msra.mxu0 %v3746_v24  ;;  %v1001_v38 = vrot.slane %v999_v16, 7 }
  0xfe   : > { %3471 = vmatprep.subr.bf16.mxu0 %v4556_v19 }
 0x101   : > { %3472 = vmatpush3.bf16.msra.mxu0 %v4556_v19 }
 0x102   : > { %3473 = vmatprep.subr.bf16.mxu0 %v4567_v9 }
 0x103   : > { %2334 = vmatmul.mubr.bf16.gmra.mrb[40].mxu0 %v4416_v6  ;;  %1945 = vmatmul.mubr.bf16.gmra.mrb[40].mxu1 %v4492_v54  ;;  %v922_v6 = vshll.u32 %v4585_v40, 16 }
 0x104   : > { %2341 = vmatprep.mubr.bf16.mxu0 %v4465_v14  ;;  %1952 = vmatprep.mubr.bf16.mxu1 %v4503_v61  ;;  %v1009_v14 = vsel %vm764_vm4, %v1001_v38, %v1008_v3 }
 0x105   : > { %3474 = vmatpush3.bf16.msra.mxu0 %v4567_v9  ;;  %v924_v43 = vrot.slane %v922_v6, 1 }
 0x106   : > { %3475 = vmatprep.subr.bf16.mxu0 %v4574_v13 }
 0x107   : > { %v927_v45 = vor.u32 %v925_v44, %v924_v43  ;;  %v2066_v46 = vshrl.u32 %v924_v43, 16 }
 0x109   : > { %3476 = vmatpush3.bf16.msra.mxu0 %v4574_v13  ;;  %v2073_v48 = vshll.u32 %v927_v45, 16 }
 0x10a   : > { %3477 = vmatprep.subr.bf16.mxu0 %v3753_v39 }
 0x10b   : > { %2342 = vmatmul.mubr.bf16.gmra.mrb[44].mxu0 %v4457_v30  ;;  %1953 = vmatmul.mubr.bf16.gmra.mrb[44].mxu1 %v4515_v17  ;;  %v2070_v30 = vshrl.u32 %v927_v45, 16 }
 0x10c   : > { %2349 = vmatprep.mubr.bf16.mxu0 %v4495_v55  ;;  %3449 = vmatprep.mubr.bf16.mxu1 %v1009_v14  ;;  %v857_v55 = vld [vmem:[#allocation2 + $0xe8] sm:$0x1] }
 0x10d   : > { %3478 = vmatpush3.bf16.msra.mxu0 %v3753_v39  ;;  %v2072_v47 = vrot.slane %v2070_v30, 7 }
 0x10e   : > { %3479 = vmatprep.subr.bf16.mxu0 %v3754_v42 }
 0x10f   : > { %v2075_v49 = vor.u32 %v2073_v48, %v2072_v47 }
 0x111   : > { %3480 = vmatpush3.bf16.msra.mxu0 %v3754_v42 }
 0x113   : > { %2350 = vmatmul.mubr.bf16.gmra.mrb[48].mxu0 %v4492_v54  ;;  %3450 = vmatmul.mubr.bf16.vlgmr.msra.gmra.mrb[0].mxu1 %v4270_v37  ;;  %v2068_v37 = vrot.slane %v2066_v46, 7  ;;  %v2062_v54 = vrot.slane %v925_v44, 7 }
 0x114   : > { %2357 = vmatprep.mubr.bf16.mxu0 %v4503_v61  ;;  %3505 = vmatpush3.bf16.msra.mxu1 %v4489_v53  ;;  %v2059_v53 = vshrl.u32 %v836_v50, 16  ;;  %v977_v61 = vrot.slane %v857_v55, 1 }
 0x115   : > { %3453 = vmatprep.mubr.bf16.mxu1 %v4296_v57  ;;  %3498 = vmatprep.subr.bf16.mxu1 %v3744_v27  ;;  %v2076_v29 = vsel %vm764_vm4, %v2068_v37, %v2075_v49  ;;  %v2063_v58 = vor.u32 %v2062_v54, %v922_v6 }
 0x116   : > { %v2061_v56 = vrot.slane %v2059_v53, 7  ;;  %v978_v63 = vsel %vm948_vm6, %v976_v59, %v977_v61 }
 0x117   : > { %v2082_v0 = vshrl.u32 %v978_v63, 16  ;;  %v2085_v7 = vshll.u32 %v978_v63, 16 }
 0x118   : > { %3506 = vmatpush3.bf16.msra.mxu1 %v3744_v27  ;;  %v2064_v62 = vsel %vm764_vm4, %v2061_v56, %v2063_v58 }
 0x119   : > { %3499 = vmatprep.subr.bf16.mxu1 %v3746_v24  ;;  %v2084_v4 = vrot.slane %v2082_v0, 7 }
 0x11b   : > { %2358 = vmatmul.mubr.bf16.gmra.mrb[52].mxu0 %v4515_v17  ;;  %3454 = vmatmul.mubr.bf16.gmra.mrb[4].mxu1 %v4328_v25  ;;  %v2087_v10 = vor.u32 %v2085_v7, %v2084_v4 }
 0x11c   : > { %2365 = vmatprep.mubr.bf16.mxu0 %v4518_v15  ;;  %3507 = vmatpush3.bf16.msra.mxu1 %v3746_v24 }
 0x11d   : > { %3457 = vmatprep.mubr.bf16.mxu1 %v4352_v52  ;;  %3500 = vmatprep.subr.bf16.mxu1 %v4556_v19 }
 0x120   : > { %3508 = vmatpush3.bf16.msra.mxu1 %v4556_v19 }
 0x121   : > { %3501 = vmatprep.subr.bf16.mxu1 %v4567_v9 }
 0x123   : > { %2366 = vmatmul.mubr.bf16.gmra.mrb[56].mxu0 %v4531_v23  ;;  %3458 = vmatmul.mubr.bf16.gmra.mrb[8].mxu1 %v4366_v11 }
 0x124   : > { %2373 = vmatprep.mubr.bf16.mxu0 %v2076_v29  ;;  %3509 = vmatpush3.bf16.msra.mxu1 %v4567_v9 }
 0x125   : > { %3461 = vmatprep.mubr.bf16.mxu1 %v4392_v36  ;;  %3502 = vmatprep.subr.bf16.mxu1 %v4574_v13 }
 0x128   : > { %3510 = vmatpush3.bf16.msra.mxu1 %v4574_v13 }
 0x129   : > { %3503 = vmatprep.subr.bf16.mxu1 %v3753_v39 }
 0x12b   : > { %2374 = vmatmul.mubr.bf16.gmra.mrb[60].mxu0 %v2064_v62  ;;  %3462 = vmatmul.mubr.bf16.gmra.mrb[12].mxu1 %v4413_v5 }
 0x12c   : > { %3481 = vmatprep.mubr.bf16.mxu0 %v4296_v57  ;;  %3511 = vmatpush3.bf16.msra.mxu1 %v3753_v39  ;;  %v2088_v57 = vsel %vm764_vm4, %v2080_v8, %v2087_v10 }
 0x12d   : > { %3489 = vmatprep.mubr.bf16.mxu1 %v4392_v36  ;;  %3504 = vmatprep.subr.bf16.mxu1 %v3754_v42 }
 0x130   : > { %3512 = vmatpush3.bf16.msra.mxu1 %v3754_v42 }
 0x133   : > { %3482 = vmatmul.mubr.bf16.vlgmr.msra.gmra.mrb[64].mxu0 %v4328_v25  ;;  %3490 = vmatmul.mubr.bf16.vlgmr.msra.gmra.mrb[8].mxu1 %v4413_v5 }
 0x134   : > { %3485 = vmatprep.mubr.bf16.mxu0 %v4352_v52  ;;  %3493 = vmatprep.mubr.bf16.mxu1 %v4437_v2 }
 0x13b   : > { %3486 = vmatmul.mubr.bf16.gmra.mrb[68].mxu0 %v4366_v11  ;;  %3494 = vmatmul.mubr.bf16.gmra.mrb[12].mxu1 %v2088_v57 }
 0x185   : > { %v3177_v36 = vpop.f32.mrb[0].mxu0 }
 0x186   : > { %v3178_v12 = vpop.f32.mrb[1].mxu0 }
 0x187   : > { %v3179_v17 = vadd.f32 %v3178_v12, %v3177_v36  ;;  %v3180_v41 = vpop.f32.mrb[2].mxu0 }
 0x188   : > { %v3181_v18 = vpop.f32.mrb[3].mxu0 }
 0x189   : > { %v3182_v15 = vadd.f32 %v3181_v18, %v3180_v41 }
 0x18d   : > { %v3183_v25 = vpop.f32.mrb[4].mxu0 }
 0x18e   : > { %v3184_v60 = vpop.f32.mrb[5].mxu0 }
 0x18f   : > { %v3185_v5 = vadd.f32 %v3184_v60, %v3183_v25  ;;  %v3186_v20 = vpop.f32.mrb[6].mxu0 }
 0x190   : > { %v3187_v52 = vpop.f32.mrb[7].mxu0 }
 0x191   : > { %v3188_v28 = vadd.f32 %v3187_v52, %v3186_v20 }
 0x195   : > { %v3189_v2 = vpop.f32.mrb[8].mxu0 }
 0x196   : > { %v3190_v21 = vpop.f32.mrb[9].mxu0 }
 0x197   : > { %v3191_v23 = vadd.f32 %v3190_v21, %v3189_v2  ;;  %v3192_v26 = vpop.f32.mrb[10].mxu0 }
 0x198   : > { %v3193_v27 = vpop.f32.mrb[11].mxu0 }
 0x199   : > { %v3194_v31 = vadd.f32 %v3193_v27, %v3192_v26 }
 0x19d   : > { %v3195_v11 = vpop.f32.mrb[12].mxu0 }
 0x19e   : > { %v3196_v24 = vpop.f32.mrb[13].mxu0 }
 0x19f   : > { %v3197_v32 = vadd.f32 %v3196_v24, %v3195_v11  ;;  %v3198_v51 = vpop.f32.mrb[14].mxu0 }
 0x1a0   : > { %v3199_v19 = vpop.f32.mrb[15].mxu0 }
 0x1a1   : > { %v3200_v33 = vadd.f32 %v3199_v19, %v3198_v51 }
 0x1a6   : > { %v3201_v22 = vpop.f32.mrb[16].mxu0  ;;  %v3257_v9 = vpop.f32.mrb[16].mxu1 }
 0x1a7   : > { %v3202_v16 = vpop.f32.mrb[17].mxu0  ;;  %v3258_v35 = vpop.f32.mrb[17].mxu1 }
 0x1a8   : > { %v4628_v34 = vadd.f32 %v3202_v16, %v3201_v22  ;;  %v3204_v13 = vpop.f32.mrb[18].mxu0  ;;  %v3259_v38 = vadd.f32 %v3258_v35, %v3257_v9  ;;  %v3260_v3 = vpop.f32.mrb[18].mxu1 }
 0x1a9   : > { %v3205_v39 = vpop.f32.mrb[19].mxu0  ;;  %v3261_v6 = vpop.f32.mrb[19].mxu1 }
 0x1aa   : > { %v3206_v40 = vadd.f32 %v3205_v39, %v3204_v13  ;;  %v3262_v14 = vadd.f32 %v3261_v6, %v3260_v3  ;;  %v4630_v42 = vadd.f32 %v3259_v38, %v3179_v17 }
 0x1ac   : > { %v4632_v43 = vadd.f32 %v3262_v14, %v3182_v15 }
 0x1ae   : > { %v3207_v44 = vpop.f32.mrb[20].mxu0  ;;  %v3263_v45 = vpop.f32.mrb[20].mxu1 }
 0x1af   : > { %v3208_v30 = vpop.f32.mrb[21].mxu0  ;;  %v3264_v47 = vpop.f32.mrb[21].mxu1 }
 0x1b0   : > { %v4634_v46 = vadd.f32 %v3208_v30, %v3207_v44  ;;  %v3210_v48 = vpop.f32.mrb[22].mxu0  ;;  %v3265_v37 = vadd.f32 %v3264_v47, %v3263_v45  ;;  %v3266_v49 = vpop.f32.mrb[22].mxu1 }
 0x1b1   : > { %v3211_v50 = vpop.f32.mrb[23].mxu0  ;;  %v3267_v54 = vpop.f32.mrb[23].mxu1 }
 0x1b2   : > { %v3212_v53 = vadd.f32 %v3211_v50, %v3210_v48  ;;  %v3268_v29 = vadd.f32 %v3267_v54, %v3266_v49  ;;  %v4636_v55 = vadd.f32 %v3265_v37, %v3185_v5 }
 0x1b4   : > { %v4638_v56 = vadd.f32 %v3268_v29, %v3188_v28 }
 0x1b6   : > { %v3213_v58 = vpop.f32.mrb[24].mxu0  ;;  %v3269_v59 = vpop.f32.mrb[24].mxu1 }
 0x1b7   : > { %v3214_v61 = vpop.f32.mrb[25].mxu0  ;;  %v3270_v63 = vpop.f32.mrb[25].mxu1 }
 0x1b8   : > { %v4640_v62 = vadd.f32 %v3214_v61, %v3213_v58  ;;  %v3216_v0 = vpop.f32.mrb[26].mxu0  ;;  %v3271_v1 = vadd.f32 %v3270_v63, %v3269_v59  ;;  %v3272_v4 = vpop.f32.mrb[26].mxu1 }
 0x1b9   : > { %v3217_v7 = vpop.f32.mrb[27].mxu0  ;;  %v3273_v10 = vpop.f32.mrb[27].mxu1 }
 0x1ba   : > { %v3218_v8 = vadd.f32 %v3217_v7, %v3216_v0  ;;  %v3274_v57 = vadd.f32 %v3273_v10, %v3272_v4  ;;  %v4642_v36 = vadd.f32 %v3271_v1, %v3191_v23 }
 0x1bc   : > { %v4644_v12 = vadd.f32 %v3274_v57, %v3194_v31 }
 0x1be   : > { %v3219_v17 = vpop.f32.mrb[28].mxu0  ;;  %v3275_v41 = vpop.f32.mrb[28].mxu1 }
 0x1bf   : > { %v3220_v18 = vpop.f32.mrb[29].mxu0  ;;  %v3276_v25 = vpop.f32.mrb[29].mxu1 }
 0x1c0   : > { %v4646_v15 = vadd.f32 %v3220_v18, %v3219_v17  ;;  %v3222_v60 = vpop.f32.mrb[30].mxu0  ;;  %v3277_v5 = vadd.f32 %v3276_v25, %v3275_v41  ;;  %v3278_v20 = vpop.f32.mrb[30].mxu1 }
 0x1c1   : > { %v3223_v52 = vpop.f32.mrb[31].mxu0  ;;  %v3279_v2 = vpop.f32.mrb[31].mxu1 }
 0x1c2   : > { %v3224_v28 = vadd.f32 %v3223_v52, %v3222_v60  ;;  %v3280_v21 = vadd.f32 %v3279_v2, %v3278_v20  ;;  %v4648_v26 = vadd.f32 %v3277_v5, %v3197_v32 }
 0x1c4   : > { %v4650_v27 = vadd.f32 %v3280_v21, %v3200_v33 }
 0x1c6   : > { %v3337_v23 = vpop.f32.mrb[32].mxu0  ;;  %v3281_v31 = vpop.f32.mrb[32].mxu1 }
 0x1c7   : > { %v3338_v11 = vpop.f32.mrb[33].mxu0  ;;  %v3282_v24 = vpop.f32.mrb[33].mxu1 }
 0x1c8   : > { %v4652_v51 = vadd.f32 %v3338_v11, %v3337_v23  ;;  %v3340_v19 = vpop.f32.mrb[34].mxu0  ;;  %v3283_v22 = vadd.f32 %v3282_v24, %v3281_v31  ;;  %v3284_v9 = vpop.f32.mrb[34].mxu1 }
 0x1c9   : > { %v3341_v16 = vpop.f32.mrb[35].mxu0  ;;  %v3285_v35 = vpop.f32.mrb[35].mxu1 }
 0x1ca   : > { %v4654_v13 = vadd.f32 %v3341_v16, %v3340_v19  ;;  %v3548_v38 = vadd.f32 %v3283_v22, %v4628_v34  ;;  %v3286_v3 = vadd.f32 %v3285_v35, %v3284_v9 }
 0x1cc   : > { %v3554_v32 = vadd.f32 %v3286_v3, %v3206_v40 }
 0x1ce   : > { %v3343_v39 = vpop.f32.mrb[36].mxu0  ;;  %v3287_v33 = vpop.f32.mrb[36].mxu1 }
 0x1cf   : > { %v3344_v6 = vpop.f32.mrb[37].mxu0  ;;  %v3288_v14 = vpop.f32.mrb[37].mxu1 }
 0x1d0   : > { %v3345_v44 = vadd.f32 %v3344_v6, %v3343_v39  ;;  %v3346_v45 = vpop.f32.mrb[38].mxu0  ;;  %v3289_v30 = vadd.f32 %v3288_v14, %v3287_v33  ;;  %v3290_v47 = vpop.f32.mrb[38].mxu1 }
 0x1d1   : > { %v3347_v48 = vpop.f32.mrb[39].mxu0  ;;  %v3291_v37 = vpop.f32.mrb[39].mxu1 }
 0x1d2   : > { %v3348_v49 = vadd.f32 %v3347_v48, %v3346_v45  ;;  %v4658_v50 = vadd.f32 %v3289_v30, %v4634_v46  ;;  %v3292_v54 = vadd.f32 %v3291_v37, %v3290_v47 }
 0x1d4   : > { %v4660_v29 = vadd.f32 %v3292_v54, %v3212_v53 }
 0x1d6   : > { %v3349_v34 = vpop.f32.mrb[40].mxu0  ;;  %v3293_v58 = vpop.f32.mrb[40].mxu1 }
 0x1d7   : > { %v3350_v40 = vpop.f32.mrb[41].mxu0  ;;  %v3294_v59 = vpop.f32.mrb[41].mxu1 }
 0x1d8   : > { %v3351_v61 = vadd.f32 %v3350_v40, %v3349_v34  ;;  %v3352_v63 = vpop.f32.mrb[42].mxu0  ;;  %v3295_v0 = vadd.f32 %v3294_v59, %v3293_v58  ;;  %v3296_v1 = vpop.f32.mrb[42].mxu1 }
 0x1d9   : > { %v3353_v4 = vpop.f32.mrb[43].mxu0  ;;  %v3297_v7 = vpop.f32.mrb[43].mxu1 }
 0x1da   : > { %v3354_v10 = vadd.f32 %v3353_v4, %v3352_v63  ;;  %v4663_v57 = vadd.f32 %v3295_v0, %v4640_v62  ;;  %v3298_v17 = vadd.f32 %v3297_v7, %v3296_v1 }
 0x1dc   : > { %v3566_v46 = vadd.f32 %v3298_v17, %v3218_v8 }
 0x1de   : > { %v3355_v41 = vpop.f32.mrb[44].mxu0  ;;  %v3299_v18 = vpop.f32.mrb[44].mxu1 }
 0x1df   : > { %v3356_v53 = vpop.f32.mrb[45].mxu0  ;;  %v3300_v25 = vpop.f32.mrb[45].mxu1 }
 0x1e0   : > { %v3357_v60 = vadd.f32 %v3356_v53, %v3355_v41  ;;  %v3358_v5 = vpop.f32.mrb[46].mxu0  ;;  %v3301_v20 = vadd.f32 %v3300_v25, %v3299_v18  ;;  %v3302_v52 = vpop.f32.mrb[46].mxu1 }
 0x1e1   : > { %v3359_v2 = vpop.f32.mrb[47].mxu0  ;;  %v3303_v21 = vpop.f32.mrb[47].mxu1 }
 0x1e2   : > { %v3360_v23 = vadd.f32 %v3359_v2, %v3358_v5  ;;  %v3557_v31 = vadd.f32 %v3301_v20, %v4646_v15  ;;  %v3304_v11 = vadd.f32 %v3303_v21, %v3302_v52 }
 0x1e4   : > { %v3563_v24 = vadd.f32 %v3304_v11, %v3224_v28 }
 0x1e6   : > { %v3361_v19 = vpop.f32.mrb[48].mxu0  ;;  %v3451_v62 = vpop.f32.mrb[0].mxu1 }
 0x1e7   : > { %v3362_v22 = vpop.f32.mrb[49].mxu0  ;;  %v3514_v8 = vadd.f32 %v4636_v55, %v3451_v62  ;;  %v1995_v9 = vpop.f32.mrb[1].mxu1 }
 0x1e8   : > { %v3363_v16 = vadd.f32 %v3362_v22, %v3361_v19  ;;  %v3364_v35 = vpop.f32.mrb[50].mxu0  ;;  %v3518_v3 = vadd.f32 %v4630_v42, %v1995_v9  ;;  %v3452_v39 = vpop.f32.mrb[2].mxu1 }
 0x1e9   : > { %v3365_v33 = vpop.f32.mrb[51].mxu0  ;;  %v3522_v6 = vadd.f32 %v4638_v56, %v3452_v39  ;;  %v1998_v14 = vpop.f32.mrb[3].mxu1  ;;  %v3515_v30 = vadd.f32 %v3514_v8, %v3345_v44 }
 0x1ea   : > { %v3366_v45 = vadd.f32 %v3365_v33, %v3364_v35  ;;  %v3549_v15 = vadd.f32 %v3548_v38, %v3363_v16  ;;  %v3526_v28 = vadd.f32 %v4632_v43, %v1998_v14  ;;  %v3519_v47 = vadd.f32 %v3518_v3, %v4652_v51 }
 0x1eb   : > { %v3523_v48 = vadd.f32 %v3522_v6, %v3348_v49 }
 0x1ec   : > { %v3555_v37 = vadd.f32 %v3554_v32, %v3366_v45  ;;  %v3527_v55 = vadd.f32 %v3526_v28, %v4654_v13 }
 0x1ee   : > { %v3367_v54 = vpop.f32.mrb[52].mxu0  ;;  %v3455_v34 = vpop.f32.mrb[4].mxu1 }
 0x1ef   : > { %v3368_v58 = vpop.f32.mrb[53].mxu0  ;;  %v3530_v42 = vadd.f32 %v4648_v26, %v3455_v34  ;;  %v2011_v40 = vpop.f32.mrb[5].mxu1 }
 0x1f0   : > { %v3369_v59 = vadd.f32 %v3368_v58, %v3367_v54  ;;  %v3370_v56 = vpop.f32.mrb[54].mxu0  ;;  %v3534_v63 = vadd.f32 %v4642_v36, %v2011_v40  ;;  %v3456_v44 = vpop.f32.mrb[6].mxu1 }
 0x1f1   : > { %v3371_v38 = vpop.f32.mrb[55].mxu0  ;;  %v3538_v43 = vadd.f32 %v4650_v27, %v3456_v44  ;;  %v2014_v0 = vpop.f32.mrb[7].mxu1  ;;  %v3531_v49 = vadd.f32 %v3530_v42, %v3357_v60 }
 0x1f2   : > { %v3372_v51 = vadd.f32 %v3371_v38, %v3370_v56  ;;  %v3546_v32 = vadd.f32 %v4658_v50, %v3369_v59  ;;  %v3542_v13 = vadd.f32 %v4644_v12, %v2014_v0  ;;  %v3535_v1 = vadd.f32 %v3534_v63, %v3351_v61 }
 0x1f3   : > { %v3539_v26 = vadd.f32 %v3538_v43, %v3360_v23 }
 0x1f4   : > { %v3552_v4 = vadd.f32 %v4660_v29, %v3372_v51  ;;  %v4678_v7 = vadd.f32 %v3542_v13, %v3354_v10 }
 0x1f6   : > { %v3373_v17 = vpop.f32.mrb[56].mxu0 }
 0x1f7   : > { %v3374_v41 = vpop.f32.mrb[57].mxu0 }
 0x1f8   : > { %v3375_v36 = vadd.f32 %v3374_v41, %v3373_v17  ;;  %v3376_v18 = vpop.f32.mrb[58].mxu0 }
 0x1f9   : > { %v3377_v53 = vpop.f32.mrb[59].mxu0 }
 0x1fa   : > { %v3378_v25 = vadd.f32 %v3377_v53, %v3376_v18  ;;  %v3561_v27 = vadd.f32 %v4663_v57, %v3375_v36 }
 0x1fc   : > { %v3567_v5 = vadd.f32 %v3566_v46, %v3378_v25 }
 0x1fe   : > { %v3379_v20 = vpop.f32.mrb[60].mxu0 }
 0x1ff   : > { %v3380_v50 = vpop.f32.mrb[61].mxu0 }
 0x200   : > { %v3381_v60 = vadd.f32 %v3380_v50, %v3379_v20  ;;  %v3382_v52 = vpop.f32.mrb[62].mxu0 }
 0x201   : > { %v3383_v12 = vpop.f32.mrb[63].mxu0 }
 0x202   : > { %v3384_v61 = vadd.f32 %v3383_v12, %v3382_v52  ;;  %v3558_v2 = vadd.f32 %v3557_v31, %v3381_v60 }
 0x204   : > { %v3564_v29 = vadd.f32 %v3563_v24, %v3384_v61 }
 0x206   : > { %v3483_v21 = vpop.f32.mrb[64].mxu0  ;;  %v3491_v23 = vpop.f32.mrb[8].mxu1 }
 0x207   : > { %v3516_v10 = vadd.f32 %v3515_v30, %v3483_v21  ;;  %v2416_v11 = vpop.f32.mrb[65].mxu0  ;;  %v4681_v19 = vadd.f32 %v3546_v32, %v3491_v23  ;;  %v2448_v22 = vpop.f32.mrb[9].mxu1 }
 0x208   : > { %v3520_v62 = vadd.f32 %v3519_v47, %v2416_v11  ;;  %v3484_v8 = vpop.f32.mrb[66].mxu0  ;;  %v3550_v57 = vadd.f32 %v3549_v15, %v2448_v22  ;;  %v3492_v9 = vpop.f32.mrb[10].mxu1 }
 0x209   : > { %v3524_v46 = vadd.f32 %v3523_v48, %v3484_v8  ;;  %v2419_v16 = vpop.f32.mrb[67].mxu0  ;;  %v4683_v35 = vadd.f32 %v3552_v4, %v3492_v9  ;;  %v2451_v24 = vpop.f32.mrb[11].mxu1  ;;  %v2598_v48 = vmul.f32 %v3516_v10, %v3516_v10  ;;  %v2606_v11 = vmul.f32 %v4681_v19, %v4681_v19 }
 0x20a   : > { %v3528_v31 = vadd.f32 %v3527_v55, %v2419_v16  ;;  %v3556_v39 = vadd.f32 %v3555_v37, %v2451_v24  ;;  %v2596_v45 = vmul.f32 %v3520_v62, %v3520_v62 }
 0x20b   : > { %v3115_v3 = vpack.c.bf16 %v3524_v46, %v3516_v10  ;;  %v3135_v33 = vpack.c.bf16 %v4683_v35, %v4681_v19  ;;  %v2599_v63 = vmul.f32 %v3524_v46, %v3524_v46  ;;  %v2607_v8 = vmul.f32 %v4683_v35, %v4683_v35 }
 0x20c   : > { %v3110_v6 = vpack.c.bf16 %v3528_v31, %v3520_v62  ;;  %v2575_v14 = vadd.f32 %v3528_v31, %v3520_v62  ;;  %v2597_v30 = vmul.f32 %v3528_v31, %v3528_v31  ;;  %v3130_v15 = vpack.c.bf16 %v3556_v39, %v3550_v57 }
 0x20d   : > { %3154 = vst [vmem:[%s4077_s14 + $0x8] sm:$0xff] %v3115_v3   ;;  %3158 = vst [vmem:[%s4077_s14 + $0x28] sm:$0xff] %v3135_v33  }
 0x20e   : > { %3111 = vst [vmem:[%s4077_s14] sm:$0xff] %v3110_v6   ;;  %v2576_v28 = vadd.f32 %v3516_v10, %v2575_v14  ;;  %v3487_v47 = vpop.f32.mrb[68].mxu0  ;;  %v2612_v54 = vadd.f32 %v2597_v30, %v2596_v45  ;;  %3157 = vst [vmem:[%s4077_s14 + $0x20] sm:$0xff] %v3130_v15   ;;  %v3495_v34 = vpop.f32.mrb[12].mxu1 }
 0x20f   : > { %v3532_v55 = vadd.f32 %v3531_v49, %v3487_v47  ;;  %v2432_v58 = vpop.f32.mrb[69].mxu0  ;;  %v3559_v37 = vadd.f32 %v3558_v2, %v3495_v34  ;;  %v2464_v59 = vpop.f32.mrb[13].mxu1 }
 0x210   : > { %v3536_v42 = vadd.f32 %v3535_v1, %v2432_v58  ;;  %v2577_v40 = vadd.f32 %v3524_v46, %v2576_v28  ;;  %v3488_v56 = vpop.f32.mrb[70].mxu0  ;;  %v2613_v44 = vadd.f32 %v2612_v54, %v2598_v48  ;;  %v3562_v38 = vadd.f32 %v3561_v27, %v2464_v59  ;;  %v3496_v0 = vpop.f32.mrb[14].mxu1 }
 0x211   : > { %v3540_v43 = vadd.f32 %v3539_v26, %v3488_v56  ;;  %v2435_v51 = vpop.f32.mrb[71].mxu0  ;;  %v3565_v4 = vadd.f32 %v3564_v29, %v3496_v0  ;;  %v2467_v49 = vpop.f32.mrb[15].mxu1  ;;  %v2602_v50 = vmul.f32 %v3532_v55, %v3532_v55  ;;  %v2604_v29 = vmul.f32 %v3550_v57, %v3550_v57 }
 0x212   : > { %v2578_v32 = vadd.f32 %v3536_v42, %v2577_v40  ;;  %v2600_v13 = vmul.f32 %v3536_v42, %v3536_v42  ;;  %v2614_v17 = vadd.f32 %v2613_v44, %v2599_v63  ;;  %v3544_v36 = vadd.f32 %v4678_v7, %v2435_v51 }
 0x213   : > { %v3125_v41 = vpack.c.bf16 %v3540_v43, %v3532_v55  ;;  %v3145_v1 = vpack.c.bf16 %v3565_v4, %v3559_v37  ;;  %v3568_v18 = vadd.f32 %v3567_v5, %v2467_v49  ;;  %v2603_v12 = vmul.f32 %v3540_v43, %v3540_v43 }
 0x214   : > { %v2615_v53 = vadd.f32 %v2614_v17, %v2600_v13  ;;  %v3120_v25 = vpack.c.bf16 %v3544_v36, %v3536_v42  ;;  %v2579_v27 = vadd.f32 %v3544_v36, %v2578_v32  ;;  %v2601_v26 = vmul.f32 %v3544_v36, %v3544_v36 }
 0x215   : > { %3156 = vst [vmem:[%s4077_s14 + $0x18] sm:$0xff] %v3125_v41   ;;  %3160 = vst [vmem:[%s4077_s14 + $0x38] sm:$0xff] %v3145_v1   ;;  %v3140_v20 = vpack.c.bf16 %v3568_v18, %v3562_v38  ;;  %v2605_v7 = vmul.f32 %v3556_v39, %v3556_v39  ;;  %v2608_v16 = vmul.f32 %v3562_v38, %v3562_v38 }
 0x216   : > { %3155 = vst [vmem:[%s4077_s14 + $0x10] sm:$0xff] %v3120_v25   ;;  %v2580_v60 = vadd.f32 %v3532_v55, %v2579_v27  ;;  %v2616_v52 = vadd.f32 %v2615_v53, %v2601_v26  ;;  %v2609_v3 = vmul.f32 %v3568_v18, %v3568_v18  ;;  %v2610_v6 = vmul.f32 %v3559_v37, %v3559_v37 }
 0x217   : > { %3159 = vst [vmem:[%s4077_s14 + $0x30] sm:$0xff] %v3140_v20   ;;  %v2611_v45 = vmul.f32 %v3565_v4, %v3565_v4 }
 0x218   : > { %v2581_v61 = vadd.f32 %v3540_v43, %v2580_v60  ;;  %v2617_v2 = vadd.f32 %v2616_v52, %v2602_v50 }
 0x21a   : > { %v2582_v21 = vadd.f32 %v3550_v57, %v2581_v61  ;;  %v2618_v10 = vadd.f32 %v2617_v2, %v2603_v12 }
 0x21c   : > { %v2619_v5 = vadd.f32 %v2618_v10, %v2604_v29  ;;  %v2583_v23 = vadd.f32 %v3556_v39, %v2582_v21 }
 0x21e   : > { %v2584_v62 = vadd.f32 %v4681_v19, %v2583_v23  ;;  %v2620_v22 = vadd.f32 %v2619_v5, %v2605_v7 }
 0x220   : > { %v2585_v46 = vadd.f32 %v4683_v35, %v2584_v62  ;;  %v2621_v9 = vadd.f32 %v2620_v22, %v2606_v11 }
 0x222   : > { %v2586_v31 = vadd.f32 %v3562_v38, %v2585_v46  ;;  %v2622_v24 = vadd.f32 %v2621_v9, %v2607_v8 }
 0x224   : > { %v2587_v57 = vadd.f32 %v3568_v18, %v2586_v31  ;;  %v2623_v33 = vadd.f32 %v2622_v24, %v2608_v16 }
 0x226   : > { %v2588_v39 = vadd.f32 %v3559_v37, %v2587_v57  ;;  %v2624_v14 = vadd.f32 %v2623_v33, %v2609_v3 }
 0x228   : > { %v2589_v30 = vadd.f32 %v3565_v4, %v2588_v39  ;;  %v2625_v19 = vadd.f32 %v2624_v14, %v2610_v6 }
 0x22a   : > { %v2590_v15 = vrot.slane %v2589_v30, 4  ;;  %v2626_v28 = vadd.f32 %v2625_v19, %v2611_v45 }
 0x22c   : > { %v2591_v47 = vadd.f32 %v2590_v15, %v2589_v30  ;;  %v2627_v48 = vrot.slane %v2626_v28, 4 }
 0x22e   : > { %v2592_v54 = vrot.slane %v2591_v47, 2  ;;  %v2628_v35 = vadd.f32 %v2627_v48, %v2626_v28 }
 0x230   : > { %v2593_v55 = vadd.f32 %v2592_v54, %v2591_v47  ;;  %v2629_v34 = vrot.slane %v2628_v35, 2 }
 0x232   : > { %v2594_v58 = vrot.slane %v2593_v55, 1  ;;  %v2630_v42 = vadd.f32 %v2629_v34, %v2628_v35 }
 0x234   : > { %v2631_v40 = vrot.slane %v2630_v42, 1  ;;  %v2595_v59 = vadd.f32 %v2594_v58, %v2593_v55 }
 0x236   : > { %v2632_v56 = vadd.f32 %v2631_v40, %v2630_v42 }
 0x238   : > { %v2634_v37 = vsel %vm763_vm3, %v2595_v59, %v2632_v56 }
 0x239   : > { %2635 = vst [vmem:[%s4110_s15] sm:$0x3] %v2634_v37 }
 0x23a PF: > { %s18_s11 = sadd.s32 1, %s3841_s11   ;;  %s4768_s14 = sld [smem:[#allocation10_spill]] }
 0x23b   : > { %p15_p11 = scmp.ge.s32.totalorder %s18_s11, 6   ;;  %s4769_s8 = sld [smem:[#allocation9_spill]] }
 0x23c   : > { %s4770_s21 = sld [smem:[#allocation7_spill]]  ;;  %s4771_s17 = sld [smem:[#allocation8_spill]] }
 0x23d   : > { %s4772_s24 = smov %s3805_s25  ;;  %s4773_s25 = smov %s3994_s13 }
 0x23e   : > { %s4774_s26 = smov %s3813_s27  ;;  %s4776_s28 = smov %s3821_s29 }
 0x23f   : > { %s4778_s30 = smov %s3833_s9  ;;  %17 = sbr.rel (!%p15_p11) target bundleno = 10 (0xa), region = 242 }
 0x240   : > { %s4775_s27 = smov %s4768_s14 }
 0x241   : > { %s4777_s29 = smov %s4769_s8  ;;  %s4779_s8 = smov %s3837_s10 }
 0x242   : > { %s4780_s9 = smov %s4770_s21  ;;  %s4781_s10 = smov %s4771_s17 }

// kernel: basic_block_forward.3
= control target key start
LH: loop header
LB: loop body
LE: loop exit
PB: predicated region body
PF: predicated region fallthrough
CT: control target
= control target key end

     0   :  { %s3945_s18 = smov 0   ;;  %s3947_s19 = smov 0   ;;  %s5184_s0 = inlined_call_operand.vmem [shape: bf16[2,16,16,128], index: 0, kind: input, shape index: {}, may-alias: {0,1,2}]   ;;  %s5185_s1 = inlined_call_operand.vmem [shape: bf16[2,16,16,128], index: 1, kind: input, shape index: {}, may-alias: {0,1,2}]   ;;  %s5186_s2 = inlined_call_operand.vmem [shape: bf16[2,16,16,128], index: 2, kind: input, shape index: {}, may-alias: {0,1,2}]   ;;  %s5187_s3 = inlined_call_operand.vmem [shape: bf16[3,384,256], index: 3, kind: input, shape index: {}]   ;;  %s5188_s4 = inlined_call_operand.vmem [shape: bf16[2,16,16,256], index: 4, kind: output, shape index: {0}]   ;;  %s5189_s5 = inlined_call_operand.vmem [shape: f32[2,2,2,256], index: 5, kind: output, shape index: {1}]  }
   0x1   :  { %s3949_s20 = smov 0   ;;  %s3951_s21 = smov 0  }
   0x2   :  { %s3953_s22 = smov 0  }
   0x3 LB: > { %5191 = sst [smem:[#allocation3_spill]] %s3906_s21  ;;  %s25_s23 = sadd.s32 1, %s3902_s20  ;;  %s3910_s22 = sphi %s3953_s22, %s16_s22   ;;  %s3906_s21 = sphi %s3951_s21, %s5200_s21   ;;  %s3902_s20 = sphi %s3949_s20, %s5202_s20   ;;  %s3898_s19 = sphi %s3947_s19, %s5198_s19   ;;  %s3894_s18 = sphi %s3945_s18, %s5201_s18  }
   0x4   : > { %s28_s24 = sadd.s32 1, %s3906_s21  ;;  %p26_p0 = scmp.ge.s32.totalorder %s25_s23, 2 }
   0x5   : > { %p3109_p1 = scmp.ge.s32.totalorder %s3910_s22, 1  ;;  %p278_p2 = scmp.lt.s32.totalorder %s3910_s22, 5 }
   0x6   : > { %s5204_s23 = smov (%p26_p0, %s25_s23), 0  ;;  %s5206_s24 = smov (!%p26_p0, %s28_s24), %s3906_s21 }
   0x7   : > { %5192 = sst [smem:[#allocation4_spill]] %s5204_s23  ;;  %p279_p3 = pnand %p3109_p1, %p278_p2 }
   0x8   : > { %p30_p4 = scmp.ge.s32.totalorder %s5206_s24, 2  ;;  %vm437_vm0 = vcmask (!%p279_p3), 1047559   ;;  %vm438_vm1 = vsmask.f32 (!%p279_p3), 7966  ;;  %v440_v0 = vld [vmem:[#allocation2] sm:$0x80] (!%p279_p3) }
   0x9   : > { %282 = sbr.rel (%p279_p3) target bundleno = 555 (0x22b), region = 36  ;;  %vm470_vm2 = vcmask (!%p279_p3), 1040384   ;;  %vm3979_vm3 = vmand (!%p279_p3), %vm437_vm0, %vm438_vm1  ;;  %v443_v2 = vld [vmem:[#allocation2 + $0x18] sm:$0x80] (!%p279_p3)  ;;  %v446_v3 = vld [vmem:[#allocation2 + $0x30] sm:$0x80] (!%p279_p3) }
   0xa   : > { %s5208_s24 = smov (%p30_p4, %s5206_s24), 0  ;;  %vm471_vm4 = vsmask.f32 (!%p279_p3), 256  ;;  %v441_v4 = vsel (!%p279_p3), %vm3979_vm3, 0, %v440_v0  ;;  %v444_v5 = vsel (!%p279_p3), %vm3979_vm3, 0, %v443_v2  ;;  %v447_v6 = vsel (!%p279_p3), %vm3979_vm3, 0, %v446_v3 }
   0xb   : > { %5193 = sst [smem:[#allocation5_spill]] %s5208_s24  ;;  %v449_v7 = vld [vmem:[#allocation2 + $0x48] sm:$0x80] (!%p279_p3)  ;;  %s3990_s25 = sshll.u32 (!%p279_p3), %s3894_s18, 3  ;;  %442 = vst [vmem:[#allocation2] sm:$0x80] (!%p279_p3), %v441_v4  ;;  %vm4001_vm5 = vmand (!%p279_p3), %vm470_vm2, %vm471_vm4 }
   0xc   : > { %445 = vst [vmem:[#allocation2 + $0x18] sm:$0x80] (!%p279_p3), %v444_v5  ;;  %448 = vst [vmem:[#allocation2 + $0x30] sm:$0x80] (!%p279_p3), %v447_v6  ;;  %v450_v8 = vsel (!%p279_p3), %vm3979_vm3, 0, %v449_v7  ;;  %p352_p5 = scmp.lt.s32.totalorder (!%p279_p3), %s3898_s19, 1 }
   0xd   : > { %v452_v9 = vld [vmem:[#allocation2 + $0x60] sm:$0x80] (!%p279_p3)  ;;  %v455_v10 = vld [vmem:[#allocation2 + $0x78] sm:$0x80] (!%p279_p3)  ;;  %451 = vst [vmem:[#allocation2 + $0x48] sm:$0x80] (!%p279_p3), %v450_v8 }
   0xe   : > { %v453_v11 = vsel (!%p279_p3), %vm3979_vm3, 0, %v452_v9  ;;  %v456_v12 = vsel (!%p279_p3), %vm3979_vm3, 0, %v455_v10  ;;  %v458_v13 = vld [vmem:[#allocation2 + $0x90] sm:$0x80] (!%p279_p3)  ;;  %v461_v14 = vld [vmem:[#allocation2 + $0xa8] sm:$0x80] (!%p279_p3) }
   0xf   : > { %454 = vst [vmem:[#allocation2 + $0x60] sm:$0x80] (!%p279_p3), %v453_v11  ;;  %457 = vst [vmem:[#allocation2 + $0x78] sm:$0x80] (!%p279_p3), %v456_v12  ;;  %v459_v16 = vsel (!%p279_p3), %vm3979_vm3, 0, %v458_v13  ;;  %v462_v17 = vsel (!%p279_p3), %vm3979_vm3, 0, %v461_v14 }
  0x10   : > { %v464_v18 = vld [vmem:[#allocation2 + $0xc0] sm:$0x80]  ;;  %v467_v19 = vld [vmem:[#allocation2 + $0xd8] sm:$0x80]  ;;  %460 = vst [vmem:[#allocation2 + $0x90] sm:$0x80] %v459_v16 }
  0x11   : > { %463 = vst [vmem:[#allocation2 + $0xa8] sm:$0x80] %v462_v17  ;;  %v465_v20 = vsel %vm3979_vm3, 0, %v464_v18  ;;  %v468_v21 = vsel %vm3979_vm3, 0, %v467_v19  ;;  %v473_v22 = vld [vmem:[#allocation2 + $0x10] sm:$0x1] }
  0x12   : > { %v476_v23 = vld [vmem:[#allocation2 + $0x28] sm:$0x1]  ;;  %466 = vst [vmem:[#allocation2 + $0xc0] sm:$0x80] %v465_v20  ;;  %469 = vst [vmem:[#allocation2 + $0xd8] sm:$0x80] %v468_v21 }
  0x13   : > { %v474_v24 = vsel %vm4001_vm5, 0, %v473_v22  ;;  %v477_v25 = vsel %vm4001_vm5, 0, %v476_v23  ;;  %v479_v26 = vld [vmem:[#allocation2 + $0x40] sm:$0x1]  ;;  %v482_v27 = vld [vmem:[#allocation2 + $0x58] sm:$0x1] }
  0x14   : > { %475 = vst [vmem:[#allocation2 + $0x10] sm:$0x1] %v474_v24  ;;  %478 = vst [vmem:[#allocation2 + $0x28] sm:$0x1] %v477_v25  ;;  %v480_v28 = vsel %vm4001_vm5, 0, %v479_v26  ;;  %v483_v29 = vsel %vm4001_vm5, 0, %v482_v27 }
  0x15   : > { %v485_v30 = vld [vmem:[#allocation2 + $0x70] sm:$0x1]  ;;  %v488_v31 = vld [vmem:[#allocation2 + $0x88] sm:$0x1]  ;;  %481 = vst [vmem:[#allocation2 + $0x40] sm:$0x1] %v480_v28 }
  0x16   : > { %484 = vst [vmem:[#allocation2 + $0x58] sm:$0x1] %v483_v29  ;;  %v486_v32 = vsel %vm4001_vm5, 0, %v485_v30  ;;  %v489_v33 = vsel %vm4001_vm5, 0, %v488_v31  ;;  %v491_v34 = vld [vmem:[#allocation2 + $0xa0] sm:$0x1] }
  0x17   : > { %v494_v35 = vld [vmem:[#allocation2 + $0xb8] sm:$0x1]  ;;  %487 = vst [vmem:[#allocation2 + $0x70] sm:$0x1] %v486_v32  ;;  %490 = vst [vmem:[#allocation2 + $0x88] sm:$0x1] %v489_v33 }
  0x18   : > { %v492_v36 = vsel %vm4001_vm5, 0, %v491_v34  ;;  %v495_v37 = vsel %vm4001_vm5, 0, %v494_v35  ;;  %v497_v38 = vld [vmem:[#allocation2 + $0xd0] sm:$0x1]  ;;  %v500_v39 = vld [vmem:[#allocation2 + $0xe8] sm:$0x1] }
  0x19   : > { %493 = vst [vmem:[#allocation2 + $0xa0] sm:$0x1] %v492_v36  ;;  %496 = vst [vmem:[#allocation2 + $0xb8] sm:$0x1] %v495_v37  ;;  %v498_v40 = vsel %vm4001_vm5, 0, %v497_v38  ;;  %v501_v41 = vsel %vm4001_vm5, 0, %v500_v39 }
  0x1a   : > { %s5210_s19 = smov (!%p352_p5, %s3898_s19), 1  ;;  %499 = vst [vmem:[#allocation2 + $0xd0] sm:$0x1] %v498_v40  ;;  %502 = vst [vmem:[#allocation2 + $0xe8] sm:$0x1] %v501_v41  ;;  %p354_p6 = scmp.lt.s32.totalorder %s3990_s25, 15 }
  0x1b   : > { %p409_p7 = scmp.lt.s32.totalorder %s3894_s18, 1  ;;  %s4038_s26 = sshll.u32 %s5210_s19, 5 }
  0x1c   : > { %s3133_s27 = sshll.u32 %s5210_s19, 6  ;;  %s3136_s24 = sshll.u32 %s5210_s19, 2 }
  0x1d   : > { %s355_s28 = scalar_select %p354_p6, %s3990_s25, 15 }
  0x1e   : > { %s410_s29 = scalar_select %p409_p7, %s3894_s18, 1 }
  0x1f   : > { %s3111_s30 = sshll.u32 %s355_s28, 1  ;;  %s3132_s6 = sshll.u32 %s355_s28, 2 }
  0x20   : > { %s358_s7 = sadd.s32 %s4038_s26, %s3111_s30  ;;  %s403_s8 = sadd.s32 %s3133_s27, %s3132_s6 }
  0x21   : > { %s3113_s9 = sshll.u32 %s358_s7, 2  ;;  %s3134_s10 = sshll.u32 %s403_s8, 2 }
  0x22   : > { %s360_s13 = scalar_lea.vmem %s5184_s0, %s3113_s9  ;;  %s4049_s16 = scalar_lea.vmem %s5188_s4, %s3134_s10 }
  0x23   : > { %s3135_s17 = sshll.u32 %s410_s29, 1  ;;  %v3646_v42 = vld [vmem:[%s360_s13] sm:$0xff]   ;;  %s3115_s21 = sadd.s32 4294967295, %s3990_s25  ;;  %v3647_v43 = vld [vmem:[%s360_s13 + $0x8] sm:$0xff]   ;;  %v3648_v44 = vld [vmem:[%s360_s13 + $0x10] sm:$0xff]  }
  0x24   : > { %s413_s23 = sadd.s32 %s3136_s24, %s3135_s17  ;;  %552 = vst [vmem:[#allocation2 + $0x20] sm:$0xff] %v3646_v42  ;;  %p364_p8 = scmp.gt.s32.totalorder %s3115_s21, 0  ;;  %553 = vst [vmem:[#allocation2 + $0x38] sm:$0xff] %v3647_v43  ;;  %v3649_v45 = vld [vmem:[%s360_s13 + $0x18] sm:$0xff]   ;;  %v3650_v46 = vld [vmem:[%s360_s13 + $0x20] sm:$0xff]  }
  0x25   : > { %s3137_s28 = sshll.u32 %s413_s23, 1  ;;  %p3116_p9 = scmp.lt.s32.totalorder %s3115_s21, 15  ;;  %554 = vst [vmem:[#allocation2 + $0x50] sm:$0xff] %v3648_v44  ;;  %555 = vst [vmem:[#allocation2 + $0x68] sm:$0xff] %v3649_v45  ;;  %v3651_v47 = vld [vmem:[%s360_s13 + $0x28] sm:$0xff]   ;;  %v3652_v48 = vld [vmem:[%s360_s13 + $0x30] sm:$0xff]  }
  0x26   : > { %s4055_s6 = scalar_lea.vmem %s5189_s5, %s3137_s28  ;;  %s5212_s21 = smov (!%p364_p8, %s3115_s21), 0  ;;  %556 = vst [vmem:[#allocation2 + $0x80] sm:$0xff] %v3650_v46  ;;  %557 = vst [vmem:[#allocation2 + $0x98] sm:$0xff] %v3651_v47  ;;  %v3653_v49 = vld [vmem:[%s360_s13 + $0x38] sm:$0xff]  }
  0x27   : > { %s380_s19 = sadd.s32 8, %s3990_s25  ;;  %s5214_s21 = smov (!%p3116_p9, %s5212_s21), 15  ;;  %558 = vst [vmem:[#allocation2 + $0xb0] sm:$0xff] %v3652_v48  ;;  %559 = vst [vmem:[#allocation2 + $0xc8] sm:$0xff] %v3653_v49 }
  0x28   : > { %s3121_s23 = sshll.u32 %s5214_s21, 1  ;;  %p381_p10 = scmp.lt.s32.totalorder %s380_s19, 15 }
  0x29   : > { %s372_s24 = sadd.s32 %s3121_s23, %s4038_s26  ;;  %p3148_p11 = scmp.ne.s32.totalorder %s3894_s18, 0 }
  0x2a   : > { %s3123_s29 = sshll.u32 %s372_s24, 2  ;;  %s5216_s19 = smov (!%p381_p10, %s380_s19), 15  ;;  %v3912_v52 = vmov (!%p3148_p11), 0  }
  0x2b   : > { %s374_s9 = scalar_lea.vmem %s5185_s1, %s3123_s29  ;;  %s5218_s19 = smov (!%p381_p10, %s5216_s19), 15 }
  0x2c   : > { %v3654_v50 = vld [vmem:[%s374_s9] sm:$0xff]   ;;  %s3128_s25 = sshll.u32 %s5218_s19, 1  ;;  %578 = sbr.rel (%p3148_p11) target bundleno = 51 (0x33), region = 40 }
  0x2d   : > { %566 = vst [vmem:[#allocation2 + $0x8] sm:$0xff] %v3654_v50  ;;  %s389_s10 = sadd.s32 %s3128_s25, %s4038_s26 }
  0x2e   : > { %s3130_s11 = sshll.u32 %s389_s10, 2  ;;  %579 = vst [vmem:[#allocation2 + $0x8] sm:$0xff] (!%p3148_p11), %v3912_v52 }
  0x2f   : > { %s391_s13 = scalar_lea.vmem %s5186_s2, %s3130_s11 }
  0x30   : > { %v3655_v51 = vld [vmem:[%s391_s13] sm:$0xff]  }
  0x31   : > { %574 = vst [vmem:[#allocation2 + $0xe0] sm:$0xff] %v3655_v51 }
  0x33 PF: > { %p3149_p12 = scmp.ne.s32.totalorder %s3894_s18, 1 }
  0x34   : > { %v3913_v53 = vmov (!%p3149_p12), 0  }
  0x35   : > { %583 = sbr.rel (%p3149_p12) target bundleno = 60 (0x3c), region = 44  ;;  %584 = vst [vmem:[#allocation2 + $0xe0] sm:$0xff] (!%p3149_p12), %v3913_v53 }
  0x3c PF: > { %v3656_v54 = vld [vmem:[%s5187_s3 + $0x184] ss:$8 sps:$4 sm:$0xff]   ;;  %v3914_v56 = vmov 0   ;;  %v3660_v57 = vld [vmem:[%s5187_s3 + $0x180] ss:$8 sps:$4 sm:$0xff]   ;;  %vm715_vm6 = vcmask 1046528  }
  0x3d   : > { %v3658_v55 = vld [vmem:[%s5187_s3 + $0x284] ss:$8 sps:$4 sm:$0xff]   ;;  %1534 = vmatprep.mubr.bf16.mxu0 %v3914_v56  ;;  %1389 = vmatprep.subr.bf16.mxu1 %v3656_v54  ;;  %v3661_v58 = vld [vmem:[%s5187_s3 + $0x280] ss:$8 sps:$4 sm:$0xff]   ;;  %v3662_v59 = vld [vmem:[%s5187_s3 + $0x194] ss:$8 sps:$4 sm:$0xff]  }
  0x3e   : > { %1502 = vmatprep.subr.bf16.mxu0 %v3658_v55  ;;  %1390 = vmatpush1.bf16.msra.mxu1 %v3660_v57  ;;  %v3664_v60 = vld [vmem:[%s5187_s3 + $0x294] ss:$8 sps:$4 sm:$0xff]   ;;  %v3666_v61 = vld [vmem:[%s5187_s3 + $0x190] ss:$8 sps:$4 sm:$0xff]   ;;  %v3668_v63 = vld [vmem:[%s5187_s3 + $0x1a4] ss:$8 sps:$4 sm:$0xff]  }
  0x3f   : > { %1503 = vmatpush1.bf16.msra.mxu0 %v3661_v58  ;;  %1391 = vmatprep.subr.bf16.mxu1 %v3662_v59  ;;  %v3667_v62 = vld [vmem:[%s5187_s3 + $0x290] ss:$8 sps:$4 sm:$0xff]   ;;  %v3670_v0 = vld [vmem:[%s5187_s3 + $0x2a4] ss:$8 sps:$4 sm:$0xff]   ;;  %v3672_v1 = vld [vmem:[%s5187_s3 + $0x1a0] ss:$8 sps:$4 sm:$0xff]  }
  0x40   : > { %1504 = vmatprep.subr.bf16.mxu0 %v3664_v60  ;;  %v3673_v2 = vld [vmem:[%s5187_s3 + $0x2a0] ss:$8 sps:$4 sm:$0xff]   ;;  %v3674_v3 = vld [vmem:[%s5187_s3 + $0x1b4] ss:$8 sps:$4 sm:$0xff]   ;;  %v3678_v5 = vld [vmem:[%s5187_s3 + $0x1b0] ss:$8 sps:$4 sm:$0xff]  }
  0x41   : > { %v3676_v4 = vld [vmem:[%s5187_s3 + $0x2b4] ss:$8 sps:$4 sm:$0xff]   ;;  %v3679_v6 = vld [vmem:[%s5187_s3 + $0x2b0] ss:$8 sps:$4 sm:$0xff]   ;;  %v3680_v7 = vld [vmem:[%s5187_s3 + $0x1c4] ss:$8 sps:$4 sm:$0xff]  }
  0x42   : > { %1392 = vmatpush1.bf16.msra.mxu1 %v3666_v61  ;;  %v3682_v8 = vld [vmem:[%s5187_s3 + $0x2c4] ss:$8 sps:$4 sm:$0xff]   ;;  %v3684_v9 = vld [vmem:[%s5187_s3 + $0x1c0] ss:$8 sps:$4 sm:$0xff]   ;;  %v3686_v11 = vld [vmem:[%s5187_s3 + $0x1d4] ss:$8 sps:$4 sm:$0xff]  }
  0x43   : > { %1505 = vmatpush1.bf16.msra.mxu0 %v3667_v62  ;;  %1393 = vmatprep.subr.bf16.mxu1 %v3668_v63  ;;  %v3685_v10 = vld [vmem:[%s5187_s3 + $0x2c0] ss:$8 sps:$4 sm:$0xff]   ;;  %v3688_v12 = vld [vmem:[%s5187_s3 + $0x2d4] ss:$8 sps:$4 sm:$0xff]   ;;  %v3690_v13 = vld [vmem:[%s5187_s3 + $0x1d0] ss:$8 sps:$4 sm:$0xff]  }
  0x44   : > { %1506 = vmatprep.subr.bf16.mxu0 %v3670_v0  ;;  %v3691_v14 = vld [vmem:[%s5187_s3 + $0x2d0] ss:$8 sps:$4 sm:$0xff]   ;;  %v3692_v15 = vld [vmem:[%s5187_s3 + $0x1e4] ss:$8 sps:$4 sm:$0xff]   ;;  %v608_v18 = vld [vmem:[#allocation2 + $0x28] sm:$0x1] }
  0x45   : > { %v3694_v16 = vld [vmem:[%s5187_s3 + $0x2e4] ss:$8 sps:$4 sm:$0xff]   ;;  %v3696_v19 = vld [vmem:[%s5187_s3 + $0x1e0] ss:$8 sps:$4 sm:$0xff]   ;;  %v720_v21 = vrot.slane %v608_v18, 1  ;;  %v4173_v33 = vld [vmem:[#allocation2 + $0x38] sm:$0xff] }
  0x46   : > { %1394 = vmatpush1.bf16.msra.mxu1 %v3672_v1  ;;  %v4147_v17 = vld [vmem:[#allocation2 + $0x20] sm:$0xff]  ;;  %v3698_v23 = vld [vmem:[%s5187_s3 + $0x1f4] ss:$8 sps:$4 sm:$0xff]   ;;  %v3702_v28 = vld [vmem:[%s5187_s3 + $0x1f0] ss:$8 sps:$4 sm:$0xff]   ;;  %v722_v37 = vrot.slane %v4173_v33, 1 }
  0x47   : > { %1507 = vmatpush1.bf16.msra.mxu0 %v3673_v2  ;;  %1395 = vmatprep.subr.bf16.mxu1 %v3674_v3  ;;  %v719_v20 = vrot.slane %v4147_v17, 1  ;;  %v3697_v22 = vld [vmem:[%s5187_s3 + $0x2e0] ss:$8 sps:$4 sm:$0xff]   ;;  %v3700_v24 = vld [vmem:[%s5187_s3 + $0x2f4] ss:$8 sps:$4 sm:$0xff]   ;;  %v633_v27 = vshll.u32 %v4147_v17, 16 }
  0x48   : > { %1508 = vmatprep.subr.bf16.mxu0 %v3676_v4  ;;  %v3703_v29 = vld [vmem:[%s5187_s3 + $0x2f0] ss:$8 sps:$4 sm:$0xff]   ;;  %v3704_v32 = vld [vmem:[%s5187_s3 + $0x204] ss:$8 sps:$4 sm:$0xff]   ;;  %v610_v34 = vld [vmem:[#allocation2 + $0x40] sm:$0x1] }
  0x49   : > { %v721_v25 = vsel %vm715_vm6, %v719_v20, %v720_v21  ;;  %v797_v26 = vshrl.u32 %v719_v20, 16  ;;  %v723_v38 = vrot.slane %v610_v34, 1  ;;  %v3708_v39 = vld [vmem:[%s5187_s3 + $0x104] ss:$8 sps:$4 sm:$0xff]   ;;  %v635_v40 = vrot.slane %v633_v27, 1  ;;  %v4192_v50 = vld [vmem:[#allocation2 + $0x50] sm:$0xff] }
  0x4a   : > { %1396 = vmatpush1.bf16.msra.mxu1 %v3678_v5  ;;  %v801_v30 = vshrl.u32 %v721_v25, 16  ;;  %v804_v31 = vshll.u32 %v721_v25, 16  ;;  %v636_v41 = vshrl.u32 %v4147_v17, 16  ;;  %v3706_v43 = vld [vmem:[%s5187_s3 + $0x100] ss:$8 sps:$4 sm:$0xff]   ;;  %v828_v48 = vshrl.u32 %v722_v37, 16 }
  0x4b   : > { %1509 = vmatpush1.bf16.msra.mxu0 %v3679_v6  ;;  %1397 = vmatprep.subr.bf16.mxu1 %v3680_v7  ;;  %v799_v35 = vrot.slane %v797_v26, 7  ;;  %v724_v44 = vsel %vm715_vm6, %v722_v37, %v723_v38  ;;  %v3709_v45 = vld [vmem:[%s5187_s3 + $0x200] ss:$8 sps:$4 sm:$0xff]   ;;  %v612_v51 = vld [vmem:[#allocation2 + $0x58] sm:$0x1]  ;;  %v725_v54 = vrot.slane %v4192_v50, 1 }
  0x4c   : > { %1510 = vmatprep.subr.bf16.mxu0 %v3682_v8  ;;  %v803_v36 = vrot.slane %v801_v30, 7  ;;  %v832_v46 = vshrl.u32 %v724_v44, 16  ;;  %v835_v49 = vshll.u32 %v724_v44, 16  ;;  %v3710_v52 = vld [vmem:[%s5187_s3 + $0x214] ss:$8 sps:$4 sm:$0xff]   ;;  %v726_v55 = vrot.slane %v612_v51, 1 }
  0x4d   : > { %v638_v57 = vor.u32 %v636_v41, %v635_v40  ;;  %v3712_v58 = vld [vmem:[%s5187_s3 + $0x210] ss:$8 sps:$4 sm:$0xff]   ;;  %v3717_v59 = vld [vmem:[%s5187_s3 + $0x114] ss:$8 sps:$4 sm:$0xff]   ;;  %v3713_v60 = vld [vmem:[%s5187_s3 + $0x224] ss:$8 sps:$4 sm:$0xff]  }
  0x4e   : > { %1398 = vmatpush1.bf16.msra.mxu1 %v3684_v9  ;;  %v806_v42 = vor.u32 %v804_v31, %v803_v36  ;;  %v834_v53 = vrot.slane %v832_v46, 7  ;;  %v3715_v61 = vld [vmem:[%s5187_s3 + $0x110] ss:$8 sps:$4 sm:$0xff]   ;;  %v727_v62 = vsel %vm715_vm6, %v725_v54, %v726_v55  ;;  %v830_v63 = vrot.slane %v828_v48, 7  ;;  %v3726_v2 = vld [vmem:[%s5187_s3 + $0x124] ss:$8 sps:$4 sm:$0xff]  }
  0x4f   : > { %1511 = vmatpush1.bf16.msra.mxu0 %v3685_v10  ;;  %1399 = vmatprep.subr.bf16.mxu1 %v3686_v11  ;;  %v863_v1 = vshrl.u32 %v727_v62, 16  ;;  %v4218_v3 = vld [vmem:[#allocation2 + $0x68] sm:$0xff]  ;;  %v614_v4 = vld [vmem:[#allocation2 + $0x70] sm:$0x1]  ;;  %v785_v5 = vshrl.u32 %v635_v40, 16  ;;  %v789_v6 = vshrl.u32 %v638_v57, 16 }
  0x50   : > { %1512 = vmatprep.subr.bf16.mxu0 %v3688_v12  ;;  %v4190_v47 = vsel %vm471_vm4, %v799_v35, %v806_v42  ;;  %v837_v0 = vor.u32 %v835_v49, %v834_v53  ;;  %v728_v7 = vrot.slane %v4218_v3, 1  ;;  %v729_v8 = vrot.slane %v614_v4, 1  ;;  %v3718_v9 = vld [vmem:[%s5187_s3 + $0x220] ss:$8 sps:$4 sm:$0xff]   ;;  %v3733_v34 = vld [vmem:[%s5187_s3 + $0x130] ss:$8 sps:$4 sm:$0xff]  }
  0x51   : > { %v859_v10 = vshrl.u32 %v725_v54, 16  ;;  %v791_v11 = vrot.slane %v789_v6, 7  ;;  %v3724_v18 = vld [vmem:[%s5187_s3 + $0x120] ss:$8 sps:$4 sm:$0xff]   ;;  %v787_v20 = vrot.slane %v785_v5, 7  ;;  %v792_v21 = vshll.u32 %v638_v57, 16 }
  0x52   : > { %1400 = vmatpush1.bf16.msra.mxu1 %v3690_v13  ;;  %v4225_v12 = vsel %vm471_vm4, %v830_v63, %v837_v0  ;;  %v3719_v13 = vld [vmem:[%s5187_s3 + $0x234] ss:$8 sps:$4 sm:$0xff]   ;;  %v3745_v36 = vld [vmem:[%s5187_s3 + $0x144] ss:$8 sps:$4 sm:$0xff]   ;;  %v640_v37 = vshll.u32 %v4173_v33, 16  ;;  %v643_v38 = vshrl.u32 %v4173_v33, 16 }
  0x53   : > { %1513 = vmatpush1.bf16.msra.mxu0 %v3691_v14  ;;  %1401 = vmatprep.subr.bf16.mxu1 %v3692_v15  ;;  %v865_v14 = vrot.slane %v863_v1, 7  ;;  %v866_v15 = vshll.u32 %v727_v62, 16  ;;  %v794_v26 = vor.u32 %v792_v21, %v791_v11  ;;  %v890_v40 = vshrl.u32 %v728_v7, 16  ;;  %v3743_v48 = vld [vmem:[%s5187_s3 + $0x140] ss:$8 sps:$4 sm:$0xff]   ;;  %v4275_v51 = vld [vmem:[#allocation2 + $0x98] sm:$0xff] }
  0x54   : > { %1514 = vmatprep.subr.bf16.mxu0 %v3694_v16  ;;  %v730_v16 = vsel %vm715_vm6, %v728_v7, %v729_v8  ;;  %v642_v49 = vrot.slane %v640_v37, 1  ;;  %v587_v53 = vld [vmem:[#allocation2 + $0x18] sm:$0x80]  ;;  %v734_v62 = vrot.slane %v4275_v51, 1  ;;  %v3731_v0 = vld [vmem:[%s5187_s3 + $0x264] ss:$8 sps:$4 sm:$0xff]  }
  0x55   : > { %v894_v25 = vshrl.u32 %v730_v16, 16  ;;  %v4252_v35 = vsel %vm471_vm4, %v787_v20, %v794_v26  ;;  %v892_v55 = vrot.slane %v890_v40, 7  ;;  %v781_v1 = vrot.slane %v636_v41, 7  ;;  %v3736_v4 = vld [vmem:[%s5187_s3 + $0x260] ss:$8 sps:$4 sm:$0xff]  }
  0x56   : > { %1402 = vmatpush1.bf16.msra.mxu1 %v3696_v19  ;;  %v3735_v19 = vld [vmem:[%s5187_s3 + $0x134] ss:$8 sps:$4 sm:$0xff]   ;;  %1421 = vmatprep.mubr.bf16.mxu1 %v4252_v35  ;;  %v645_v54 = vor.u32 %v643_v38, %v642_v49  ;;  %v778_v5 = vshrl.u32 %v587_v53, 16  ;;  %v647_v7 = vshll.u32 %v4192_v50, 16  ;;  %v650_v8 = vshrl.u32 %v4192_v50, 16 }
  0x57   : > { %1515 = vmatpush1.bf16.msra.mxu0 %v3697_v22  ;;  %1403 = vmatprep.subr.bf16.mxu1 %v3698_v23  ;;  %v4237_v22 = vld [vmem:[#allocation2 + $0x80] sm:$0xff]  ;;  %v616_v23 = vld [vmem:[#allocation2 + $0x88] sm:$0x1]  ;;  %v896_v42 = vrot.slane %v894_v25, 7  ;;  %v3737_v41 = vld [vmem:[%s5187_s3 + $0x274] ss:$8 sps:$4 sm:$0xff]   ;;  %v782_v21 = vor.u32 %v781_v1, %v633_v27 }
  0x58   : > { %1516 = vmatprep.subr.bf16.mxu0 %v3700_v24  ;;  %v3721_v24 = vld [vmem:[%s5187_s3 + $0x230] ss:$8 sps:$4 sm:$0xff]   ;;  %v731_v30 = vrot.slane %v4237_v22, 1  ;;  %v732_v31 = vrot.slane %v616_v23, 1  ;;  %v3763_v25 = vld [vmem:[%s5187_s3 + $0x164] ss:$8 sps:$4 sm:$0xff]  }
  0x59   : > { %v620_v20 = vld [vmem:[#allocation2 + $0xb8] sm:$0x1]  ;;  %v780_v26 = vrot.slane %v778_v5, 7  ;;  %v654_v17 = vshll.u32 %v4218_v3, 16 }
  0x5a   : > { %1404 = vmatpush1.bf16.msra.mxu1 %v3702_v28  ;;  %v861_v28 = vrot.slane %v859_v10, 7  ;;  %v733_v46 = vsel %vm715_vm6, %v731_v30, %v732_v31  ;;  %v921_v6 = vshrl.u32 %v731_v30, 16  ;;  %v3739_v27 = vld [vmem:[%s5187_s3 + $0x270] ss:$8 sps:$4 sm:$0xff]  }
  0x5b   : > { %1517 = vmatpush1.bf16.msra.mxu0 %v3703_v29  ;;  %1405 = vmatprep.subr.bf16.mxu1 %v3704_v32  ;;  %v868_v29 = vor.u32 %v866_v15, %v865_v14  ;;  %v3722_v32 = vld [vmem:[%s5187_s3 + $0x244] ss:$8 sps:$4 sm:$0xff]   ;;  %v928_v11 = vshll.u32 %v733_v46, 16  ;;  %v823_v15 = vshll.u32 %v645_v54, 16  ;;  %v3746_v1 = vld [vmem:[%s5187_s3 + $0x10] ss:$8 sps:$4 sm:$0xff]  }
  0x5c   : > { %1968 = vmatprep.subr.bf16.mxu0 %v3708_v39  ;;  %v3727_v39 = vld [vmem:[%s5187_s3 + $0x240] ss:$8 sps:$4 sm:$0xff]  }
  0x5d   : > { %v4264_v44 = vsel %vm471_vm4, %v861_v28, %v868_v29  ;;  %v923_v28 = vrot.slane %v921_v6, 7  ;;  %v589_v29 = vld [vmem:[#allocation2 + $0x30] sm:$0x80]  ;;  %v622_v6 = vld [vmem:[#allocation2 + $0xd0] sm:$0x1] }
  0x5e   : > { %1535 = vmatmul.mubr.bf16.vlgmr.msra.gmra.mrb[0].mxu0 %v4190_v47  ;;  %1406 = vmatpush1.bf16.msra.mxu1 %v3709_v45  ;;  %v3728_v45 = vld [vmem:[%s5187_s3 + $0x254] ss:$8 sps:$4 sm:$0xff]  }
  0x5f   : > { %1969 = vmatpush1.bf16.msra.mxu0 %v3706_v43  ;;  %1407 = vmatprep.subr.bf16.mxu1 %v3710_v52  ;;  %v897_v43 = vshll.u32 %v730_v16, 16  ;;  %v618_v52 = vld [vmem:[#allocation2 + $0xa0] sm:$0x1] }
  0x60   : > { %1544 = vmatprep.mubr.bf16.mxu0 %v3914_v56  ;;  %1970 = vmatprep.subr.bf16.mxu0 %v3717_v59  ;;  %v3754_v59 = vld [vmem:[%s5187_s3 + $0x154] ss:$8 sps:$4 sm:$0xff]   ;;  %v735_v63 = vrot.slane %v618_v52, 1 }
  0x61   : > { %v899_v57 = vor.u32 %v897_v43, %v896_v42  ;;  %v738_v42 = vrot.slane %v620_v20, 1  ;;  %v4337_v43 = vrot.slane %v654_v17, 1 }
  0x62   : > { %1408 = vmatpush1.bf16.msra.mxu1 %v3712_v58  ;;  %v925_v58 = vshrl.u32 %v733_v46, 16  ;;  %v736_v16 = vsel %vm715_vm6, %v734_v62, %v735_v63  ;;  %v809_v46 = vshrl.u32 %v589_v29, 16 }
  0x63   : > { %1971 = vmatpush1.bf16.msra.mxu0 %v3715_v61  ;;  %1409 = vmatprep.subr.bf16.mxu1 %v3713_v60  ;;  %v3730_v60 = vld [vmem:[%s5187_s3 + $0x250] ss:$8 sps:$4 sm:$0xff]   ;;  %v820_v61 = vshrl.u32 %v645_v54, 16  ;;  %v956_v30 = vshrl.u32 %v736_v16, 16  ;;  %v959_v53 = vshll.u32 %v736_v16, 16  ;;  %v4343_v54 = vsel %vm471_vm4, %v780_v26, %v782_v21 }
  0x64   : > { %1972 = vmatprep.subr.bf16.mxu0 %v3726_v2  ;;  %v3752_v2 = vld [vmem:[%s5187_s3 + $0x150] ss:$8 sps:$4 sm:$0xff]   ;;  %v927_v10 = vrot.slane %v925_v58, 7  ;;  %v741_v21 = vrot.slane %v622_v6, 1  ;;  %v3749_v26 = vld [vmem:[%s5187_s3 + $0x20] ss:$8 sps:$4 sm:$0xff]  }
  0x65   : > { %v822_v14 = vrot.slane %v820_v61, 7  ;;  %v958_v52 = vrot.slane %v956_v30, 7  ;;  %v843_v30 = vrot.slane %v650_v8, 7 }
  0x66   : > { %1545 = vmatmul.mubr.bf16.gmra.mrb[4].mxu0 %v4225_v12  ;;  %1410 = vmatpush1.bf16.msra.mxu1 %v3718_v9  ;;  %v4302_v9 = vsel %vm471_vm4, %v892_v55, %v899_v57  ;;  %v930_v31 = vor.u32 %v928_v11, %v927_v10  ;;  %v3740_v57 = vld [vmem:[%s5187_s3] ss:$8 sps:$4 sm:$0xff]   ;;  %v591_v11 = vld [vmem:[#allocation2 + $0x48] sm:$0x80] }
  0x67   : > { %1554 = vmatprep.mubr.bf16.mxu0 %v3914_v56  ;;  %1411 = vmatprep.subr.bf16.mxu1 %v3719_v13  ;;  %v816_v13 = vshrl.u32 %v642_v49, 16  ;;  %v952_v49 = vshrl.u32 %v734_v62, 16  ;;  %v961_v10 = vor.u32 %v959_v53, %v958_v52  ;;  %v606_v52 = vld [vmem:[#allocation2 + $0x10] sm:$0x1] }
  0x68   : > { %1973 = vmatpush1.bf16.msra.mxu0 %v3724_v18  ;;  %v649_v18 = vrot.slane %v647_v7, 1  ;;  %v4346_v55 = vsel %vm471_vm4, %v923_v28, %v930_v31  ;;  %v840_v28 = vshrl.u32 %v591_v11, 16 }
  0x69   : > { %1974 = vmatprep.subr.bf16.mxu0 %v3735_v19  ;;  %v4310_v19 = vld [vmem:[#allocation2 + $0xb0] sm:$0xff]  ;;  %v954_v5 = vrot.slane %v952_v49, 7  ;;  %v4421_v49 = vld [vmem:[#allocation2 + $0x8] sm:$0xff] }
  0x6a   : > { %1412 = vmatpush1.bf16.msra.mxu1 %v3721_v24  ;;  %v4316_v23 = vor.u32 %v650_v8, %v649_v18  ;;  %v3761_v24 = vld [vmem:[%s5187_s3 + $0x160] ss:$8 sps:$4 sm:$0xff]   ;;  %v847_v58 = vshrl.u32 %v649_v18, 16  ;;  %v3751_v18 = vld [vmem:[%s5187_s3 + $0x24] ss:$8 sps:$4 sm:$0xff]   ;;  %v842_v53 = vrot.slane %v840_v28, 7 }
  0x6b   : > { %1413 = vmatprep.subr.bf16.mxu1 %v3722_v32  ;;  %v818_v32 = vrot.slane %v816_v13, 7  ;;  %v3770_v13 = vld [vmem:[%s5187_s3 + $0x170] ss:$8 sps:$4 sm:$0xff]   ;;  %v4399_v29 = vsel %vm471_vm4, %v954_v5, %v961_v10 }
  0x6c   : > { %1975 = vmatpush1.bf16.msra.mxu0 %v3733_v34  ;;  %v825_v34 = vor.u32 %v823_v15, %v822_v14  ;;  %v851_v40 = vshrl.u32 %v4316_v23, 16  ;;  %v854_v62 = vshll.u32 %v4316_v23, 16  ;;  %v661_v14 = vshll.u32 %v4237_v22, 16 }
  0x6d   : > { %1976 = vmatprep.subr.bf16.mxu0 %v3745_v36  ;;  %v737_v36 = vrot.slane %v4310_v19, 1  ;;  %v849_v33 = vrot.slane %v847_v58, 7 }
  0x6e   : > { %1555 = vmatmul.mubr.bf16.gmra.mrb[8].mxu0 %v4264_v44  ;;  %1414 = vmatpush1.bf16.msra.mxu1 %v3727_v39  ;;  %v3742_v39 = vld [vmem:[%s5187_s3 + $0x4] ss:$8 sps:$4 sm:$0xff]   ;;  %v853_v61 = vrot.slane %v851_v40, 7  ;;  %v4389_v23 = vrot.slane %v661_v14, 1 }
  0x6f   : > { %1564 = vmatprep.mubr.bf16.mxu0 %v3914_v56  ;;  %1415 = vmatprep.subr.bf16.mxu1 %v3728_v45  ;;  %v657_v45 = vshrl.u32 %v4218_v3, 16  ;;  %v739_v63 = vsel %vm715_vm6, %v737_v36, %v738_v42 }
  0x70   : > { %1977 = vmatpush1.bf16.msra.mxu0 %v3743_v48  ;;  %v812_v48 = vrot.slane %v643_v38, 7  ;;  %v856_v20 = vor.u32 %v854_v62, %v853_v61  ;;  %v990_v31 = vshll.u32 %v739_v63, 16  ;;  %v3760_v62 = vld [vmem:[%s5187_s3 + $0x44] ss:$8 sps:$4 sm:$0xff]  }
  0x71   : > { %1978 = vmatprep.subr.bf16.mxu0 %v3754_v59  ;;  %v4354_v38 = vor.u32 %v657_v45, %v4337_v43  ;;  %v3748_v59 = vld [vmem:[%s5187_s3 + $0x14] ss:$8 sps:$4 sm:$0xff]   ;;  %v874_v6 = vrot.slane %v657_v45, 7 }
  0x72   : > { %1416 = vmatpush1.bf16.msra.mxu1 %v3730_v60  ;;  %v4360_v60 = vsel %vm471_vm4, %v818_v32, %v825_v34  ;;  %v3781_v32 = vld [vmem:[%s5187_s3 + $0x304] ss:$8 sps:$4 sm:$0xff]   ;;  %v4412_v8 = vsel %vm471_vm4, %v849_v33, %v856_v20  ;;  %v909_v20 = vshrl.u32 %v4389_v23, 16 }
  0x73   : > { %1417 = vmatprep.subr.bf16.mxu1 %v3731_v0  ;;  %v4364_v0 = vld [vmem:[#allocation2 + $0xc8] sm:$0xff]  ;;  %v882_v15 = vshrl.u32 %v4354_v38, 16  ;;  %v885_v42 = vshll.u32 %v4354_v38, 16  ;;  %v593_v38 = vld [vmem:[#allocation2 + $0x60] sm:$0x80] }
  0x74   : > { %1979 = vmatpush1.bf16.msra.mxu0 %v3752_v2  ;;  %v811_v2 = vrot.slane %v809_v46, 7  ;;  %v740_v16 = vrot.slane %v4364_v0, 1  ;;  %v3757_v46 = vld [vmem:[%s5187_s3 + $0x34] ss:$8 sps:$4 sm:$0xff]   ;;  %v871_v5 = vshrl.u32 %v593_v38, 16 }
  0x75   : > { %1980 = vmatprep.subr.bf16.mxu0 %v3763_v25  ;;  %v884_v40 = vrot.slane %v882_v15, 7  ;;  %v3767_v38 = vld [vmem:[%s5187_s3 + $0x60] ss:$8 sps:$4 sm:$0xff]  }
  0x76   : > { %1565 = vmatmul.mubr.bf16.gmra.mrb[12].mxu0 %v4302_v9  ;;  %1418 = vmatpush1.bf16.msra.mxu1 %v3736_v4  ;;  %v813_v4 = vor.u32 %v812_v48, %v640_v37  ;;  %v987_v37 = vshrl.u32 %v739_v63, 16  ;;  %v1086_v10 = vshrl.u32 %v740_v16, 16 }
  0x77   : > { %1574 = vmatprep.mubr.bf16.mxu0 %v3914_v56  ;;  %1419 = vmatprep.subr.bf16.mxu1 %v3737_v41  ;;  %v3772_v41 = vld [vmem:[%s5187_s3 + $0x174] ss:$8 sps:$4 sm:$0xff]  }
  0x78   : > { %1981 = vmatpush1.bf16.msra.mxu0 %v3761_v24  ;;  %v664_v24 = vshrl.u32 %v4237_v22, 16  ;;  %v4393_v25 = vsel %vm471_vm4, %v811_v2, %v813_v4  ;;  %v989_v34 = vrot.slane %v987_v37, 7  ;;  %v717_v4 = vrot.slane %v606_v52, 1  ;;  %v3758_v37 = vld [vmem:[%s5187_s3 + $0x40] ss:$8 sps:$4 sm:$0xff]  }
  0x79   : > { %1982 = vmatprep.subr.bf16.mxu0 %v3772_v41  ;;  %v1088_v3 = vrot.slane %v1086_v10, 7 }
  0x7a   : > { %1420 = vmatpush1.bf16.msra.mxu1 %v3739_v27  ;;  %v983_v27 = vshrl.u32 %v737_v36, 16  ;;  %v742_v36 = vsel %vm715_vm6, %v740_v16, %v741_v21  ;;  %v666_v48 = vor.u32 %v664_v24, %v4389_v23  ;;  %v992_v61 = vor.u32 %v990_v31, %v989_v34  ;;  %v3766_v16 = vld [vmem:[%s5187_s3 + $0x54] ss:$8 sps:$4 sm:$0xff]   ;;  %v3764_v23 = vld [vmem:[%s5187_s3 + $0x50] ss:$8 sps:$4 sm:$0xff]  }
  0x7b   : > { %1855 = vmatprep.subr.bf16.mxu1 %v3742_v39  ;;  %v878_v39 = vshrl.u32 %v4337_v43, 16  ;;  %v3755_v43 = vld [vmem:[%s5187_s3 + $0x30] ss:$8 sps:$4 sm:$0xff]   ;;  %v1090_v2 = vshrl.u32 %v742_v36, 16  ;;  %v595_v31 = vld [vmem:[#allocation2 + $0x78] sm:$0x80] }
  0x7c   : > { %1983 = vmatpush1.bf16.msra.mxu0 %v3770_v13  ;;  %v985_v58 = vrot.slane %v983_v27, 7  ;;  %v913_v50 = vshrl.u32 %v666_v48, 16  ;;  %v671_v13 = vshrl.u32 %v4275_v51, 16  ;;  %v875_v27 = vor.u32 %v874_v6, %v654_v17 }
  0x7d   : > { %1422 = vmatmul.mubr.bf16.vlgmr.msra.gmra.mrb[0].mxu1 %v4343_v54  ;;  %2404 = vmatprep.subr.bf16.mxu0 %v3781_v32  ;;  %v880_v63 = vrot.slane %v878_v39, 7  ;;  %v1092_v15 = vrot.slane %v1090_v2, 7  ;;  %v675_v34 = vshll.u32 %v4310_v19, 16  ;;  %v682_v6 = vshll.u32 %v4364_v0, 16 }
  0x7e   : > { %1575 = vmatmul.mubr.bf16.gmra.mrb[16].mxu0 %v4346_v55  ;;  %1856 = vmatpush1.bf16.msra.mxu1 %v3740_v57  ;;  %v844_v57 = vor.u32 %v843_v30, %v647_v7  ;;  %v716_v7 = vrot.slane %v4421_v49, 1  ;;  %v4445_v33 = vsel %vm471_vm4, %v985_v58, %v992_v61  ;;  %v915_v21 = vrot.slane %v913_v50, 7  ;;  %v3773_v50 = vld [vmem:[%s5187_s3 + $0x70] ss:$8 sps:$4 sm:$0xff]  }
  0x7f   : > { %1431 = vmatprep.mubr.bf16.mxu1 %v4360_v60  ;;  %1857 = vmatprep.subr.bf16.mxu1 %v3748_v59  ;;  %v668_v59 = vshll.u32 %v4275_v51, 16  ;;  %v873_v30 = vrot.slane %v871_v5, 7  ;;  %v4518_v22 = vrot.slane %v682_v6, 1  ;;  %v3788_v51 = vld [vmem:[%s5187_s3 + $0xa0] ss:$8 sps:$4 sm:$0xff]  }
  0x80   : > { %1584 = vmatprep.mubr.bf16.mxu0 %v3914_v56  ;;  %v4437_v41 = vsel %vm471_vm4, %v842_v53, %v844_v57  ;;  %v718_v28 = vsel %vm715_vm6, %v716_v7, %v717_v4  ;;  %v4481_v53 = vrot.slane %v675_v34, 1  ;;  %v678_v57 = vshrl.u32 %v4310_v19, 16  ;;  %v3800_v19 = vld [vmem:[%s5187_s3 + $0xc0] ss:$8 sps:$4 sm:$0xff]  }
  0x81   : > { %v4441_v11 = vrot.slane %v668_v59, 1  ;;  %v770_v39 = vshrl.u32 %v718_v28, 16  ;;  %v766_v61 = vshrl.u32 %v716_v7, 16 }
  0x82   : > { %1858 = vmatpush1.bf16.msra.mxu1 %v3746_v1  ;;  %v887_v1 = vor.u32 %v885_v42, %v884_v40  ;;  %v3769_v40 = vld [vmem:[%s5187_s3 + $0x64] ss:$8 sps:$4 sm:$0xff]   ;;  %v911_v42 = vrot.slane %v909_v20, 7  ;;  %v680_v5 = vor.u32 %v678_v57, %v4481_v53  ;;  %v3776_v20 = vld [vmem:[%s5187_s3 + $0x80] ss:$8 sps:$4 sm:$0xff]  }
  0x83   : > { %1859 = vmatprep.subr.bf16.mxu1 %v3751_v18  ;;  %v1093_v18 = vshll.u32 %v742_v36, 16  ;;  %v673_v32 = vor.u32 %v671_v13, %v4441_v11  ;;  %v4475_v36 = vsel %vm471_vm4, %v873_v30, %v875_v27  ;;  %v940_v2 = vshrl.u32 %v4441_v11, 16 }
  0x84   : > { %v4451_v45 = vsel %vm471_vm4, %v880_v63, %v887_v1  ;;  %v773_v63 = vshll.u32 %v718_v28, 16  ;;  %v975_v28 = vshrl.u32 %v680_v5, 16 }
  0x85   : > { %1432 = vmatmul.mubr.bf16.gmra.mrb[4].mxu1 %v4393_v25  ;;  %v1095_v17 = vor.u32 %v1093_v18, %v1092_v15  ;;  %v944_v52 = vshrl.u32 %v673_v32, 16  ;;  %v947_v4 = vshll.u32 %v673_v32, 16  ;;  %v768_v15 = vrot.slane %v766_v61, 7  ;;  %v3790_v61 = vld [vmem:[%s5187_s3 + $0xa4] ss:$8 sps:$4 sm:$0xff]  }
  0x86   : > { %1585 = vmatmul.mubr.bf16.gmra.mrb[20].mxu0 %v4399_v29  ;;  %1860 = vmatpush1.bf16.msra.mxu1 %v3749_v26  ;;  %v916_v26 = vshll.u32 %v666_v48, 16  ;;  %v902_v48 = vshrl.u32 %v595_v31, 16  ;;  %v3779_v31 = vld [vmem:[%s5187_s3 + $0x300] ss:$8 sps:$4 sm:$0xff]  }
  0x87   : > { %1441 = vmatprep.mubr.bf16.mxu1 %v4412_v8  ;;  %1861 = vmatprep.subr.bf16.mxu1 %v3757_v46  ;;  %v4485_v58 = vsel %vm471_vm4, %v1088_v3, %v1095_v17  ;;  %v946_v7 = vrot.slane %v944_v52, 7  ;;  %v3784_v3 = vld [vmem:[%s5187_s3 + $0x94] ss:$8 sps:$4 sm:$0xff]   ;;  %v3785_v52 = vld [vmem:[%s5187_s3 + $0x310] ss:$8 sps:$4 sm:$0xff]  }
  0x88   : > { %1594 = vmatprep.mubr.bf16.mxu0 %v3914_v56  ;;  %v918_v46 = vor.u32 %v916_v26, %v915_v21  ;;  %v904_v10 = vrot.slane %v902_v48, 7  ;;  %v942_v21 = vrot.slane %v940_v2, 7  ;;  %v3787_v17 = vld [vmem:[%s5187_s3 + $0x314] ss:$8 sps:$4 sm:$0xff]  }
  0x89   : > { %v949_v26 = vor.u32 %v947_v4, %v946_v7  ;;  %v629_v7 = vshrl.u32 %v4421_v49, 16 }
  0x8a   : > { %1862 = vmatpush1.bf16.msra.mxu1 %v3755_v43  ;;  %v905_v43 = vrot.slane %v664_v24, 7  ;;  %v3775_v24 = vld [vmem:[%s5187_s3 + $0x74] ss:$8 sps:$4 sm:$0xff]   ;;  %v4494_v1 = vsel %vm471_vm4, %v911_v42, %v918_v46  ;;  %v3782_v42 = vld [vmem:[%s5187_s3 + $0x90] ss:$8 sps:$4 sm:$0xff]   ;;  %v977_v46 = vrot.slane %v975_v28, 7 }
  0x8b   : > { %1863 = vmatprep.subr.bf16.mxu1 %v3760_v62  ;;  %v772_v62 = vrot.slane %v770_v39, 7  ;;  %v971_v39 = vshrl.u32 %v4481_v53, 16  ;;  %v3797_v28 = vld [vmem:[%s5187_s3 + $0x330] ss:$8 sps:$4 sm:$0xff]  }
  0x8c   : > { %v906_v11 = vor.u32 %v905_v43, %v661_v14  ;;  %v685_v14 = vshrl.u32 %v4364_v0, 16  ;;  %v626_v43 = vshll.u32 %v4421_v49, 16  ;;  %v3824_v49 = vld [vmem:[%s5187_s3 + $0x380] ss:$8 sps:$4 sm:$0xff]  }
  0x8d   : > { %1442 = vmatmul.mubr.bf16.gmra.mrb[8].mxu1 %v4437_v41  ;;  %v775_v18 = vor.u32 %v773_v63, %v772_v62  ;;  %v3793_v62 = vld [vmem:[%s5187_s3 + $0x324] ss:$8 sps:$4 sm:$0xff]  }
  0x8e   : > { %1595 = vmatmul.mubr.bf16.gmra.mrb[24].mxu0 %v4445_v33  ;;  %1864 = vmatpush1.bf16.msra.mxu1 %v3758_v37  ;;  %v3778_v37 = vld [vmem:[%s5187_s3 + $0x84] ss:$8 sps:$4 sm:$0xff]   ;;  %v4522_v30 = vsel %vm471_vm4, %v904_v10, %v906_v11  ;;  %v687_v48 = vor.u32 %v685_v14, %v4518_v22  ;;  %v967_v11 = vrot.slane %v678_v57, 7  ;;  %v3794_v57 = vld [vmem:[%s5187_s3 + $0xb0] ss:$8 sps:$4 sm:$0xff]  }
  0x8f   : > { %1451 = vmatprep.mubr.bf16.mxu1 %v4451_v45  ;;  %1865 = vmatprep.subr.bf16.mxu1 %v3766_v16  ;;  %v597_v16 = vld [vmem:[#allocation2 + $0x90] sm:$0x80]  ;;  %v776_v27 = vsel %vm471_vm4, %v768_v15, %v775_v18  ;;  %v599_v63 = vld [vmem:[#allocation2 + $0xa8] sm:$0x80]  ;;  %v1074_v18 = vshrl.u32 %v4518_v22, 16 }
  0x90   : > { %1604 = vmatprep.mubr.bf16.mxu0 %v3914_v56  ;;  %v933_v32 = vshrl.u32 %v597_v16, 16  ;;  %v1078_v2 = vshrl.u32 %v687_v48, 16  ;;  %v964_v10 = vshrl.u32 %v599_v63, 16  ;;  %v3799_v15 = vld [vmem:[%s5187_s3 + $0x334] ss:$8 sps:$4 sm:$0xff]   ;;  %v968_v22 = vor.u32 %v967_v11, %v675_v34 }
  0x91   : > { %v1076_v34 = vrot.slane %v1074_v18, 7  ;;  %v3823_v18 = vld [vmem:[%s5187_s3 + $0x374] ss:$8 sps:$4 sm:$0xff]  }
  0x92   : > { %1866 = vmatpush1.bf16.msra.mxu1 %v3764_v23  ;;  %v936_v23 = vrot.slane %v671_v13, 7  ;;  %v4542_v13 = vsel %vm471_vm4, %v942_v21, %v949_v26  ;;  %v935_v53 = vrot.slane %v933_v32, 7  ;;  %v1081_v21 = vshll.u32 %v687_v48, 16  ;;  %v601_v32 = vld [vmem:[#allocation2 + $0xc0] sm:$0x80] }
  0x93   : > { %1867 = vmatprep.subr.bf16.mxu1 %v3769_v40  ;;  %v978_v40 = vshll.u32 %v680_v5, 16  ;;  %v3791_v5 = vld [vmem:[%s5187_s3 + $0x320] ss:$8 sps:$4 sm:$0xff]   ;;  %v3811_v48 = vld [vmem:[%s5187_s3 + $0x354] ss:$8 sps:$4 sm:$0xff]  }
  0x95   : > { %1452 = vmatmul.mubr.bf16.gmra.mrb[12].mxu1 %v4475_v36 }
  0x96   : > { %1605 = vmatmul.mubr.bf16.gmra.mrb[28].mxu0 %v4485_v58  ;;  %1868 = vmatpush1.bf16.msra.mxu1 %v3767_v38  ;;  %v937_v38 = vor.u32 %v936_v23, %v668_v59  ;;  %v973_v59 = vrot.slane %v971_v39, 7  ;;  %v3803_v39 = vld [vmem:[%s5187_s3 + $0x340] ss:$8 sps:$4 sm:$0xff]  }
  0x97   : > { %1461 = vmatprep.mubr.bf16.mxu1 %v4494_v1  ;;  %1869 = vmatprep.subr.bf16.mxu1 %v3775_v24  ;;  %v980_v24 = vor.u32 %v978_v40, %v977_v46  ;;  %v1067_v40 = vshrl.u32 %v601_v32, 16  ;;  %v3808_v46 = vld [vmem:[%s5187_s3 + $0xd4] ss:$8 sps:$4 sm:$0xff]   ;;  %v3827_v32 = vld [vmem:[%s5187_s3 + $0x390] ss:$8 sps:$4 sm:$0xff]  }
  0x98   : > { %2000 = vmatprep.mubr.bf16.mxu0 %v3914_v56  ;;  %v4570_v4 = vsel %vm471_vm4, %v935_v53, %v937_v38 }
  0x99   : > { %v4590_v16 = vsel %vm471_vm4, %v973_v59, %v980_v24  ;;  %v1069_v63 = vrot.slane %v1067_v40, 7  ;;  %v3814_v59 = vld [vmem:[%s5187_s3 + $0xe4] ss:$8 sps:$4 sm:$0xff]   ;;  %v3833_v40 = vld [vmem:[%s5187_s3 + $0x3b0] ss:$8 sps:$4 sm:$0xff]  }
  0x9a   : > { %1870 = vmatpush1.bf16.msra.mxu1 %v3773_v50  ;;  %v4566_v50 = vrot.slane %v626_v43, 1  ;;  %v3817_v24 = vld [vmem:[%s5187_s3 + $0x364] ss:$8 sps:$4 sm:$0xff]  }
  0x9b   : > { %1871 = vmatprep.subr.bf16.mxu1 %v3778_v37  ;;  %v3796_v37 = vld [vmem:[%s5187_s3 + $0xb4] ss:$8 sps:$4 sm:$0xff]  }
  0x9c   : > { %v631_v26 = vor.u32 %v629_v7, %v4566_v50  ;;  %v754_v53 = vshrl.u32 %v4566_v50, 16 }
  0x9d   : > { %1462 = vmatmul.mubr.bf16.gmra.mrb[16].mxu1 %v4522_v30 }
  0x9e   : > { %2001 = vmatmul.mubr.bf16.vlgmr.msra.gmra.mrb[32].mxu0 %v776_v27  ;;  %1872 = vmatpush1.bf16.msra.mxu1 %v3776_v20  ;;  %v1080_v20 = vrot.slane %v1078_v2, 7  ;;  %v3802_v27 = vld [vmem:[%s5187_s3 + $0xc4] ss:$8 sps:$4 sm:$0xff]   ;;  %v761_v38 = vshll.u32 %v631_v26, 16  ;;  %v756_v50 = vrot.slane %v754_v53, 7 }
  0x9f   : > { %2405 = vmatpush1.bf16.msra.mxu0 %v3779_v31  ;;  %1873 = vmatprep.subr.bf16.mxu1 %v3784_v3  ;;  %v3805_v31 = vld [vmem:[%s5187_s3 + $0x344] ss:$8 sps:$4 sm:$0xff]   ;;  %v758_v3 = vshrl.u32 %v631_v26, 16  ;;  %v3857_v53 = vld [vmem:[%s5187_s3 + $0x430] ss:$8 sps:$4 sm:$0xff]  }
  0xa0   : > { %2406 = vmatprep.subr.bf16.mxu0 %v3787_v17  ;;  %1471 = vmatprep.mubr.bf16.mxu1 %v4542_v13  ;;  %v1083_v23 = vor.u32 %v1081_v21, %v1080_v20  ;;  %v585_v2 = vld [vmem:[#allocation2] sm:$0x80]  ;;  %v3821_v20 = vld [vmem:[%s5187_s3 + $0x370] ss:$8 sps:$4 sm:$0xff]  }
  0xa1   : > { %2010 = vmatprep.mubr.bf16.mxu0 %v3914_v56  ;;  %v747_v11 = vshrl.u32 %v585_v2, 16  ;;  %v3848_v2 = vld [vmem:[%s5187_s3 + $0x3f0] ss:$8 sps:$4 sm:$0xff]  }
  0xa2   : > { %1874 = vmatpush1.bf16.msra.mxu1 %v3782_v42  ;;  %v1070_v42 = vrot.slane %v685_v14, 7  ;;  %v760_v14 = vrot.slane %v758_v3, 7  ;;  %v3856_v3 = vld [vmem:[%s5187_s3 + $0x424] ss:$8 sps:$4 sm:$0xff]  }
  0xa3   : > { %2407 = vmatpush1.bf16.msra.mxu0 %v3785_v52  ;;  %1875 = vmatprep.subr.bf16.mxu1 %v3790_v61  ;;  %v4628_v52 = vsel %vm471_vm4, %v1076_v34, %v1083_v23  ;;  %v3806_v61 = vld [vmem:[%s5187_s3 + $0xd0] ss:$8 sps:$4 sm:$0xff]   ;;  %v749_v21 = vrot.slane %v747_v11, 7  ;;  %v3835_v23 = vld [vmem:[%s5187_s3 + $0x3b4] ss:$8 sps:$4 sm:$0xff]  }
  0xa4   : > { %2408 = vmatprep.subr.bf16.mxu0 %v3793_v62  ;;  %v3809_v62 = vld [vmem:[%s5187_s3 + $0x350] ss:$8 sps:$4 sm:$0xff]  }
  0xa5   : > { %1472 = vmatmul.mubr.bf16.gmra.mrb[20].mxu1 %v4570_v4  ;;  %v4715_v34 = vld [vmem:[%s5187_s3 + $0x410] ss:$8 sps:$4 sm:$0xff]  }
  0xa6   : > { %2011 = vmatmul.mubr.bf16.gmra.mrb[36].mxu0 %v4190_v47  ;;  %1876 = vmatpush1.bf16.msra.mxu1 %v3788_v51  ;;  %v966_v47 = vrot.slane %v964_v10, 7  ;;  %v1071_v51 = vor.u32 %v1070_v42, %v682_v6  ;;  %v3812_v6 = vld [vmem:[%s5187_s3 + $0xe0] ss:$8 sps:$4 sm:$0xff]   ;;  %v3859_v42 = vld [vmem:[%s5187_s3 + $0x434] ss:$8 sps:$4 sm:$0xff]  }
  0xa7   : > { %2409 = vmatpush1.bf16.msra.mxu0 %v3791_v5  ;;  %1877 = vmatprep.subr.bf16.mxu1 %v3796_v37  ;;  %v763_v5 = vor.u32 %v761_v38, %v760_v14  ;;  %v3815_v10 = vld [vmem:[%s5187_s3 + $0x360] ss:$8 sps:$4 sm:$0xff]   ;;  %v750_v37 = vrot.slane %v629_v7, 7  ;;  %v3818_v7 = vld [vmem:[%s5187_s3 + $0xf0] ss:$8 sps:$4 sm:$0xff]  }
  0xa8   : > { %2410 = vmatprep.subr.bf16.mxu0 %v3799_v15  ;;  %1481 = vmatprep.mubr.bf16.mxu1 %v4590_v16  ;;  %v4612_v17 = vsel %vm471_vm4, %v966_v47, %v968_v22  ;;  %v4648_v0 = vsel %vm471_vm4, %v1069_v63, %v1071_v51  ;;  %v3820_v15 = vld [vmem:[%s5187_s3 + $0xf4] ss:$8 sps:$4 sm:$0xff]   ;;  %v4681_v47 = vld [vmem:[%s5187_s3 + $0x404] ss:$8 sps:$4 sm:$0xff]   ;;  %v3839_v38 = vld [vmem:[%s5187_s3 + $0x3d0] ss:$8 sps:$4 sm:$0xff]  }
  0xa9   : > { %2020 = vmatprep.mubr.bf16.mxu0 %v3914_v56  ;;  %v751_v26 = vor.u32 %v750_v37, %v626_v43  ;;  %v3829_v43 = vld [vmem:[%s5187_s3 + $0x394] ss:$8 sps:$4 sm:$0xff]   ;;  %v3862_v14 = vld [vmem:[%s5187_s3 + $0x444] ss:$8 sps:$4 sm:$0xff]   ;;  %v3842_v63 = vld [vmem:[%s5187_s3 + $0x3e0] ss:$8 sps:$4 sm:$0xff]  }
  0xaa   : > { %1878 = vmatpush1.bf16.msra.mxu1 %v3794_v57  ;;  %v764_v57 = vsel %vm471_vm4, %v756_v50, %v763_v5  ;;  %v3850_v51 = vld [vmem:[%s5187_s3 + $0x3f4] ss:$8 sps:$4 sm:$0xff]   ;;  %v3868_v50 = vld [vmem:[%s5187_s3 + $0x464] ss:$8 sps:$4 sm:$0xff]   ;;  %v3866_v5 = vld [vmem:[%s5187_s3 + $0x460] ss:$8 sps:$4 sm:$0xff]  }
  0xab   : > { %2411 = vmatpush1.bf16.msra.mxu0 %v3797_v28  ;;  %1879 = vmatprep.subr.bf16.mxu1 %v3802_v27  ;;  %v3826_v28 = vld [vmem:[%s5187_s3 + $0x384] ss:$8 sps:$4 sm:$0xff]   ;;  %v752_v22 = vsel %vm471_vm4, %v749_v21, %v751_v26  ;;  %v4695_v27 = vld [vmem:[%s5187_s3 + $0x400] ss:$8 sps:$4 sm:$0xff]   ;;  %v603_v37 = vld [vmem:[#allocation2 + $0xd8] sm:$0x80] }
  0xac   : > { %2412 = vmatprep.subr.bf16.mxu0 %v3805_v31  ;;  %v4701_v31 = vld [vmem:[%s5187_s3 + $0x414] ss:$8 sps:$4 sm:$0xff]  }
  0xad   : > { %1482 = vmatmul.mubr.bf16.gmra.mrb[24].mxu1 %v4612_v17 }
  0xae   : > { %2021 = vmatmul.mubr.bf16.gmra.mrb[40].mxu0 %v4225_v12  ;;  %1880 = vmatpush1.bf16.msra.mxu1 %v3800_v19  ;;  %v3832_v19 = vld [vmem:[%s5187_s3 + $0x3a4] ss:$8 sps:$4 sm:$0xff]  }
  0xaf   : > { %2413 = vmatpush1.bf16.msra.mxu0 %v3803_v39  ;;  %1881 = vmatprep.subr.bf16.mxu1 %v3808_v46  ;;  %v4733_v39 = vld [vmem:[%s5187_s3 + $0x420] ss:$8 sps:$4 sm:$0xff]  }
  0xb0   : > { %2414 = vmatprep.subr.bf16.mxu0 %v3811_v48  ;;  %1491 = vmatprep.mubr.bf16.mxu1 %v4628_v52  ;;  %v3836_v46 = vld [vmem:[%s5187_s3 + $0x3c0] ss:$8 sps:$4 sm:$0xff]   ;;  %v3841_v48 = vld [vmem:[%s5187_s3 + $0x3d4] ss:$8 sps:$4 sm:$0xff]  }
  0xb1   : > { %2030 = vmatprep.mubr.bf16.mxu0 %v3914_v56 }
  0xb2   : > { %1882 = vmatpush1.bf16.msra.mxu1 %v3806_v61  ;;  %v3844_v61 = vld [vmem:[%s5187_s3 + $0x3e4] ss:$8 sps:$4 sm:$0xff]  }
  0xb3   : > { %2415 = vmatpush1.bf16.msra.mxu0 %v3809_v62  ;;  %1883 = vmatprep.subr.bf16.mxu1 %v3814_v59  ;;  %v3860_v62 = vld [vmem:[%s5187_s3 + $0x440] ss:$8 sps:$4 sm:$0xff]   ;;  %v3865_v59 = vld [vmem:[%s5187_s3 + $0x454] ss:$8 sps:$4 sm:$0xff]  }
  0xb4   : > { %2416 = vmatprep.subr.bf16.mxu0 %v3817_v24  ;;  %v3863_v24 = vld [vmem:[%s5187_s3 + $0x450] ss:$8 sps:$4 sm:$0xff]  }
  0xb5   : > { %1492 = vmatmul.mubr.bf16.gmra.mrb[28].mxu1 %v4648_v0 }
  0xb6   : > { %2031 = vmatmul.mubr.bf16.gmra.mrb[44].mxu0 %v4264_v44  ;;  %1884 = vmatpush1.bf16.msra.mxu1 %v3812_v6  ;;  %v3871_v6 = vld [vmem:[%s5187_s3 + $0x474] ss:$8 sps:$4 sm:$0xff]  }
  0xb7   : > { %2417 = vmatpush1.bf16.msra.mxu0 %v3815_v10  ;;  %1885 = vmatprep.subr.bf16.mxu1 %v3820_v15 }
  0xb8   : > { %2418 = vmatprep.subr.bf16.mxu0 %v3823_v18  ;;  %1887 = vmatprep.mubr.bf16.mxu1 %v764_v57  ;;  %v624_v18 = vld [vmem:[#allocation2 + $0xe8] sm:$0x1] }
  0xb9   : > { %2040 = vmatprep.mubr.bf16.mxu0 %v3914_v56  ;;  %v744_v57 = vrot.slane %v624_v18, 1 }
  0xba   : > { %1886 = vmatpush1.bf16.msra.mxu1 %v3818_v7 }
  0xbb   : > { %2419 = vmatpush1.bf16.msra.mxu0 %v3821_v20  ;;  %3427 = vmatprep.subr.bf16.mxu1 %v4681_v47 }
  0xbc   : > { %2420 = vmatprep.subr.bf16.mxu0 %v3826_v28 }
  0xbd   : > { %1888 = vmatmul.mubr.bf16.vlgmr.msra.gmra.mrb[32].mxu1 %v752_v22 }
  0xbe   : > { %2041 = vmatmul.mubr.bf16.gmra.mrb[48].mxu0 %v4302_v9  ;;  %1897 = vmatprep.mubr.bf16.mxu1 %v4252_v35  ;;  %v3830_v35 = vld [vmem:[%s5187_s3 + $0x3a0] ss:$8 sps:$4 sm:$0xff]  }
  0xbf   : > { %2421 = vmatpush1.bf16.msra.mxu0 %v3824_v49  ;;  %2050 = vmatprep.mubr.bf16.mxu0 %v3914_v56 }
  0xc0   : > { %2422 = vmatprep.subr.bf16.mxu0 %v3829_v43  ;;  %3435 = vmatpush1.bf16.msra.mxu1 %v4695_v27 }
  0xc1   : > { %3428 = vmatprep.subr.bf16.mxu1 %v4701_v31 }
  0xc3   : > { %2423 = vmatpush1.bf16.msra.mxu0 %v3827_v32 }
  0xc4   : > { %2424 = vmatprep.subr.bf16.mxu0 %v3832_v19  ;;  %3436 = vmatpush1.bf16.msra.mxu1 %v4715_v34 }
  0xc5   : > { %1898 = vmatmul.mubr.bf16.gmra.mrb[36].mxu1 %v4343_v54  ;;  %v3838_v54 = vld [vmem:[%s5187_s3 + $0x3c4] ss:$8 sps:$4 sm:$0xff]   ;;  %3429 = vmatprep.subr.bf16.mxu1 %v3856_v3 }
  0xc6   : > { %2051 = vmatmul.mubr.bf16.gmra.mrb[52].mxu0 %v4346_v55  ;;  %1907 = vmatprep.mubr.bf16.mxu1 %v4360_v60 }
  0xc7   : > { %2425 = vmatpush1.bf16.msra.mxu0 %v3830_v35  ;;  %2060 = vmatprep.mubr.bf16.mxu0 %v3914_v56 }
  0xc8   : > { %2426 = vmatprep.subr.bf16.mxu0 %v3835_v23  ;;  %3437 = vmatpush1.bf16.msra.mxu1 %v4733_v39 }
  0xc9   : > { %3430 = vmatprep.subr.bf16.mxu1 %v3859_v42 }
  0xcb   : > { %2427 = vmatpush1.bf16.msra.mxu0 %v3833_v40 }
  0xcc   : > { %2428 = vmatprep.subr.bf16.mxu0 %v3838_v54  ;;  %3438 = vmatpush1.bf16.msra.mxu1 %v3857_v53 }
  0xcd   : > { %1908 = vmatmul.mubr.bf16.gmra.mrb[40].mxu1 %v4393_v25  ;;  %3431 = vmatprep.subr.bf16.mxu1 %v3862_v14 }
  0xce   : > { %2061 = vmatmul.mubr.bf16.gmra.mrb[56].mxu0 %v4399_v29  ;;  %1917 = vmatprep.mubr.bf16.mxu1 %v4412_v8 }
  0xcf   : > { %2429 = vmatpush1.bf16.msra.mxu0 %v3836_v46  ;;  %2070 = vmatprep.mubr.bf16.mxu0 %v3914_v56 }
  0xd0   : > { %2430 = vmatprep.subr.bf16.mxu0 %v3841_v48  ;;  %3439 = vmatpush1.bf16.msra.mxu1 %v3860_v62 }
  0xd1   : > { %3432 = vmatprep.subr.bf16.mxu1 %v3865_v59 }
  0xd3   : > { %2431 = vmatpush1.bf16.msra.mxu0 %v3839_v38 }
  0xd4   : > { %2432 = vmatprep.subr.bf16.mxu0 %v3844_v61  ;;  %3440 = vmatpush1.bf16.msra.mxu1 %v3863_v24 }
  0xd5   : > { %1918 = vmatmul.mubr.bf16.gmra.mrb[44].mxu1 %v4437_v41  ;;  %3433 = vmatprep.subr.bf16.mxu1 %v3868_v50 }
  0xd6   : > { %2071 = vmatmul.mubr.bf16.gmra.mrb[60].mxu0 %v4445_v33  ;;  %1927 = vmatprep.mubr.bf16.mxu1 %v4451_v45 }
  0xd7   : > { %2433 = vmatpush1.bf16.msra.mxu0 %v3842_v63  ;;  %2436 = vmatprep.mubr.bf16.mxu0 %v4360_v60  ;;  %v3869_v60 = vld [vmem:[%s5187_s3 + $0x470] ss:$8 sps:$4 sm:$0xff]  }
  0xd8   : > { %2434 = vmatprep.subr.bf16.mxu0 %v3850_v51  ;;  %3441 = vmatpush1.bf16.msra.mxu1 %v3866_v5 }
  0xd9   : > { %3434 = vmatprep.subr.bf16.mxu1 %v3871_v6 }
  0xdb   : > { %2435 = vmatpush1.bf16.msra.mxu0 %v3848_v2 }
  0xdc   : > { %2517 = vmatprep.subr.bf16.mxu0 %v4681_v47  ;;  %3442 = vmatpush1.bf16.msra.mxu1 %v3869_v60 }
  0xdd   : > { %1928 = vmatmul.mubr.bf16.gmra.mrb[48].mxu1 %v4475_v36 }
  0xde   : > { %2437 = vmatmul.mubr.bf16.vlgmr.msra.gmra.mrb[32].mxu0 %v4393_v25  ;;  %1937 = vmatprep.mubr.bf16.mxu1 %v4494_v1  ;;  %v604_v25 = vld [vmem:[#allocation2 + $0xe0] sm:$0xff] }
  0xdf   : > { %2518 = vmatpush1.bf16.msra.mxu0 %v4695_v27  ;;  %2446 = vmatprep.mubr.bf16.mxu0 %v4412_v8  ;;  %v689_v8 = vshll.u32 %v604_v25, 16 }
  0xe0   : > { %2519 = vmatprep.subr.bf16.mxu0 %v4701_v31 }
  0xe3   : > { %2520 = vmatpush1.bf16.msra.mxu0 %v4715_v34 }
  0xe4   : > { %2521 = vmatprep.subr.bf16.mxu0 %v3856_v3 }
  0xe5   : > { %1938 = vmatmul.mubr.bf16.gmra.mrb[52].mxu1 %v4522_v30 }
  0xe6   : > { %2447 = vmatmul.mubr.bf16.gmra.mrb[36].mxu0 %v4437_v41  ;;  %1947 = vmatprep.mubr.bf16.mxu1 %v4542_v13  ;;  %v691_v41 = vrot.slane %v689_v8, 1 }
  0xe7   : > { %2456 = vmatprep.mubr.bf16.mxu0 %v4451_v45  ;;  %2522 = vmatpush1.bf16.msra.mxu0 %v4733_v39  ;;  %v692_v45 = vshrl.u32 %v604_v25, 16 }
  0xe8   : > { %2523 = vmatprep.subr.bf16.mxu0 %v3859_v42 }
  0xe9   : > { %v2085_v15 = vrot.slane %v692_v45, 7 }
  0xeb   : > { %2524 = vmatpush1.bf16.msra.mxu0 %v3857_v53 }
  0xec   : > { %2525 = vmatprep.subr.bf16.mxu0 %v3862_v14 }
  0xed   : > { %1948 = vmatmul.mubr.bf16.gmra.mrb[56].mxu1 %v4570_v4 }
  0xee   : > { %2457 = vmatmul.mubr.bf16.gmra.mrb[40].mxu0 %v4475_v36  ;;  %1957 = vmatprep.mubr.bf16.mxu1 %v4590_v16  ;;  %v694_v36 = vor.u32 %v692_v45, %v691_v41 }
  0xef   : > { %2466 = vmatprep.mubr.bf16.mxu0 %v4494_v1  ;;  %2526 = vmatpush1.bf16.msra.mxu0 %v3860_v62 }
  0xf0   : > { %2527 = vmatprep.subr.bf16.mxu0 %v3865_v59  ;;  %v2093_v1 = vshrl.u32 %v694_v36, 16 }
  0xf2   : > { %v2095_v10 = vrot.slane %v2093_v1, 7 }
  0xf3   : > { %2528 = vmatpush1.bf16.msra.mxu0 %v3863_v24 }
  0xf4   : > { %2529 = vmatprep.subr.bf16.mxu0 %v3868_v50 }
  0xf5   : > { %1958 = vmatmul.mubr.bf16.gmra.mrb[60].mxu1 %v4612_v17 }
  0xf6   : > { %2467 = vmatmul.mubr.bf16.gmra.mrb[44].mxu0 %v4522_v30  ;;  %2569 = vmatprep.mubr.bf16.mxu1 %v3914_v56  ;;  %v2089_v30 = vshrl.u32 %v691_v41, 16 }
  0xf7   : > { %2476 = vmatprep.mubr.bf16.mxu0 %v4542_v13  ;;  %2530 = vmatpush1.bf16.msra.mxu0 %v3866_v5  ;;  %v2096_v13 = vshll.u32 %v694_v36, 16 }
  0xf8   : > { %2531 = vmatprep.subr.bf16.mxu0 %v3871_v6  ;;  %v2091_v11 = vrot.slane %v2089_v30, 7 }
  0xfb   : > { %2532 = vmatpush1.bf16.msra.mxu0 %v3869_v60 }
  0xfd   : > { %2570 = vmatmul.mubr.bf16.vlgmr.msra.gmra.mrb[64].mxu1 %v4302_v9  ;;  %v2082_v9 = vshrl.u32 %v603_v37, 16 }
  0xfe   : > { %2477 = vmatmul.mubr.bf16.gmra.mrb[48].mxu0 %v4570_v4  ;;  %2579 = vmatprep.mubr.bf16.mxu1 %v3914_v56  ;;  %v2098_v4 = vor.u32 %v2096_v13, %v2095_v10 }
  0xff   : > { %2486 = vmatprep.mubr.bf16.mxu0 %v4590_v16 }
 0x100   : > { %v2099_v16 = vsel %vm471_vm4, %v2091_v11, %v2098_v4 }
 0x105   : > { %2580 = vmatmul.mubr.bf16.gmra.mrb[68].mxu1 %v4346_v55  ;;  %v2084_v55 = vrot.slane %v2082_v9, 7 }
 0x106   : > { %2487 = vmatmul.mubr.bf16.gmra.mrb[52].mxu0 %v4612_v17  ;;  %2589 = vmatprep.mubr.bf16.mxu1 %v3914_v56  ;;  %v2086_v17 = vor.u32 %v2085_v15, %v689_v8 }
 0x107   : > { %2496 = vmatprep.mubr.bf16.mxu0 %v4628_v52  ;;  %v743_v52 = vrot.slane %v604_v25, 1 }
 0x108   : > { %v2087_v7 = vsel %vm471_vm4, %v2084_v55, %v2086_v17 }
 0x109   : > { %v745_v20 = vsel %vm715_vm6, %v743_v52, %v744_v57 }
 0x10a   : > { %v2108_v26 = vshll.u32 %v745_v20, 16 }
 0x10d   : > { %2590 = vmatmul.mubr.bf16.gmra.mrb[72].mxu1 %v4399_v29  ;;  %v2101_v29 = vshrl.u32 %v743_v52, 16 }
 0x10e   : > { %2497 = vmatmul.mubr.bf16.gmra.mrb[56].mxu0 %v4648_v0  ;;  %2599 = vmatprep.mubr.bf16.mxu1 %v3914_v56  ;;  %v2105_v0 = vshrl.u32 %v745_v20, 16 }
 0x10f   : > { %2506 = vmatprep.mubr.bf16.mxu0 %v2099_v16  ;;  %v2103_v28 = vrot.slane %v2101_v29, 7 }
 0x110   : > { %v2107_v21 = vrot.slane %v2105_v0, 7 }
 0x112   : > { %v2110_v47 = vor.u32 %v2108_v26, %v2107_v21 }
 0x115   : > { %2600 = vmatmul.mubr.bf16.gmra.mrb[76].mxu1 %v4445_v33  ;;  %v2111_v33 = vsel %vm471_vm4, %v2103_v28, %v2110_v47 }
 0x116   : > { %2507 = vmatmul.mubr.bf16.gmra.mrb[60].mxu0 %v2087_v7  ;;  %2609 = vmatprep.mubr.bf16.mxu1 %v3914_v56 }
 0x117   : > { %2549 = vmatprep.mubr.bf16.mxu0 %v3914_v56 }
 0x11d   : > { %2610 = vmatmul.mubr.bf16.gmra.mrb[80].mxu1 %v4485_v58 }
 0x11e   : > { %2550 = vmatmul.mubr.bf16.vlgmr.msra.gmra.mrb[32].mxu0 %v4225_v12  ;;  %2619 = vmatprep.mubr.bf16.mxu1 %v3914_v56 }
 0x11f   : > { %2559 = vmatprep.mubr.bf16.mxu0 %v3914_v56 }
 0x125   : > { %2620 = vmatmul.mubr.bf16.gmra.mrb[84].mxu1 %v2111_v33 }
 0x126   : > { %2560 = vmatmul.mubr.bf16.gmra.mrb[36].mxu0 %v4264_v44 }
 0x131   : > { %v1536_v22 = vpop.f32.mrb[0].mxu0 }
 0x132   : > { %v1538_v49 = vpop.f32.mrb[1].mxu0 }
 0x133   : > { %v1540_v43 = vpop.f32.mrb[2].mxu0 }
 0x134   : > { %v1542_v27 = vpop.f32.mrb[3].mxu0 }
 0x139   : > { %v1546_v31 = vpop.f32.mrb[4].mxu0 }
 0x13a   : > { %v1548_v32 = vpop.f32.mrb[5].mxu0 }
 0x13b   : > { %v1550_v12 = vpop.f32.mrb[6].mxu0 }
 0x13c   : > { %v1552_v19 = vpop.f32.mrb[7].mxu0 }
 0x141   : > { %v1556_v58 = vpop.f32.mrb[8].mxu0 }
 0x142   : > { %v1558_v34 = vpop.f32.mrb[9].mxu0 }
 0x143   : > { %v1560_v35 = vpop.f32.mrb[10].mxu0 }
 0x144   : > { %v1562_v23 = vpop.f32.mrb[11].mxu0 }
 0x149   : > { %v1566_v56 = vpop.f32.mrb[12].mxu0 }
 0x14a   : > { %v1568_v3 = vpop.f32.mrb[13].mxu0 }
 0x14b   : > { %v1570_v39 = vpop.f32.mrb[14].mxu0 }
 0x14c   : > { %v1572_v40 = vpop.f32.mrb[15].mxu0 }
 0x150   : > { %v1423_v42 = vpop.f32.mrb[0].mxu1 }
 0x151   : > { %v1576_v54 = vpop.f32.mrb[16].mxu0  ;;  %v4847_v44 = vadd.f32 %v1536_v22, %v1423_v42  ;;  %v1425_v46 = vpop.f32.mrb[1].mxu1 }
 0x152   : > { %v1578_v48 = vpop.f32.mrb[17].mxu0  ;;  %v4849_v53 = vadd.f32 %v1538_v49, %v1425_v46  ;;  %v1427_v14 = vpop.f32.mrb[2].mxu1 }
 0x153   : > { %v1580_v38 = vpop.f32.mrb[18].mxu0  ;;  %v4851_v61 = vadd.f32 %v1540_v43, %v1427_v14  ;;  %v1429_v62 = vpop.f32.mrb[3].mxu1 }
 0x154   : > { %v1582_v63 = vpop.f32.mrb[19].mxu0  ;;  %v4853_v51 = vadd.f32 %v1542_v27, %v1429_v62 }
 0x158   : > { %v1433_v59 = vpop.f32.mrb[4].mxu1 }
 0x159   : > { %v1586_v24 = vpop.f32.mrb[20].mxu0  ;;  %v4855_v2 = vadd.f32 %v1546_v31, %v1433_v59  ;;  %v1435_v50 = vpop.f32.mrb[5].mxu1 }
 0x15a   : > { %v1588_v5 = vpop.f32.mrb[21].mxu0  ;;  %v4857_v6 = vadd.f32 %v1548_v32, %v1435_v50  ;;  %v1437_v60 = vpop.f32.mrb[6].mxu1 }
 0x15b   : > { %v1590_v25 = vpop.f32.mrb[22].mxu0  ;;  %v4859_v8 = vadd.f32 %v1550_v12, %v1437_v60  ;;  %v1439_v41 = vpop.f32.mrb[7].mxu1 }
 0x15c   : > { %v1592_v45 = vpop.f32.mrb[23].mxu0  ;;  %v4861_v36 = vadd.f32 %v1552_v19, %v1439_v41 }
 0x160   : > { %v1443_v1 = vpop.f32.mrb[8].mxu1 }
 0x161   : > { %v1596_v30 = vpop.f32.mrb[24].mxu0  ;;  %v4863_v10 = vadd.f32 %v1556_v58, %v1443_v1  ;;  %v1445_v13 = vpop.f32.mrb[9].mxu1 }
 0x162   : > { %v1598_v11 = vpop.f32.mrb[25].mxu0  ;;  %v4865_v4 = vadd.f32 %v1558_v34, %v1445_v13  ;;  %v1447_v37 = vpop.f32.mrb[10].mxu1 }
 0x163   : > { %v1600_v9 = vpop.f32.mrb[26].mxu0  ;;  %v4867_v15 = vadd.f32 %v1560_v35, %v1447_v37  ;;  %v1449_v16 = vpop.f32.mrb[11].mxu1 }
 0x164   : > { %v1602_v18 = vpop.f32.mrb[27].mxu0  ;;  %v4869_v55 = vadd.f32 %v1562_v23, %v1449_v16 }
 0x168   : > { %v1453_v17 = vpop.f32.mrb[12].mxu1 }
 0x169   : > { %v1606_v52 = vpop.f32.mrb[28].mxu0  ;;  %v4871_v57 = vadd.f32 %v1566_v56, %v1453_v17  ;;  %v1455_v7 = vpop.f32.mrb[13].mxu1 }
 0x16a   : > { %v1608_v20 = vpop.f32.mrb[29].mxu0  ;;  %v4873_v0 = vadd.f32 %v1568_v3, %v1455_v7  ;;  %v1457_v29 = vpop.f32.mrb[14].mxu1 }
 0x16b   : > { %v1610_v21 = vpop.f32.mrb[30].mxu0  ;;  %v4875_v26 = vadd.f32 %v1570_v39, %v1457_v29  ;;  %v1459_v28 = vpop.f32.mrb[15].mxu1 }
 0x16c   : > { %v1612_v47 = vpop.f32.mrb[31].mxu0  ;;  %v4877_v33 = vadd.f32 %v1572_v40, %v1459_v28 }
 0x170   : > { %v1463_v22 = vpop.f32.mrb[16].mxu1 }
 0x171   : > { %v4879_v49 = vadd.f32 %v1576_v54, %v1463_v22  ;;  %v1465_v43 = vpop.f32.mrb[17].mxu1 }
 0x172   : > { %v4881_v27 = vadd.f32 %v1578_v48, %v1465_v43  ;;  %v1467_v31 = vpop.f32.mrb[18].mxu1 }
 0x173   : > { %v4883_v32 = vadd.f32 %v1580_v38, %v1467_v31  ;;  %v1469_v12 = vpop.f32.mrb[19].mxu1 }
 0x174   : > { %v4885_v19 = vadd.f32 %v1582_v63, %v1469_v12 }
 0x178   : > { %v1473_v58 = vpop.f32.mrb[20].mxu1 }
 0x179   : > { %v4887_v34 = vadd.f32 %v1586_v24, %v1473_v58  ;;  %v1475_v35 = vpop.f32.mrb[21].mxu1 }
 0x17a   : > { %v4889_v23 = vadd.f32 %v1588_v5, %v1475_v35  ;;  %v1477_v56 = vpop.f32.mrb[22].mxu1 }
 0x17b   : > { %v4891_v3 = vadd.f32 %v1590_v25, %v1477_v56  ;;  %v1479_v39 = vpop.f32.mrb[23].mxu1 }
 0x17c   : > { %v4893_v40 = vadd.f32 %v1592_v45, %v1479_v39 }
 0x180   : > { %v1483_v42 = vpop.f32.mrb[24].mxu1 }
 0x181   : > { %v4895_v54 = vadd.f32 %v1596_v30, %v1483_v42  ;;  %v1485_v46 = vpop.f32.mrb[25].mxu1 }
 0x182   : > { %v4897_v48 = vadd.f32 %v1598_v11, %v1485_v46  ;;  %v1487_v14 = vpop.f32.mrb[26].mxu1 }
 0x183   : > { %v4899_v38 = vadd.f32 %v1600_v9, %v1487_v14  ;;  %v1489_v62 = vpop.f32.mrb[27].mxu1 }
 0x184   : > { %v4901_v63 = vadd.f32 %v1602_v18, %v1489_v62 }
 0x188   : > { %v1493_v59 = vpop.f32.mrb[28].mxu1 }
 0x189   : > { %v4903_v24 = vadd.f32 %v1606_v52, %v1493_v59  ;;  %v1495_v50 = vpop.f32.mrb[29].mxu1 }
 0x18a   : > { %v4905_v5 = vadd.f32 %v1608_v20, %v1495_v50  ;;  %v1497_v60 = vpop.f32.mrb[30].mxu1 }
 0x18b   : > { %v4907_v25 = vadd.f32 %v1610_v21, %v1497_v60  ;;  %v1499_v41 = vpop.f32.mrb[31].mxu1 }
 0x18c   : > { %v4909_v45 = vadd.f32 %v1612_v47, %v1499_v41 }
 0x190   : > { %v1889_v1 = vpop.f32.mrb[32].mxu1 }
 0x191   : > { %v4912_v30 = vadd.f32 %v1889_v1, %v4847_v44  ;;  %v1891_v13 = vpop.f32.mrb[33].mxu1 }
 0x192   : > { %v4915_v11 = vadd.f32 %v1891_v13, %v4849_v53  ;;  %v1893_v37 = vpop.f32.mrb[34].mxu1 }
 0x193   : > { %v4918_v9 = vadd.f32 %v1893_v37, %v4851_v61  ;;  %v1895_v16 = vpop.f32.mrb[35].mxu1 }
 0x194   : > { %v4921_v18 = vadd.f32 %v1895_v16, %v4853_v51 }
 0x198   : > { %v1899_v17 = vpop.f32.mrb[36].mxu1 }
 0x199   : > { %v4924_v52 = vadd.f32 %v1899_v17, %v4855_v2  ;;  %v1901_v7 = vpop.f32.mrb[37].mxu1 }
 0x19a   : > { %v4927_v44 = vadd.f32 %v1901_v7, %v4857_v6  ;;  %v1903_v20 = vpop.f32.mrb[38].mxu1 }
 0x19b   : > { %v4930_v53 = vadd.f32 %v1903_v20, %v4859_v8  ;;  %v1905_v29 = vpop.f32.mrb[39].mxu1 }
 0x19c   : > { %v4933_v61 = vadd.f32 %v1905_v29, %v4861_v36 }
 0x1a0   : > { %v1909_v21 = vpop.f32.mrb[40].mxu1 }
 0x1a1   : > { %v1910_v51 = vadd.f32 %v1909_v21, %v4863_v10  ;;  %v1911_v28 = vpop.f32.mrb[41].mxu1 }
 0x1a2   : > { %v1912_v47 = vadd.f32 %v1911_v28, %v4865_v4  ;;  %v1913_v2 = vpop.f32.mrb[42].mxu1 }
 0x1a3   : > { %v1914_v22 = vadd.f32 %v1913_v2, %v4867_v15  ;;  %v1915_v43 = vpop.f32.mrb[43].mxu1 }
 0x1a4   : > { %v1916_v6 = vadd.f32 %v1915_v43, %v4869_v55 }
 0x1a8   : > { %v1919_v31 = vpop.f32.mrb[44].mxu1 }
 0x1a9   : > { %v1920_v8 = vadd.f32 %v1919_v31, %v4871_v57  ;;  %v1921_v12 = vpop.f32.mrb[45].mxu1 }
 0x1aa   : > { %v1922_v58 = vadd.f32 %v1921_v12, %v4873_v0  ;;  %v1923_v36 = vpop.f32.mrb[46].mxu1 }
 0x1ab   : > { %v1924_v35 = vadd.f32 %v1923_v36, %v4875_v26  ;;  %v1925_v56 = vpop.f32.mrb[47].mxu1 }
 0x1ac   : > { %v1926_v10 = vadd.f32 %v1925_v56, %v4877_v33 }
 0x1b0   : > { %v1929_v39 = vpop.f32.mrb[48].mxu1 }
 0x1b1   : > { %v1930_v4 = vadd.f32 %v1929_v39, %v4879_v49  ;;  %v1931_v42 = vpop.f32.mrb[49].mxu1 }
 0x1b2   : > { %v1932_v15 = vadd.f32 %v1931_v42, %v4881_v27  ;;  %v1933_v46 = vpop.f32.mrb[50].mxu1 }
 0x1b3   : > { %v1934_v55 = vadd.f32 %v1933_v46, %v4883_v32  ;;  %v1935_v14 = vpop.f32.mrb[51].mxu1 }
 0x1b4   : > { %v1936_v57 = vadd.f32 %v1935_v14, %v4885_v19 }
 0x1b8   : > { %v1939_v62 = vpop.f32.mrb[52].mxu1 }
 0x1b9   : > { %v1940_v0 = vadd.f32 %v1939_v62, %v4887_v34  ;;  %v1941_v59 = vpop.f32.mrb[53].mxu1 }
 0x1ba   : > { %v4949_v26 = vadd.f32 %v1941_v59, %v4889_v23  ;;  %v1943_v33 = vpop.f32.mrb[54].mxu1 }
 0x1bb   : > { %v4952_v50 = vadd.f32 %v1943_v33, %v4891_v3  ;;  %v1945_v49 = vpop.f32.mrb[55].mxu1 }
 0x1bc   : > { %v4955_v27 = vadd.f32 %v1945_v49, %v4893_v40 }
 0x1c0   : > { %v1949_v60 = vpop.f32.mrb[56].mxu1 }
 0x1c1   : > { %v2458_v32 = vpop.f32.mrb[40].mxu0  ;;  %v4958_v41 = vadd.f32 %v1949_v60, %v4895_v54  ;;  %v1951_v1 = vpop.f32.mrb[57].mxu1 }
 0x1c2   : > { %v3469_v19 = vadd.f32 %v2458_v32, %v1910_v51  ;;  %v2460_v34 = vpop.f32.mrb[41].mxu0  ;;  %v4961_v13 = vadd.f32 %v1951_v1, %v4897_v48  ;;  %v1953_v37 = vpop.f32.mrb[58].mxu1 }
 0x1c3   : > { %v3473_v23 = vadd.f32 %v2460_v34, %v1912_v47  ;;  %v2462_v16 = vpop.f32.mrb[42].mxu0  ;;  %v4964_v3 = vadd.f32 %v1953_v37, %v4899_v38  ;;  %v1955_v40 = vpop.f32.mrb[59].mxu1 }
 0x1c4   : > { %v3477_v17 = vadd.f32 %v2462_v16, %v1914_v22  ;;  %v2464_v7 = vpop.f32.mrb[43].mxu0  ;;  %v4967_v20 = vadd.f32 %v1955_v40, %v4901_v63 }
 0x1c5   : > { %v3481_v54 = vadd.f32 %v2464_v7, %v1916_v6 }
 0x1c8   : > { %v1959_v29 = vpop.f32.mrb[60].mxu1 }
 0x1c9   : > { %v2468_v21 = vpop.f32.mrb[44].mxu0  ;;  %v4970_v51 = vadd.f32 %v1959_v29, %v4903_v24  ;;  %v1961_v28 = vpop.f32.mrb[61].mxu1 }
 0x1ca   : > { %v3485_v48 = vadd.f32 %v2468_v21, %v1920_v8  ;;  %v2470_v47 = vpop.f32.mrb[45].mxu0  ;;  %v4973_v2 = vadd.f32 %v1961_v28, %v4905_v5  ;;  %v1963_v43 = vpop.f32.mrb[62].mxu1 }
 0x1cb   : > { %v3489_v38 = vadd.f32 %v2470_v47, %v1922_v58  ;;  %v2472_v22 = vpop.f32.mrb[46].mxu0  ;;  %v4976_v31 = vadd.f32 %v1963_v43, %v4907_v25  ;;  %v1965_v12 = vpop.f32.mrb[63].mxu1 }
 0x1cc   : > { %v3493_v63 = vadd.f32 %v2472_v22, %v1924_v35  ;;  %v2474_v6 = vpop.f32.mrb[47].mxu0  ;;  %v4979_v36 = vadd.f32 %v1965_v12, %v4909_v45 }
 0x1cd   : > { %v3497_v24 = vadd.f32 %v2474_v6, %v1926_v10 }
 0x1d0   : > { %v2571_v8 = vpop.f32.mrb[64].mxu1 }
 0x1d1   : > { %v2478_v56 = vpop.f32.mrb[48].mxu0  ;;  %v4981_v42 = vadd.f32 %v3469_v19, %v2571_v8  ;;  %v2573_v58 = vpop.f32.mrb[65].mxu1 }
 0x1d2   : > { %v3501_v39 = vadd.f32 %v2478_v56, %v1930_v4  ;;  %v2480_v5 = vpop.f32.mrb[49].mxu0  ;;  %v4983_v14 = vadd.f32 %v3473_v23, %v2573_v58  ;;  %v2575_v35 = vpop.f32.mrb[66].mxu1 }
 0x1d3   : > { %v3505_v46 = vadd.f32 %v2480_v5, %v1932_v15  ;;  %v2482_v25 = vpop.f32.mrb[50].mxu0  ;;  %v4985_v59 = vadd.f32 %v3477_v17, %v2575_v35  ;;  %v2577_v33 = vpop.f32.mrb[67].mxu1 }
 0x1d4   : > { %v3509_v62 = vadd.f32 %v2482_v25, %v1934_v55  ;;  %v2484_v45 = vpop.f32.mrb[51].mxu0  ;;  %v3415_v10 = vpack.c.bf16 %v4983_v14, %v4981_v42  ;;  %v4989_v4 = vadd.f32 %v3481_v54, %v2577_v33 }
 0x1d5   : > { %v3513_v49 = vadd.f32 %v2484_v45, %v1936_v57 }
 0x1d6   : > { %2762 = vst [vmem:[%s4049_s16 + $0x20] sm:$0xff] %v3415_v10  ;;  %v3416_v60 = vpack.c.bf16 %v4989_v4, %v4985_v59 }
 0x1d8   : > { %2763 = vst [vmem:[%s4049_s16 + $0x28] sm:$0xff] %v3416_v60  ;;  %v2581_v32 = vpop.f32.mrb[68].mxu1 }
 0x1d9   : > { %v2488_v15 = vpop.f32.mrb[52].mxu0  ;;  %v4995_v55 = vadd.f32 %v3485_v48, %v2581_v32  ;;  %v2583_v34 = vpop.f32.mrb[69].mxu1 }
 0x1da   : > { %v3517_v19 = vadd.f32 %v2488_v15, %v1940_v0  ;;  %v2490_v1 = vpop.f32.mrb[53].mxu0  ;;  %v4998_v37 = vadd.f32 %v3489_v38, %v2583_v34  ;;  %v2585_v16 = vpop.f32.mrb[70].mxu1 }
 0x1db   : > { %v3521_v23 = vadd.f32 %v2490_v1, %v4949_v26  ;;  %v2492_v57 = vpop.f32.mrb[54].mxu0  ;;  %v5001_v40 = vadd.f32 %v3493_v63, %v2585_v16  ;;  %v2587_v54 = vpop.f32.mrb[71].mxu1 }
 0x1dc   : > { %v3525_v17 = vadd.f32 %v2492_v57, %v4952_v50  ;;  %v2494_v7 = vpop.f32.mrb[55].mxu0  ;;  %v3417_v0 = vpack.c.bf16 %v4998_v37, %v4995_v55  ;;  %v5006_v21 = vadd.f32 %v3497_v24, %v2587_v54 }
 0x1dd   : > { %v3529_v29 = vadd.f32 %v2494_v7, %v4955_v27 }
 0x1de   : > { %2764 = vst [vmem:[%s4049_s16 + $0x30] sm:$0xff] %v3417_v0  ;;  %v3418_v26 = vpack.c.bf16 %v5006_v21, %v5001_v40 }
 0x1e0   : > { %2765 = vst [vmem:[%s4049_s16 + $0x38] sm:$0xff] %v3418_v26  ;;  %v2591_v28 = vpop.f32.mrb[72].mxu1 }
 0x1e1   : > { %v2498_v48 = vpop.f32.mrb[56].mxu0  ;;  %v5013_v47 = vadd.f32 %v3501_v39, %v2591_v28  ;;  %v2593_v43 = vpop.f32.mrb[73].mxu1 }
 0x1e2   : > { %v3533_v50 = vadd.f32 %v2498_v48, %v4958_v41  ;;  %v2500_v38 = vpop.f32.mrb[57].mxu0  ;;  %v5016_v27 = vadd.f32 %v3505_v46, %v2593_v43  ;;  %v2595_v12 = vpop.f32.mrb[74].mxu1 }
 0x1e3   : > { %v3537_v22 = vadd.f32 %v2500_v38, %v4961_v13  ;;  %v2502_v63 = vpop.f32.mrb[58].mxu0  ;;  %v5019_v24 = vadd.f32 %v3509_v62, %v2595_v12  ;;  %v2597_v8 = vpop.f32.mrb[75].mxu1 }
 0x1e4   : > { %v3541_v6 = vadd.f32 %v2502_v63, %v4964_v3  ;;  %v2504_v56 = vpop.f32.mrb[59].mxu0  ;;  %v3419_v41 = vpack.c.bf16 %v5016_v27, %v5013_v47  ;;  %v5024_v5 = vadd.f32 %v3513_v49, %v2597_v8 }
 0x1e5   : > { %v3545_v39 = vadd.f32 %v2504_v56, %v4967_v20 }
 0x1e6   : > { %2766 = vst [vmem:[%s4049_s16 + $0x40] sm:$0xff] %v3419_v41  ;;  %v3420_v13 = vpack.c.bf16 %v5024_v5, %v5019_v24 }
 0x1e8   : > { %2767 = vst [vmem:[%s4049_s16 + $0x48] sm:$0xff] %v3420_v13  ;;  %v2601_v46 = vpop.f32.mrb[76].mxu1 }
 0x1e9   : > { %v2508_v58 = vpop.f32.mrb[60].mxu0  ;;  %v5031_v25 = vadd.f32 %v3517_v19, %v2601_v46  ;;  %v2603_v62 = vpop.f32.mrb[77].mxu1 }
 0x1ea   : > { %v3549_v3 = vadd.f32 %v2508_v58, %v4970_v51  ;;  %v2510_v35 = vpop.f32.mrb[61].mxu0  ;;  %v5034_v20 = vadd.f32 %v3521_v23, %v2603_v62  ;;  %v2605_v10 = vpop.f32.mrb[78].mxu1 }
 0x1eb   : > { %v3553_v45 = vadd.f32 %v2510_v35, %v4973_v2  ;;  %v2512_v33 = vpop.f32.mrb[62].mxu0  ;;  %v5039_v60 = vadd.f32 %v3525_v17, %v2605_v10  ;;  %v2607_v32 = vpop.f32.mrb[79].mxu1 }
 0x1ec   : > { %v5037_v49 = vadd.f32 %v2512_v33, %v4976_v31  ;;  %v2514_v15 = vpop.f32.mrb[63].mxu0  ;;  %v3421_v51 = vpack.c.bf16 %v5034_v20, %v5031_v25  ;;  %v5046_v1 = vadd.f32 %v3529_v29, %v2607_v32 }
 0x1ed   : > { %v5044_v19 = vadd.f32 %v2514_v15, %v4979_v36 }
 0x1ee   : > { %2768 = vst [vmem:[%s4049_s16 + $0x50] sm:$0xff] %v3421_v51  ;;  %v3422_v2 = vpack.c.bf16 %v5046_v1, %v5039_v60 }
 0x1f0   : > { %2769 = vst [vmem:[%s4049_s16 + $0x58] sm:$0xff] %v3422_v2  ;;  %v2611_v31 = vpop.f32.mrb[80].mxu1 }
 0x1f1   : > { %v2551_v34 = vpop.f32.mrb[32].mxu0  ;;  %v5053_v57 = vadd.f32 %v3533_v50, %v2611_v31  ;;  %v2613_v17 = vpop.f32.mrb[81].mxu1 }
 0x1f2   : > { %v3445_v23 = vadd.f32 %v2551_v34, %v4912_v30  ;;  %v2553_v16 = vpop.f32.mrb[33].mxu0  ;;  %v5056_v36 = vadd.f32 %v3537_v22, %v2613_v17  ;;  %v2615_v0 = vpop.f32.mrb[82].mxu1 }
 0x1f3   : > { %v3448_v7 = vadd.f32 %v2553_v16, %v4915_v11  ;;  %v2555_v54 = vpop.f32.mrb[34].mxu0  ;;  %v5059_v26 = vadd.f32 %v3541_v6, %v2615_v0  ;;  %v2617_v28 = vpop.f32.mrb[83].mxu1 }
 0x1f4   : > { %v3451_v29 = vadd.f32 %v2555_v54, %v4918_v9  ;;  %v2557_v48 = vpop.f32.mrb[35].mxu0  ;;  %v3423_v30 = vpack.c.bf16 %v5056_v36, %v5053_v57  ;;  %v2816_v50 = vmul.f32 %v3445_v23, %v3445_v23  ;;  %v5066_v12 = vadd.f32 %v3545_v39, %v2617_v28 }
 0x1f5   : > { %v3411_v38 = vpack.c.bf16 %v3448_v7, %v3445_v23  ;;  %v3454_v11 = vadd.f32 %v2557_v48, %v4921_v18  ;;  %v2817_v22 = vmul.f32 %v3448_v7, %v3448_v7  ;;  %v2824_v48 = vmul.f32 %v4981_v42, %v4981_v42 }
 0x1f6   : > { %v2774_v43 = vadd.f32 %v3451_v29, %v3445_v23  ;;  %v2818_v63 = vmul.f32 %v3451_v29, %v3451_v29  ;;  %2770 = vst [vmem:[%s4049_s16 + $0x60] sm:$0xff] %v3423_v30  ;;  %v3424_v41 = vpack.c.bf16 %v5066_v12, %v5059_v26 }
 0x1f7   : > { %2758 = vst [vmem:[%s4049_s16] sm:$0xff] %v3411_v38  ;;  %v3412_v6 = vpack.c.bf16 %v3454_v11, %v3451_v29  ;;  %v2795_v56 = vadd.f32 %v3454_v11, %v3448_v7  ;;  %v2819_v8 = vmul.f32 %v3454_v11, %v3454_v11 }
 0x1f8   : > { %v2848_v9 = vadd.f32 %v2818_v63, %v2816_v50  ;;  %v2621_v58 = vpop.f32.mrb[84].mxu1  ;;  %2771 = vst [vmem:[%s4049_s16 + $0x68] sm:$0xff] %v3424_v41  ;;  %v2826_v63 = vmul.f32 %v4985_v59, %v4985_v59 }
 0x1f9   : > { %v2561_v13 = vpop.f32.mrb[36].mxu0  ;;  %2759 = vst [vmem:[%s4049_s16 + $0x8] sm:$0xff] %v3412_v6  ;;  %v2869_v46 = vadd.f32 %v2819_v8, %v2817_v22  ;;  %v5072_v18 = vadd.f32 %v3549_v3, %v2621_v58  ;;  %v2623_v33 = vpop.f32.mrb[85].mxu1 }
 0x1fa   : > { %v3457_v35 = vadd.f32 %v2561_v13, %v4924_v52  ;;  %v2563_v62 = vpop.f32.mrb[37].mxu0  ;;  %v5076_v10 = vadd.f32 %v3553_v45, %v2623_v33  ;;  %v2625_v32 = vpop.f32.mrb[86].mxu1  ;;  %v2830_v13 = vmul.f32 %v5001_v40, %v5001_v40 }
 0x1fb   : > { %v3460_v39 = vadd.f32 %v2563_v62, %v4927_v44  ;;  %v2565_v15 = vpop.f32.mrb[38].mxu0  ;;  %v2627_v23 = vpop.f32.mrb[87].mxu1  ;;  %v5084_v0 = vadd.f32 %v5037_v49, %v2625_v32  ;;  %v2832_v62 = vmul.f32 %v5013_v47, %v5013_v47 }
 0x1fc   : > { %v2775_v51 = vadd.f32 %v3457_v35, %v2774_v43  ;;  %v2820_v2 = vmul.f32 %v3457_v35, %v3457_v35  ;;  %v3463_v34 = vadd.f32 %v2565_v15, %v4930_v53  ;;  %v2567_v31 = vpop.f32.mrb[39].mxu0  ;;  %v3425_v17 = vpack.c.bf16 %v5076_v10, %v5072_v18 }
 0x1fd   : > { %v3413_v52 = vpack.c.bf16 %v3460_v39, %v3457_v35  ;;  %v2796_v3 = vadd.f32 %v3460_v39, %v2795_v56  ;;  %v2821_v16 = vmul.f32 %v3460_v39, %v3460_v39  ;;  %v3466_v53 = vadd.f32 %v2567_v31, %v4933_v61 }
 0x1fe   : > { %v2849_v7 = vadd.f32 %v2848_v9, %v2820_v2  ;;  %v2776_v44 = vadd.f32 %v3463_v34, %v2775_v51  ;;  %v2822_v54 = vmul.f32 %v3463_v34, %v3463_v34  ;;  %2772 = vst [vmem:[%s4049_s16 + $0x70] sm:$0xff] %v3425_v17  ;;  %v5088_v29 = vadd.f32 %v5044_v19, %v2627_v23 }
 0x1ff   : > { %2760 = vst [vmem:[%s4049_s16 + $0x10] sm:$0xff] %v3413_v52  ;;  %v2870_v45 = vadd.f32 %v2869_v46, %v2821_v16  ;;  %v3414_v30 = vpack.c.bf16 %v3466_v53, %v3463_v34  ;;  %v2797_v50 = vadd.f32 %v3466_v53, %v2796_v3  ;;  %v2823_v43 = vmul.f32 %v3466_v53, %v3466_v53 }
 0x200   : > { %v2777_v28 = vadd.f32 %v4981_v42, %v2776_v44  ;;  %v2850_v38 = vadd.f32 %v2849_v7, %v2822_v54  ;;  %v3426_v61 = vpack.c.bf16 %v5088_v29, %v5084_v0  ;;  %v2825_v19 = vmul.f32 %v4983_v14, %v4983_v14 }
 0x201   : > { %2761 = vst [vmem:[%s4049_s16 + $0x18] sm:$0xff] %v3414_v30  ;;  %v2798_v42 = vadd.f32 %v4983_v14, %v2797_v50  ;;  %v2871_v22 = vadd.f32 %v2870_v45, %v2823_v43  ;;  %v2828_v9 = vmul.f32 %v4995_v55, %v4995_v55  ;;  %v2829_v46 = vmul.f32 %v4998_v37, %v4998_v37 }
 0x202   : > { %v2778_v49 = vadd.f32 %v4985_v59, %v2777_v28  ;;  %v2851_v11 = vadd.f32 %v2850_v38, %v2824_v48  ;;  %2773 = vst [vmem:[%s4049_s16 + $0x78] sm:$0xff] %v3426_v61  ;;  %v2827_v59 = vmul.f32 %v4989_v4, %v4989_v4 }
 0x203   : > { %v2799_v8 = vadd.f32 %v4989_v4, %v2798_v42  ;;  %v2872_v41 = vadd.f32 %v2871_v22, %v2825_v19  ;;  %v2831_v4 = vmul.f32 %v5006_v21, %v5006_v21  ;;  %v2846_v19 = vmul.f32 %v5084_v0, %v5084_v0 }
 0x204   : > { %v2779_v6 = vadd.f32 %v4995_v55, %v2778_v49  ;;  %v2852_v56 = vadd.f32 %v2851_v11, %v2826_v63 }
 0x205   : > { %v2800_v35 = vadd.f32 %v4998_v37, %v2799_v8  ;;  %v2873_v55 = vadd.f32 %v2872_v41, %v2827_v59  ;;  %v2833_v37 = vmul.f32 %v5016_v27, %v5016_v27 }
 0x206   : > { %v2780_v58 = vadd.f32 %v5001_v40, %v2779_v6  ;;  %v2853_v14 = vadd.f32 %v2852_v56, %v2828_v9  ;;  %v2834_v40 = vmul.f32 %v5019_v24, %v5019_v24 }
 0x207   : > { %v2801_v15 = vadd.f32 %v5006_v21, %v2800_v35  ;;  %v2874_v32 = vadd.f32 %v2873_v55, %v2829_v46  ;;  %v2835_v21 = vmul.f32 %v5024_v5, %v5024_v5 }
 0x208   : > { %v2781_v33 = vadd.f32 %v5013_v47, %v2780_v58  ;;  %v2854_v39 = vadd.f32 %v2853_v14, %v2830_v13  ;;  %v2836_v47 = vmul.f32 %v5031_v25, %v5031_v25 }
 0x209   : > { %v2802_v34 = vadd.f32 %v5016_v27, %v2801_v15  ;;  %v2875_v31 = vadd.f32 %v2874_v32, %v2831_v4  ;;  %v2837_v27 = vmul.f32 %v5034_v20, %v5034_v20 }
 0x20a   : > { %v2855_v51 = vadd.f32 %v2854_v39, %v2832_v62  ;;  %v2782_v2 = vadd.f32 %v5019_v24, %v2781_v33  ;;  %v2838_v24 = vmul.f32 %v5039_v60, %v5039_v60 }
 0x20b   : > { %v2876_v3 = vadd.f32 %v2875_v31, %v2833_v37  ;;  %v2803_v16 = vadd.f32 %v5024_v5, %v2802_v34  ;;  %v2839_v5 = vmul.f32 %v5046_v1, %v5046_v1 }
 0x20c   : > { %v2783_v23 = vadd.f32 %v5031_v25, %v2782_v2  ;;  %v2856_v52 = vadd.f32 %v2855_v51, %v2834_v40  ;;  %v2840_v25 = vmul.f32 %v5053_v57, %v5053_v57 }
 0x20d   : > { %v2804_v44 = vadd.f32 %v5034_v20, %v2803_v16  ;;  %v2877_v54 = vadd.f32 %v2876_v3, %v2835_v21  ;;  %v2841_v20 = vmul.f32 %v5056_v36, %v5056_v36 }
 0x20e   : > { %v2784_v17 = vadd.f32 %v5039_v60, %v2783_v23  ;;  %v2857_v7 = vadd.f32 %v2856_v52, %v2836_v47  ;;  %v2842_v60 = vmul.f32 %v5059_v26, %v5059_v26 }
 0x20f   : > { %v2805_v48 = vadd.f32 %v5046_v1, %v2804_v44  ;;  %v2878_v28 = vadd.f32 %v2877_v54, %v2837_v27  ;;  %v2843_v1 = vmul.f32 %v5066_v12, %v5066_v12 }
 0x210   : > { %v2785_v45 = vadd.f32 %v5053_v57, %v2784_v17  ;;  %v2858_v53 = vadd.f32 %v2857_v7, %v2838_v24  ;;  %v2844_v57 = vmul.f32 %v5072_v18, %v5072_v18 }
 0x211   : > { %v2806_v50 = vadd.f32 %v5056_v36, %v2805_v48  ;;  %v2879_v43 = vadd.f32 %v2878_v28, %v2839_v5  ;;  %v2845_v36 = vmul.f32 %v5076_v10, %v5076_v10 }
 0x212   : > { %v2786_v38 = vadd.f32 %v5059_v26, %v2785_v45  ;;  %v2859_v30 = vadd.f32 %v2858_v53, %v2840_v25 }
 0x213   : > { %v2807_v11 = vadd.f32 %v5066_v12, %v2806_v50  ;;  %v2880_v61 = vadd.f32 %v2879_v43, %v2841_v20  ;;  %v2847_v12 = vmul.f32 %v5088_v29, %v5088_v29 }
 0x214   : > { %v2787_v63 = vadd.f32 %v5072_v18, %v2786_v38  ;;  %v2860_v49 = vadd.f32 %v2859_v30, %v2842_v60 }
 0x215   : > { %v2808_v22 = vadd.f32 %v5076_v10, %v2807_v11  ;;  %v2881_v9 = vadd.f32 %v2880_v61, %v2843_v1 }
 0x216   : > { %v2788_v26 = vadd.f32 %v5084_v0, %v2787_v63  ;;  %v2861_v42 = vadd.f32 %v2860_v49, %v2844_v57 }
 0x217   : > { %v2809_v56 = vadd.f32 %v5088_v29, %v2808_v22  ;;  %v2882_v59 = vadd.f32 %v2881_v9, %v2845_v36 }
 0x218   : > { %v2789_v18 = vrot.slane %v2788_v26, 4  ;;  %v2862_v6 = vadd.f32 %v2861_v42, %v2846_v19 }
 0x219   : > { %v2810_v13 = vrot.slane %v2809_v56, 4  ;;  %v2883_v58 = vadd.f32 %v2882_v59, %v2847_v12 }
 0x21a   : > { %v2790_v8 = vadd.f32 %v2789_v18, %v2788_v26  ;;  %v2863_v41 = vrot.slane %v2862_v6, 4 }
 0x21b   : > { %v2811_v46 = vadd.f32 %v2810_v13, %v2809_v56  ;;  %v2884_v35 = vrot.slane %v2883_v58, 4 }
 0x21c   : > { %v2791_v0 = vrot.slane %v2790_v8, 2  ;;  %v2864_v14 = vadd.f32 %v2863_v41, %v2862_v6 }
 0x21d   : > { %v2812_v10 = vrot.slane %v2811_v46, 2  ;;  %v2885_v33 = vadd.f32 %v2884_v35, %v2883_v58 }
 0x21e   : > { %v2792_v55 = vadd.f32 %v2791_v0, %v2790_v8  ;;  %v2865_v62 = vrot.slane %v2864_v14, 2 }
 0x21f   : > { %v2813_v15 = vadd.f32 %v2812_v10, %v2811_v46  ;;  %v2886_v32 = vrot.slane %v2885_v33, 2 }
 0x220   : > { %v2793_v39 = vrot.slane %v2792_v55, 1  ;;  %v2866_v4 = vadd.f32 %v2865_v62, %v2864_v14 }
 0x221   : > { %v2814_v29 = vrot.slane %v2813_v15, 1  ;;  %v2887_v51 = vadd.f32 %v2886_v32, %v2885_v33 }
 0x222   : > { %v2867_v40 = vrot.slane %v2866_v4, 1  ;;  %v2794_v2 = vadd.f32 %v2793_v39, %v2792_v55 }
 0x223   : > { %v2888_v34 = vrot.slane %v2887_v51, 1  ;;  %v2815_v47 = vadd.f32 %v2814_v29, %v2813_v15 }
 0x224   : > { %v2868_v37 = vadd.f32 %v2867_v40, %v2866_v4 }
 0x225   : > { %v2889_v23 = vadd.f32 %v2888_v34, %v2887_v51 }
 0x226   : > { %v2891_v31 = vsel %vm470_vm2, %v2794_v2, %v2868_v37 }
 0x227   : > { %v2892_v52 = vsel %vm470_vm2, %v2815_v47, %v2889_v23 }
 0x228   : > { %v2895_v21 = vcombine.low %v2891_v31, %v2892_v52 }
 0x22a   : > { %3406 = vst.sshfl [vmem:[%s4055_s6] sm:$0x33 pattern:$0x76325410] %v2895_v21 }
 0x22b PF: > { %s16_s22 = sadd.s32 1, %s3910_s22   ;;  %s5198_s19 = sld [smem:[#allocation3_spill]] }
 0x22c   : > { %p13_p13 = scmp.ge.s32.totalorder %s16_s22, 6   ;;  %s5199_s16 = sld [smem:[#allocation4_spill]] }
 0x22d   : > { %s5200_s21 = sld [smem:[#allocation5_spill]]  ;;  %s5201_s18 = smov %s3902_s20 }
 0x22e   :  { %15 = sbr.rel (!%p13_p13) target bundleno = 3 (0x3), region = 96 }
 0x232   : > { %s5202_s20 = smov %s5199_s16 }

</bundles_post_ra>
